<compile_context>
chip_gen: v7x
topology: tpu7x:2x2x1
jax: 0.10.0
libtpu: 0.0.40
codegen_flags: <defaults>
</compile_context>

<pallas_src>
import numpy as np

import jax
import jax.numpy as jnp
from jax.experimental import pallas as pl

# ----------------------------- model sizes ---------------------------------
B = 2              # batch
S = 8              # input sequence length
T = 6              # target (equation) length
E = 32             # embedding_size
H = 32             # hidden_size
L = 16             # latent_size
VOCAB_IN = 30      # len(dataset.in_idx2word)
VOCAB_OUT = 20     # len(dataset.out_idx2symbol)
SOS_IDX = 1        # sos_token_idx

# padded / fused layout constants
VP_IN = 32         # in-vocab rows padded (one-hot width, fwd or bwd half)
VP_OUT = 32        # out-vocab rows padded (one-hot width)
GP = 128           # per-gate lane padding (r | z | n each 128 lanes wide)
NG = 3 * GP        # fused gate width
HP = 128           # padded hidden lanes carried for the recurrent state
V_PAD = 128        # lane-dense padded output vocab
NEG_BIG = -1e9     # bias fill for padded vocab columns (exp underflows to exactly 0)


# --------------------------- fused forward kernel ---------------------------
def _rnnvae_fused_kernel(
        encf_ref, encb_ref, decid_ref, eps_ref,
        ew_enc_ref, bx_enc_ref, whh_enc_ref, bhn_enc_ref,
        ew_dec_ref, wiz_dec_ref, bx_dec_ref, whh_dec_ref, bhn_dec_ref,
        wml_ref, bml_ref, wout_ref, bout_ref,
        out_ref):
    """Entire RNNVAE teacher-forced forward, VMEM-resident, single invocation.

    encf_ref/encb_ref: (S*B, 1) int32 fwd / reversed encoder token ids (row t*B+b)
    decid_ref:         (T*B, 1) int32 decoder input ids ([SOS, target[:-1]], row t*B+b)
    eps_ref:           (B, 128) f32 reparameterization noise (zero-padded past L)
    out_ref:           (B*T, 128) f32 log-softmax over the padded vocab, row b*T+t
    """
    f32 = jnp.float32

    # ---- fused embedding + input projection for ALL encoder steps (one dot) ----
    # one-hot over [fwd vocab (32) | bwd vocab (32)]; ew_enc = blockdiag(Ein@Wih_f, Ein@Wih_b)
    ids_f = encf_ref[...]                                             # (S*B, 1)
    ids_b = encb_ref[...]                                             # (S*B, 1)
    iota_e = jax.lax.broadcasted_iota(jnp.int32, (S * B, 2 * VP_IN), 1)
    oh_enc = ((iota_e == ids_f) | (iota_e == ids_b + VP_IN)).astype(f32)
    gi_enc = jnp.dot(oh_enc, ew_enc_ref[...],
                     preferred_element_type=f32) + bx_enc_ref[...]    # (S*B, 384)

    # ---- bidirectional encoder GRU: fwd & bwd fused via block-diagonal W_hh ----
    # state layout: lanes [0:32]=h_f, [32:64]=h_b, [64:128]=0 (stays exactly 0)
    h_enc = jnp.zeros((B, HP), f32)
    for t in range(S):                       # static trip count -> fully unrolled
        gi = gi_enc[t * B:(t + 1) * B, :]    # off the serial chain (no h dependence)
        gh = jnp.dot(h_enc, whh_enc_ref[...], preferred_element_type=f32)
        r = jax.nn.sigmoid(gi[:, 0:GP] + gh[:, 0:GP])
        zg = jax.nn.sigmoid(gi[:, GP:2 * GP] + gh[:, GP:2 * GP])
        n = jnp.tanh(gi[:, 2 * GP:3 * GP] + r * (gh[:, 2 * GP:3 * GP] + bhn_enc_ref[...]))
        h_enc = (1.0 - zg) * n + zg * h_enc

    # ---- VAE reparameterization head (mean / logvar fused, lane-aligned slices) ----
    ml = jnp.dot(h_enc, wml_ref[...], preferred_element_type=f32) + bml_ref[...]  # (B, 256)
    mean = ml[:, 0:GP]
    logvar = ml[:, GP:2 * GP]
    z_lat = mean + eps_ref[...] * jnp.exp(0.5 * logvar)               # (B, 128), pad lanes 0

    # ---- decoder: all-step embedding+input projection and latent projection (hoisted) ----
    iota_d = jax.lax.broadcasted_iota(jnp.int32, (T * B, VP_OUT), 1)
    oh_dec = (iota_d == decid_ref[...]).astype(f32)                   # (T*B, 32)
    gi_dec = jnp.dot(oh_dec, ew_dec_ref[...], preferred_element_type=f32)         # (T*B, 384)
    gz = jnp.dot(z_lat, wiz_dec_ref[...],
                 preferred_element_type=f32) + bx_dec_ref[...]        # (B, 384), loop-invariant

    # decoder initial hidden = forward-direction encoder final hidden (hidden_states[::2])
    lane = jax.lax.broadcasted_iota(jnp.int32, (B, HP), 1)
    h_dec = jnp.where(lane < H, h_enc, 0.0)                           # lanes >=32 zeroed

    hs = []
    for t in range(T):                       # static trip count -> fully unrolled
        gi = gi_dec[t * B:(t + 1) * B, :] + gz
        gh = jnp.dot(h_dec, whh_dec_ref[...], preferred_element_type=f32)
        r = jax.nn.sigmoid(gi[:, 0:GP] + gh[:, 0:GP])
        zg = jax.nn.sigmoid(gi[:, GP:2 * GP] + gh[:, GP:2 * GP])
        n = jnp.tanh(gi[:, 2 * GP:3 * GP] + r * (gh[:, 2 * GP:3 * GP] + bhn_dec_ref[...]))
        h_dec = (1.0 - zg) * n + zg * h_dec
        hs.append(h_dec)

    # ---- batched output projection + log_softmax, one dense (B*T, 128) store ----
    # rows emitted directly in PyTorch order b*T + t (no wrapper transpose needed)
    hcat = jnp.concatenate([hs[t][b:b + 1, :] for b in range(B) for t in range(T)],
                           axis=0)                                    # (B*T, 128)
    logits = jnp.dot(hcat, wout_ref[...], preferred_element_type=f32) + bout_ref[...]
    m = jnp.max(logits, axis=-1, keepdims=True)
    shifted = logits - m
    lse = jnp.log(jnp.sum(jnp.exp(shifted), axis=-1, keepdims=True))
    out_ref[...] = shifted - lse


# ----------------------------- parameters ----------------------------------
def init_params(key):
    """PyTorch-layout parameters (gate order r, z, n)."""
    ks = jax.random.split(key, 20)
    k_rnn = 1.0 / jnp.sqrt(H)

    def u(k, shape, scale):
        return jax.random.uniform(k, shape, jnp.float32, -scale, scale)

    p = {}
    p['emb_in'] = jax.random.normal(ks[0], (VOCAB_IN, E), jnp.float32)
    p['emb_out'] = jax.random.normal(ks[1], (VOCAB_OUT, E), jnp.float32)

    # encoder: bidirectional GRU, 1 layer
    p['enc_f_wih'] = u(ks[2], (3, E, H), k_rnn)
    p['enc_f_whh'] = u(ks[3], (3, H, H), k_rnn)
    p['enc_f_bih'] = u(ks[4], (3, 1, H), k_rnn)
    p['enc_f_bhh'] = u(ks[5], (3, 1, H), k_rnn)
    p['enc_b_wih'] = u(ks[6], (3, E, H), k_rnn)
    p['enc_b_whh'] = u(ks[7], (3, H, H), k_rnn)
    p['enc_b_bih'] = u(ks[8], (3, 1, H), k_rnn)
    p['enc_b_bhh'] = u(ks[9], (3, 1, H), k_rnn)

    # decoder: GRU, 1 layer, input size E + L ([embedding | latent z])
    p['dec_wih'] = u(ks[10], (3, E + L, H), k_rnn)
    p['dec_whh'] = u(ks[11], (3, H, H), k_rnn)
    p['dec_bih'] = u(ks[12], (3, 1, H), k_rnn)
    p['dec_bhh'] = u(ks[13], (3, 1, H), k_rnn)

    # hidden_to_mean / hidden_to_logvar: Linear(2H -> L)
    k_lin = 1.0 / jnp.sqrt(2 * H)
    p['w_mean'] = u(ks[14], (2 * H, L), k_lin)
    p['b_mean'] = u(ks[15], (1, L), k_lin)
    p['w_logvar'] = u(ks[16], (2 * H, L), k_lin)
    p['b_logvar'] = u(ks[17], (1, L), k_lin)

    # out: Linear(H -> symbol_size)
    k_out = 1.0 / jnp.sqrt(H)
    p['w_out'] = u(ks[18], (H, VOCAB_OUT), k_out)
    p['b_out'] = u(ks[19], (1, VOCAB_OUT), k_out)

    # NOTE: latent_to_hidden exists in __init__ but is unused in forward(); omitted.
    return p


def pack_params(p):
    """Host-side packing into the fused-kernel layout (done once, outside jit).

    Gate layout along lanes: [r | z | n], each gate padded to 128 lanes.
    Within a gate: encoder uses [fwd(32) | bwd(32) | pad], decoder uses [dir(32) | pad].
    Embedding tables are pre-multiplied into the GRU input weights so the kernel's
    one-hot matmul performs gather + input projection in a single MXU dot.
    """
    f32 = jnp.float32
    emb_in_pad = jnp.zeros((VP_IN, E), f32).at[:VOCAB_IN].set(p['emb_in'])
    emb_out_pad = jnp.zeros((VP_OUT, E), f32).at[:VOCAB_OUT].set(p['emb_out'])

    ew_enc = jnp.zeros((2 * VP_IN, NG), f32)
    bx_enc = jnp.zeros((1, NG), f32)
    whh_enc = jnp.zeros((HP, NG), f32)
    for g in range(3):
        c = g * GP
        ew_enc = ew_enc.at[:VP_IN, c:c + H].set(emb_in_pad @ p['enc_f_wih'][g])
        ew_enc = ew_enc.at[VP_IN:, c + H:c + 2 * H].set(emb_in_pad @ p['enc_b_wih'][g])
        whh_enc = whh_enc.at[:H, c:c + H].set(p['enc_f_whh'][g])
        whh_enc = whh_enc.at[H:2 * H, c + H:c + 2 * H].set(p['enc_b_whh'][g])
        if g < 2:   # r, z: fold input + hidden biases
            bx_enc = bx_enc.at[:, c:c + H].set(p['enc_f_bih'][g] + p['enc_f_bhh'][g])
            bx_enc = bx_enc.at[:, c + H:c + 2 * H].set(p['enc_b_bih'][g] + p['enc_b_bhh'][g])
        else:       # n: input bias only; hidden bias applied inside r * (...)
            bx_enc = bx_enc.at[:, c:c + H].set(p['enc_f_bih'][g])
            bx_enc = bx_enc.at[:, c + H:c + 2 * H].set(p['enc_b_bih'][g])
    bhn_enc = jnp.zeros((1, HP), f32)
    bhn_enc = bhn_enc.at[:, :H].set(p['enc_f_bhh'][2])
    bhn_enc = bhn_enc.at[:, H:2 * H].set(p['enc_b_bhh'][2])

    ew_dec = jnp.zeros((VP_OUT, NG), f32)
    wiz_dec = jnp.zeros((HP, NG), f32)
    bx_dec = jnp.zeros((1, NG), f32)
    whh_dec = jnp.zeros((HP, NG), f32)
    for g in range(3):
        c = g * GP
        ew_dec = ew_dec.at[:, c:c + H].set(emb_out_pad @ p['dec_wih'][g][:E])
        wiz_dec = wiz_dec.at[:L, c:c + H].set(p['dec_wih'][g][E:])
        whh_dec = whh_dec.at[:H, c:c + H].set(p['dec_whh'][g])
        if g < 2:
            bx_dec = bx_dec.at[:, c:c + H].set(p['dec_bih'][g] + p['dec_bhh'][g])
        else:
            bx_dec = bx_dec.at[:, c:c + H].set(p['dec_bih'][g])
    bhn_dec = jnp.zeros((1, HP), f32).at[:, :H].set(p['dec_bhh'][2])

    # hidden_to_mean / hidden_to_logvar fused, lane-aligned: cols [0:128]=mean, [128:256]=logvar
    w_ml = jnp.zeros((HP, 2 * GP), f32)
    w_ml = w_ml.at[:2 * H, :L].set(p['w_mean'])
    w_ml = w_ml.at[:2 * H, GP:GP + L].set(p['w_logvar'])
    b_ml = jnp.zeros((1, 2 * GP), f32)
    b_ml = b_ml.at[:, :L].set(p['b_mean']).at[:, GP:GP + L].set(p['b_logvar'])

    # lane-dense padded output head (pad columns carry -1e9 bias -> exp underflows to 0)
    w_out = jnp.zeros((HP, V_PAD), f32).at[:H, :VOCAB_OUT].set(p['w_out'])
    b_out = jnp.full((1, V_PAD), NEG_BIG, f32).at[:, :VOCAB_OUT].set(p['b_out'])

    return dict(ew_enc=ew_enc, bx_enc=bx_enc, whh_enc=whh_enc, bhn_enc=bhn_enc,
                ew_dec=ew_dec, wiz_dec=wiz_dec, bx_dec=bx_dec, whh_dec=whh_dec,
                bhn_dec=bhn_dec, w_ml=w_ml, b_ml=b_ml, w_out=w_out, b_out=b_out)


# ------------------------------- forward ------------------------------------
@jax.jit
def rnnvae_forward(fp, seq, target, eps):
    """Teacher-forced forward; returns log-softmax token logits [B*T, VOCAB_OUT]."""
    # Only integer id re-ordering remains in the wrapper; embedding gathers happen
    # in-kernel as one-hot matmuls fused with the GRU input projections.
    seq = seq.astype(jnp.int32)
    enc_ids_f = seq.T.reshape(S * B, 1)                # row t*B+b -> seq[b, t]
    enc_ids_b = seq[:, ::-1].T.reshape(S * B, 1)       # row t*B+b -> seq[b, S-1-t]
    sos = jnp.full((B, 1), SOS_IDX, dtype=jnp.int32)
    dec_in = jnp.concatenate([sos, target.astype(jnp.int32)], axis=1)[:, :-1]  # [SOS, tgt[:-1]]
    dec_ids = dec_in.T.reshape(T * B, 1)
    eps_pad = jnp.zeros((B, GP), jnp.float32).at[:, :L].set(eps.astype(jnp.float32))

    out = pl.pallas_call(
        _rnnvae_fused_kernel,
        out_shape=jax.ShapeDtypeStruct((B * T, V_PAD), jnp.float32),
    )(enc_ids_f, enc_ids_b, dec_ids, eps_pad,
      fp['ew_enc'], fp['bx_enc'], fp['whh_enc'], fp['bhn_enc'],
      fp['ew_dec'], fp['wiz_dec'], fp['bx_dec'], fp['whh_dec'], fp['bhn_dec'],
      fp['w_ml'], fp['b_ml'], fp['w_out'], fp['b_out'])

    # rows already in PyTorch order (b*T + t); just drop the vocab padding.
    return out[:, :VOCAB_OUT]


# --------------------------- pure reference (host) ---------------------------
def _reference_forward(p, seq, target, eps):
    """Unfused float64 numpy reference of the same teacher-forced forward."""
    pn = {k: np.asarray(v, np.float64) for k, v in p.items()}
    seq = np.asarray(seq)
    target = np.asarray(target)
    eps = np.asarray(eps, np.float64)
    sig = lambda v: 1.0 / (1.0 + np.exp(-v))

    def cell(h, x, wih, whh, bih, bhh):
        r = sig(x @ wih[0] + bih[0] + h @ whh[0] + bhh[0])
        z = sig(x @ wih[1] + bih[1] + h @ whh[1] + bhh[1])
        n = np.tanh(x @ wih[2] + bih[2] + r * (h @ whh[2] + bhh[2]))
        return (1.0 - z) * n + z * h

    x = pn['emb_in'][seq]                                            # (B, S, E)
    hf = np.zeros((B, H)); hb = np.zeros((B, H))
    for t in range(S):
        hf = cell(hf, x[:, t], pn['enc_f_wih'], pn['enc_f_whh'], pn['enc_f_bih'], pn['enc_f_bhh'])
        hb = cell(hb, x[:, S - 1 - t], pn['enc_b_wih'], pn['enc_b_whh'], pn['enc_b_bih'], pn['enc_b_bhh'])
    h_n = np.concatenate([hf, hb], axis=1)
    mean = h_n @ pn['w_mean'] + pn['b_mean']
    logvar = h_n @ pn['w_logvar'] + pn['b_logvar']
    z = mean + eps * np.exp(0.5 * logvar)

    dec_in = np.concatenate([np.full((B, 1), SOS_IDX, np.int64), target], axis=1)[:, :-1]
    demb = pn['emb_out'][dec_in]                                     # (B, T, E)
    h = hf
    outs = []
    for t in range(T):
        xt = np.concatenate([demb[:, t], z], axis=1)
        h = cell(h, xt, pn['dec_wih'], pn['dec_whh'], pn['dec_bih'], pn['dec_bhh'])
        outs.append(h)
    hs = np.stack(outs, axis=1)                                      # (B, T, H)
    logits = (hs @ pn['w_out'] + pn['b_out']).reshape(B * T, VOCAB_OUT)
    logits = logits - logits.max(axis=1, keepdims=True)
    return logits - np.log(np.exp(logits).sum(axis=1, keepdims=True))


# TODO(synk): host-side vocab index conversions (convert_*_idx_*, convert_idx2symbol),
# NLLLoss bookkeeping and the python `random.random()` teacher-forcing draw are
# Python/dict logic with no tensor hot path; not ported (teacher-forced path fixed,
# torch.randn replaced by an explicit eps input for determinism).

if __name__ == "__main__":
    key = jax.random.PRNGKey(0)
    k_par, k_seq, k_tgt, k_eps = jax.random.split(key, 4)

    params = init_params(k_par)
    fused_params = pack_params(params)

    seq = jax.random.randint(k_seq, (B, S), 0, VOCAB_IN, dtype=jnp.int32)
    target = jax.random.randint(k_tgt, (B, T), 0, VOCAB_OUT, dtype=jnp.int32)
    eps = jax.random.normal(k_eps, (B, L), jnp.float32)   # torch.randn([B, L]) equivalent

    token_logits = jax.block_until_ready(rnnvae_forward(fused_params, seq, target, eps))

    assert token_logits.shape == (B * T, VOCAB_OUT)
    assert bool(jnp.all(jnp.isfinite(token_logits)))
    # rows are valid log-probabilities (logsumexp == 0)
    assert bool(jnp.allclose(jax.scipy.special.logsumexp(token_logits, axis=1),
                             0.0, atol=1e-4))
    # matches the unfused reference (loose tolerance: catches wiring bugs, not rounding)
    ref = _reference_forward(params, seq, target, eps).astype(np.float32)
    assert float(jnp.max(jnp.abs(token_logits - ref))) < 0.1
    print("KERNEL_OK")
</pallas_src>

<mosaic_0001>
module attributes {stable_mosaic.version = 11 : i64} {
  func.func @_rnnvae_fused_kernel(%arg0: memref<16x1xi32, #tpu.memory_space<vmem>>, %arg1: memref<16x1xi32, #tpu.memory_space<vmem>>, %arg2: memref<12x1xi32, #tpu.memory_space<vmem>>, %arg3: memref<2x128xf32, #tpu.memory_space<vmem>>, %arg4: memref<64x384xf32, #tpu.memory_space<vmem>>, %arg5: memref<1x384xf32, #tpu.memory_space<vmem>>, %arg6: memref<128x384xf32, #tpu.memory_space<vmem>>, %arg7: memref<1x128xf32, #tpu.memory_space<vmem>>, %arg8: memref<32x384xf32, #tpu.memory_space<vmem>>, %arg9: memref<128x384xf32, #tpu.memory_space<vmem>>, %arg10: memref<1x384xf32, #tpu.memory_space<vmem>>, %arg11: memref<128x384xf32, #tpu.memory_space<vmem>>, %arg12: memref<1x128xf32, #tpu.memory_space<vmem>>, %arg13: memref<128x256xf32, #tpu.memory_space<vmem>>, %arg14: memref<1x256xf32, #tpu.memory_space<vmem>>, %arg15: memref<128x128xf32, #tpu.memory_space<vmem>>, %arg16: memref<1x128xf32, #tpu.memory_space<vmem>>, %arg17: memref<12x128xf32, #tpu.memory_space<vmem>>) attributes {dimension_semantics = [], scalar_prefetch = 0 : i64, scratch_operands = 0 : i64, tpu.core_type = #tpu.core_type<tc>} {
    %c0 = arith.constant 0 : index
    %c0_0 = arith.constant 0 : index
    %0 = vector.load %arg0[%c0, %c0_0] : memref<16x1xi32, #tpu.memory_space<vmem>>, vector<16x1xi32>
    %c0_1 = arith.constant 0 : index
    %c0_2 = arith.constant 0 : index
    %1 = vector.load %arg1[%c0_1, %c0_2] : memref<16x1xi32, #tpu.memory_space<vmem>>, vector<16x1xi32>
    %2 = tpu.iota {dimensions = array<i32: 1>} : vector<16x64xi32>
    %3 = vector.broadcast %0 : vector<16x1xi32> to vector<16x64xi32>
    %4 = arith.cmpi eq, %2, %3 : vector<16x64xi32>
    %c32_i32 = arith.constant 32 : i32
    %5 = vector.broadcast %c32_i32 : i32 to vector<16x1xi32>
    %6 = arith.addi %1, %5 : vector<16x1xi32>
    %7 = vector.broadcast %6 : vector<16x1xi32> to vector<16x64xi32>
    %8 = arith.cmpi eq, %2, %7 : vector<16x64xi32>
    %9 = arith.ori %4, %8 : vector<16x64xi1>
    %10 = arith.extui %9 : vector<16x64xi1> to vector<16x64xi32>
    %11 = arith.sitofp %10 : vector<16x64xi32> to vector<16x64xf32>
    %c0_3 = arith.constant 0 : index
    %c0_4 = arith.constant 0 : index
    %12 = vector.load %arg4[%c0_3, %c0_4] : memref<64x384xf32, #tpu.memory_space<vmem>>, vector<64x384xf32>
    %cst = arith.constant dense<0.000000e+00> : vector<16x384xf32>
    %13 = tpu.matmul %11, %12, %cst {dimension_numbers = #tpu.dot_dimension_numbers<[1], [0], [0], [1], [0, 0, 1, 1], [], []>} : vector<16x64xf32>, vector<64x384xf32>, vector<16x384xf32> -> vector<16x384xf32>
    %c0_5 = arith.constant 0 : index
    %c0_6 = arith.constant 0 : index
    %14 = vector.load %arg5[%c0_5, %c0_6] : memref<1x384xf32, #tpu.memory_space<vmem>>, vector<1x384xf32>
    %15 = vector.broadcast %14 : vector<1x384xf32> to vector<16x384xf32>
    %16 = arith.addf %13, %15 : vector<16x384xf32>
    %cst_7 = arith.constant 0.000000e+00 : f32
    %17 = vector.broadcast %cst_7 : f32 to vector<2x128xf32>
    %18 = vector.extract_strided_slice %16 {offsets = [0, 0], sizes = [2, 384], strides = [1, 1]} : vector<16x384xf32> to vector<2x384xf32>
    %c0_8 = arith.constant 0 : index
    %c0_9 = arith.constant 0 : index
    %19 = vector.load %arg6[%c0_8, %c0_9] : memref<128x384xf32, #tpu.memory_space<vmem>>, vector<128x384xf32>
    %cst_10 = arith.constant dense<0.000000e+00> : vector<2x384xf32>
    %20 = tpu.matmul %17, %19, %cst_10 {dimension_numbers = #tpu.dot_dimension_numbers<[1], [0], [0], [1], [0, 0, 1, 1], [], []>} : vector<2x128xf32>, vector<128x384xf32>, vector<2x384xf32> -> vector<2x384xf32>
    %21 = vector.extract_strided_slice %18 {offsets = [0, 0], sizes = [2, 128], strides = [1, 1]} : vector<2x384xf32> to vector<2x128xf32>
    %22 = vector.extract_strided_slice %20 {offsets = [0, 0], sizes = [2, 128], strides = [1, 1]} : vector<2x384xf32> to vector<2x128xf32>
    %23 = arith.addf %21, %22 : vector<2x128xf32>
    %24 = arith.negf %23 : vector<2x128xf32>
    %25 = math.exp %24 : vector<2x128xf32>
    %cst_11 = arith.constant 1.000000e+00 : f32
    %26 = vector.broadcast %cst_11 : f32 to vector<2x128xf32>
    %27 = arith.addf %26, %25 : vector<2x128xf32>
    %28 = arith.divf %26, %27 : vector<2x128xf32>
    %29 = vector.extract_strided_slice %18 {offsets = [0, 128], sizes = [2, 128], strides = [1, 1]} : vector<2x384xf32> to vector<2x128xf32>
    %30 = vector.extract_strided_slice %20 {offsets = [0, 128], sizes = [2, 128], strides = [1, 1]} : vector<2x384xf32> to vector<2x128xf32>
    %31 = arith.addf %29, %30 : vector<2x128xf32>
    %32 = arith.negf %31 : vector<2x128xf32>
    %33 = math.exp %32 : vector<2x128xf32>
    %cst_12 = arith.constant 1.000000e+00 : f32
    %34 = vector.broadcast %cst_12 : f32 to vector<2x128xf32>
    %35 = arith.addf %34, %33 : vector<2x128xf32>
    %36 = arith.divf %34, %35 : vector<2x128xf32>
    %37 = vector.extract_strided_slice %18 {offsets = [0, 256], sizes = [2, 128], strides = [1, 1]} : vector<2x384xf32> to vector<2x128xf32>
    %38 = vector.extract_strided_slice %20 {offsets = [0, 256], sizes = [2, 128], strides = [1, 1]} : vector<2x384xf32> to vector<2x128xf32>
    %c0_13 = arith.constant 0 : index
    %c0_14 = arith.constant 0 : index
    %39 = vector.load %arg7[%c0_13, %c0_14] : memref<1x128xf32, #tpu.memory_space<vmem>>, vector<1x128xf32>
    %40 = vector.broadcast %39 : vector<1x128xf32> to vector<2x128xf32>
    %41 = arith.addf %38, %40 : vector<2x128xf32>
    %42 = arith.mulf %28, %41 : vector<2x128xf32>
    %43 = arith.addf %37, %42 : vector<2x128xf32>
    %44 = math.tanh %43 : vector<2x128xf32>
    %cst_15 = arith.constant 1.000000e+00 : f32
    %45 = vector.broadcast %cst_15 : f32 to vector<2x128xf32>
    %46 = arith.subf %45, %36 : vector<2x128xf32>
    %47 = arith.mulf %46, %44 : vector<2x128xf32>
    %48 = arith.mulf %36, %17 : vector<2x128xf32>
    %49 = arith.addf %47, %48 : vector<2x128xf32>
    %50 = vector.extract_strided_slice %16 {offsets = [2, 0], sizes = [2, 384], strides = [1, 1]} : vector<16x384xf32> to vector<2x384xf32>
    %c0_16 = arith.constant 0 : index
    %c0_17 = arith.constant 0 : index
    %51 = vector.load %arg6[%c0_16, %c0_17] : memref<128x384xf32, #tpu.memory_space<vmem>>, vector<128x384xf32>
    %cst_18 = arith.constant dense<0.000000e+00> : vector<2x384xf32>
    %52 = tpu.matmul %49, %51, %cst_18 {dimension_numbers = #tpu.dot_dimension_numbers<[1], [0], [0], [1], [0, 0, 1, 1], [], []>} : vector<2x128xf32>, vector<128x384xf32>, vector<2x384xf32> -> vector<2x384xf32>
    %53 = vector.extract_strided_slice %50 {offsets = [0, 0], sizes = [2, 128], strides = [1, 1]} : vector<2x384xf32> to vector<2x128xf32>
    %54 = vector.extract_strided_slice %52 {offsets = [0, 0], sizes = [2, 128], strides = [1, 1]} : vector<2x384xf32> to vector<2x128xf32>
    %55 = arith.addf %53, %54 : vector<2x128xf32>
    %56 = arith.negf %55 : vector<2x128xf32>
    %57 = math.exp %56 : vector<2x128xf32>
    %cst_19 = arith.constant 1.000000e+00 : f32
    %58 = vector.broadcast %cst_19 : f32 to vector<2x128xf32>
    %59 = arith.addf %58, %57 : vector<2x128xf32>
    %60 = arith.divf %58, %59 : vector<2x128xf32>
    %61 = vector.extract_strided_slice %50 {offsets = [0, 128], sizes = [2, 128], strides = [1, 1]} : vector<2x384xf32> to vector<2x128xf32>
    %62 = vector.extract_strided_slice %52 {offsets = [0, 128], sizes = [2, 128], strides = [1, 1]} : vector<2x384xf32> to vector<2x128xf32>
    %63 = arith.addf %61, %62 : vector<2x128xf32>
    %64 = arith.negf %63 : vector<2x128xf32>
    %65 = math.exp %64 : vector<2x128xf32>
    %cst_20 = arith.constant 1.000000e+00 : f32
    %66 = vector.broadcast %cst_20 : f32 to vector<2x128xf32>
    %67 = arith.addf %66, %65 : vector<2x128xf32>
    %68 = arith.divf %66, %67 : vector<2x128xf32>
    %69 = vector.extract_strided_slice %50 {offsets = [0, 256], sizes = [2, 128], strides = [1, 1]} : vector<2x384xf32> to vector<2x128xf32>
    %70 = vector.extract_strided_slice %52 {offsets = [0, 256], sizes = [2, 128], strides = [1, 1]} : vector<2x384xf32> to vector<2x128xf32>
    %c0_21 = arith.constant 0 : index
    %c0_22 = arith.constant 0 : index
    %71 = vector.load %arg7[%c0_21, %c0_22] : memref<1x128xf32, #tpu.memory_space<vmem>>, vector<1x128xf32>
    %72 = vector.broadcast %71 : vector<1x128xf32> to vector<2x128xf32>
    %73 = arith.addf %70, %72 : vector<2x128xf32>
    %74 = arith.mulf %60, %73 : vector<2x128xf32>
    %75 = arith.addf %69, %74 : vector<2x128xf32>
    %76 = math.tanh %75 : vector<2x128xf32>
    %cst_23 = arith.constant 1.000000e+00 : f32
    %77 = vector.broadcast %cst_23 : f32 to vector<2x128xf32>
    %78 = arith.subf %77, %68 : vector<2x128xf32>
    %79 = arith.mulf %78, %76 : vector<2x128xf32>
    %80 = arith.mulf %68, %49 : vector<2x128xf32>
    %81 = arith.addf %79, %80 : vector<2x128xf32>
    %82 = vector.extract_strided_slice %16 {offsets = [4, 0], sizes = [2, 384], strides = [1, 1]} : vector<16x384xf32> to vector<2x384xf32>
    %c0_24 = arith.constant 0 : index
    %c0_25 = arith.constant 0 : index
    %83 = vector.load %arg6[%c0_24, %c0_25] : memref<128x384xf32, #tpu.memory_space<vmem>>, vector<128x384xf32>
    %cst_26 = arith.constant dense<0.000000e+00> : vector<2x384xf32>
    %84 = tpu.matmul %81, %83, %cst_26 {dimension_numbers = #tpu.dot_dimension_numbers<[1], [0], [0], [1], [0, 0, 1, 1], [], []>} : vector<2x128xf32>, vector<128x384xf32>, vector<2x384xf32> -> vector<2x384xf32>
    %85 = vector.extract_strided_slice %82 {offsets = [0, 0], sizes = [2, 128], strides = [1, 1]} : vector<2x384xf32> to vector<2x128xf32>
    %86 = vector.extract_strided_slice %84 {offsets = [0, 0], sizes = [2, 128], strides = [1, 1]} : vector<2x384xf32> to vector<2x128xf32>
    %87 = arith.addf %85, %86 : vector<2x128xf32>
    %88 = arith.negf %87 : vector<2x128xf32>
    %89 = math.exp %88 : vector<2x128xf32>
    %cst_27 = arith.constant 1.000000e+00 : f32
    %90 = vector.broadcast %cst_27 : f32 to vector<2x128xf32>
    %91 = arith.addf %90, %89 : vector<2x128xf32>
    %92 = arith.divf %90, %91 : vector<2x128xf32>
    %93 = vector.extract_strided_slice %82 {offsets = [0, 128], sizes = [2, 128], strides = [1, 1]} : vector<2x384xf32> to vector<2x128xf32>
    %94 = vector.extract_strided_slice %84 {offsets = [0, 128], sizes = [2, 128], strides = [1, 1]} : vector<2x384xf32> to vector<2x128xf32>
    %95 = arith.addf %93, %94 : vector<2x128xf32>
    %96 = arith.negf %95 : vector<2x128xf32>
    %97 = math.exp %96 : vector<2x128xf32>
    %cst_28 = arith.constant 1.000000e+00 : f32
    %98 = vector.broadcast %cst_28 : f32 to vector<2x128xf32>
    %99 = arith.addf %98, %97 : vector<2x128xf32>
    %100 = arith.divf %98, %99 : vector<2x128xf32>
    %101 = vector.extract_strided_slice %82 {offsets = [0, 256], sizes = [2, 128], strides = [1, 1]} : vector<2x384xf32> to vector<2x128xf32>
    %102 = vector.extract_strided_slice %84 {offsets = [0, 256], sizes = [2, 128], strides = [1, 1]} : vector<2x384xf32> to vector<2x128xf32>
    %c0_29 = arith.constant 0 : index
    %c0_30 = arith.constant 0 : index
    %103 = vector.load %arg7[%c0_29, %c0_30] : memref<1x128xf32, #tpu.memory_space<vmem>>, vector<1x128xf32>
    %104 = vector.broadcast %103 : vector<1x128xf32> to vector<2x128xf32>
    %105 = arith.addf %102, %104 : vector<2x128xf32>
    %106 = arith.mulf %92, %105 : vector<2x128xf32>
    %107 = arith.addf %101, %106 : vector<2x128xf32>
    %108 = math.tanh %107 : vector<2x128xf32>
    %cst_31 = arith.constant 1.000000e+00 : f32
    %109 = vector.broadcast %cst_31 : f32 to vector<2x128xf32>
    %110 = arith.subf %109, %100 : vector<2x128xf32>
    %111 = arith.mulf %110, %108 : vector<2x128xf32>
    %112 = arith.mulf %100, %81 : vector<2x128xf32>
    %113 = arith.addf %111, %112 : vector<2x128xf32>
    %114 = vector.extract_strided_slice %16 {offsets = [6, 0], sizes = [2, 384], strides = [1, 1]} : vector<16x384xf32> to vector<2x384xf32>
    %c0_32 = arith.constant 0 : index
    %c0_33 = arith.constant 0 : index
    %115 = vector.load %arg6[%c0_32, %c0_33] : memref<128x384xf32, #tpu.memory_space<vmem>>, vector<128x384xf32>
    %cst_34 = arith.constant dense<0.000000e+00> : vector<2x384xf32>
    %116 = tpu.matmul %113, %115, %cst_34 {dimension_numbers = #tpu.dot_dimension_numbers<[1], [0], [0], [1], [0, 0, 1, 1], [], []>} : vector<2x128xf32>, vector<128x384xf32>, vector<2x384xf32> -> vector<2x384xf32>
    %117 = vector.extract_strided_slice %114 {offsets = [0, 0], sizes = [2, 128], strides = [1, 1]} : vector<2x384xf32> to vector<2x128xf32>
    %118 = vector.extract_strided_slice %116 {offsets = [0, 0], sizes = [2, 128], strides = [1, 1]} : vector<2x384xf32> to vector<2x128xf32>
    %119 = arith.addf %117, %118 : vector<2x128xf32>
    %120 = arith.negf %119 : vector<2x128xf32>
    %121 = math.exp %120 : vector<2x128xf32>
    %cst_35 = arith.constant 1.000000e+00 : f32
    %122 = vector.broadcast %cst_35 : f32 to vector<2x128xf32>
    %123 = arith.addf %122, %121 : vector<2x128xf32>
    %124 = arith.divf %122, %123 : vector<2x128xf32>
    %125 = vector.extract_strided_slice %114 {offsets = [0, 128], sizes = [2, 128], strides = [1, 1]} : vector<2x384xf32> to vector<2x128xf32>
    %126 = vector.extract_strided_slice %116 {offsets = [0, 128], sizes = [2, 128], strides = [1, 1]} : vector<2x384xf32> to vector<2x128xf32>
    %127 = arith.addf %125, %126 : vector<2x128xf32>
    %128 = arith.negf %127 : vector<2x128xf32>
    %129 = math.exp %128 : vector<2x128xf32>
    %cst_36 = arith.constant 1.000000e+00 : f32
    %130 = vector.broadcast %cst_36 : f32 to vector<2x128xf32>
    %131 = arith.addf %130, %129 : vector<2x128xf32>
    %132 = arith.divf %130, %131 : vector<2x128xf32>
    %133 = vector.extract_strided_slice %114 {offsets = [0, 256], sizes = [2, 128], strides = [1, 1]} : vector<2x384xf32> to vector<2x128xf32>
    %134 = vector.extract_strided_slice %116 {offsets = [0, 256], sizes = [2, 128], strides = [1, 1]} : vector<2x384xf32> to vector<2x128xf32>
    %c0_37 = arith.constant 0 : index
    %c0_38 = arith.constant 0 : index
    %135 = vector.load %arg7[%c0_37, %c0_38] : memref<1x128xf32, #tpu.memory_space<vmem>>, vector<1x128xf32>
    %136 = vector.broadcast %135 : vector<1x128xf32> to vector<2x128xf32>
    %137 = arith.addf %134, %136 : vector<2x128xf32>
    %138 = arith.mulf %124, %137 : vector<2x128xf32>
    %139 = arith.addf %133, %138 : vector<2x128xf32>
    %140 = math.tanh %139 : vector<2x128xf32>
    %cst_39 = arith.constant 1.000000e+00 : f32
    %141 = vector.broadcast %cst_39 : f32 to vector<2x128xf32>
    %142 = arith.subf %141, %132 : vector<2x128xf32>
    %143 = arith.mulf %142, %140 : vector<2x128xf32>
    %144 = arith.mulf %132, %113 : vector<2x128xf32>
    %145 = arith.addf %143, %144 : vector<2x128xf32>
    %146 = vector.extract_strided_slice %16 {offsets = [8, 0], sizes = [2, 384], strides = [1, 1]} : vector<16x384xf32> to vector<2x384xf32>
    %c0_40 = arith.constant 0 : index
    %c0_41 = arith.constant 0 : index
    %147 = vector.load %arg6[%c0_40, %c0_41] : memref<128x384xf32, #tpu.memory_space<vmem>>, vector<128x384xf32>
    %cst_42 = arith.constant dense<0.000000e+00> : vector<2x384xf32>
    %148 = tpu.matmul %145, %147, %cst_42 {dimension_numbers = #tpu.dot_dimension_numbers<[1], [0], [0], [1], [0, 0, 1, 1], [], []>} : vector<2x128xf32>, vector<128x384xf32>, vector<2x384xf32> -> vector<2x384xf32>
    %149 = vector.extract_strided_slice %146 {offsets = [0, 0], sizes = [2, 128], strides = [1, 1]} : vector<2x384xf32> to vector<2x128xf32>
    %150 = vector.extract_strided_slice %148 {offsets = [0, 0], sizes = [2, 128], strides = [1, 1]} : vector<2x384xf32> to vector<2x128xf32>
    %151 = arith.addf %149, %150 : vector<2x128xf32>
    %152 = arith.negf %151 : vector<2x128xf32>
    %153 = math.exp %152 : vector<2x128xf32>
    %cst_43 = arith.constant 1.000000e+00 : f32
    %154 = vector.broadcast %cst_43 : f32 to vector<2x128xf32>
    %155 = arith.addf %154, %153 : vector<2x128xf32>
    %156 = arith.divf %154, %155 : vector<2x128xf32>
    %157 = vector.extract_strided_slice %146 {offsets = [0, 128], sizes = [2, 128], strides = [1, 1]} : vector<2x384xf32> to vector<2x128xf32>
    %158 = vector.extract_strided_slice %148 {offsets = [0, 128], sizes = [2, 128], strides = [1, 1]} : vector<2x384xf32> to vector<2x128xf32>
    %159 = arith.addf %157, %158 : vector<2x128xf32>
    %160 = arith.negf %159 : vector<2x128xf32>
    %161 = math.exp %160 : vector<2x128xf32>
    %cst_44 = arith.constant 1.000000e+00 : f32
    %162 = vector.broadcast %cst_44 : f32 to vector<2x128xf32>
    %163 = arith.addf %162, %161 : vector<2x128xf32>
    %164 = arith.divf %162, %163 : vector<2x128xf32>
    %165 = vector.extract_strided_slice %146 {offsets = [0, 256], sizes = [2, 128], strides = [1, 1]} : vector<2x384xf32> to vector<2x128xf32>
    %166 = vector.extract_strided_slice %148 {offsets = [0, 256], sizes = [2, 128], strides = [1, 1]} : vector<2x384xf32> to vector<2x128xf32>
    %c0_45 = arith.constant 0 : index
    %c0_46 = arith.constant 0 : index
    %167 = vector.load %arg7[%c0_45, %c0_46] : memref<1x128xf32, #tpu.memory_space<vmem>>, vector<1x128xf32>
    %168 = vector.broadcast %167 : vector<1x128xf32> to vector<2x128xf32>
    %169 = arith.addf %166, %168 : vector<2x128xf32>
    %170 = arith.mulf %156, %169 : vector<2x128xf32>
    %171 = arith.addf %165, %170 : vector<2x128xf32>
    %172 = math.tanh %171 : vector<2x128xf32>
    %cst_47 = arith.constant 1.000000e+00 : f32
    %173 = vector.broadcast %cst_47 : f32 to vector<2x128xf32>
    %174 = arith.subf %173, %164 : vector<2x128xf32>
    %175 = arith.mulf %174, %172 : vector<2x128xf32>
    %176 = arith.mulf %164, %145 : vector<2x128xf32>
    %177 = arith.addf %175, %176 : vector<2x128xf32>
    %178 = vector.extract_strided_slice %16 {offsets = [10, 0], sizes = [2, 384], strides = [1, 1]} : vector<16x384xf32> to vector<2x384xf32>
    %c0_48 = arith.constant 0 : index
    %c0_49 = arith.constant 0 : index
    %179 = vector.load %arg6[%c0_48, %c0_49] : memref<128x384xf32, #tpu.memory_space<vmem>>, vector<128x384xf32>
    %cst_50 = arith.constant dense<0.000000e+00> : vector<2x384xf32>
    %180 = tpu.matmul %177, %179, %cst_50 {dimension_numbers = #tpu.dot_dimension_numbers<[1], [0], [0], [1], [0, 0, 1, 1], [], []>} : vector<2x128xf32>, vector<128x384xf32>, vector<2x384xf32> -> vector<2x384xf32>
    %181 = vector.extract_strided_slice %178 {offsets = [0, 0], sizes = [2, 128], strides = [1, 1]} : vector<2x384xf32> to vector<2x128xf32>
    %182 = vector.extract_strided_slice %180 {offsets = [0, 0], sizes = [2, 128], strides = [1, 1]} : vector<2x384xf32> to vector<2x128xf32>
    %183 = arith.addf %181, %182 : vector<2x128xf32>
    %184 = arith.negf %183 : vector<2x128xf32>
    %185 = math.exp %184 : vector<2x128xf32>
    %cst_51 = arith.constant 1.000000e+00 : f32
    %186 = vector.broadcast %cst_51 : f32 to vector<2x128xf32>
    %187 = arith.addf %186, %185 : vector<2x128xf32>
    %188 = arith.divf %186, %187 : vector<2x128xf32>
    %189 = vector.extract_strided_slice %178 {offsets = [0, 128], sizes = [2, 128], strides = [1, 1]} : vector<2x384xf32> to vector<2x128xf32>
    %190 = vector.extract_strided_slice %180 {offsets = [0, 128], sizes = [2, 128], strides = [1, 1]} : vector<2x384xf32> to vector<2x128xf32>
    %191 = arith.addf %189, %190 : vector<2x128xf32>
    %192 = arith.negf %191 : vector<2x128xf32>
    %193 = math.exp %192 : vector<2x128xf32>
    %cst_52 = arith.constant 1.000000e+00 : f32
    %194 = vector.broadcast %cst_52 : f32 to vector<2x128xf32>
    %195 = arith.addf %194, %193 : vector<2x128xf32>
    %196 = arith.divf %194, %195 : vector<2x128xf32>
    %197 = vector.extract_strided_slice %178 {offsets = [0, 256], sizes = [2, 128], strides = [1, 1]} : vector<2x384xf32> to vector<2x128xf32>
    %198 = vector.extract_strided_slice %180 {offsets = [0, 256], sizes = [2, 128], strides = [1, 1]} : vector<2x384xf32> to vector<2x128xf32>
    %c0_53 = arith.constant 0 : index
    %c0_54 = arith.constant 0 : index
    %199 = vector.load %arg7[%c0_53, %c0_54] : memref<1x128xf32, #tpu.memory_space<vmem>>, vector<1x128xf32>
    %200 = vector.broadcast %199 : vector<1x128xf32> to vector<2x128xf32>
    %201 = arith.addf %198, %200 : vector<2x128xf32>
    %202 = arith.mulf %188, %201 : vector<2x128xf32>
    %203 = arith.addf %197, %202 : vector<2x128xf32>
    %204 = math.tanh %203 : vector<2x128xf32>
    %cst_55 = arith.constant 1.000000e+00 : f32
    %205 = vector.broadcast %cst_55 : f32 to vector<2x128xf32>
    %206 = arith.subf %205, %196 : vector<2x128xf32>
    %207 = arith.mulf %206, %204 : vector<2x128xf32>
    %208 = arith.mulf %196, %177 : vector<2x128xf32>
    %209 = arith.addf %207, %208 : vector<2x128xf32>
    %210 = vector.extract_strided_slice %16 {offsets = [12, 0], sizes = [2, 384], strides = [1, 1]} : vector<16x384xf32> to vector<2x384xf32>
    %c0_56 = arith.constant 0 : index
    %c0_57 = arith.constant 0 : index
    %211 = vector.load %arg6[%c0_56, %c0_57] : memref<128x384xf32, #tpu.memory_space<vmem>>, vector<128x384xf32>
    %cst_58 = arith.constant dense<0.000000e+00> : vector<2x384xf32>
    %212 = tpu.matmul %209, %211, %cst_58 {dimension_numbers = #tpu.dot_dimension_numbers<[1], [0], [0], [1], [0, 0, 1, 1], [], []>} : vector<2x128xf32>, vector<128x384xf32>, vector<2x384xf32> -> vector<2x384xf32>
    %213 = vector.extract_strided_slice %210 {offsets = [0, 0], sizes = [2, 128], strides = [1, 1]} : vector<2x384xf32> to vector<2x128xf32>
    %214 = vector.extract_strided_slice %212 {offsets = [0, 0], sizes = [2, 128], strides = [1, 1]} : vector<2x384xf32> to vector<2x128xf32>
    %215 = arith.addf %213, %214 : vector<2x128xf32>
    %216 = arith.negf %215 : vector<2x128xf32>
    %217 = math.exp %216 : vector<2x128xf32>
    %cst_59 = arith.constant 1.000000e+00 : f32
    %218 = vector.broadcast %cst_59 : f32 to vector<2x128xf32>
    %219 = arith.addf %218, %217 : vector<2x128xf32>
    %220 = arith.divf %218, %219 : vector<2x128xf32>
    %221 = vector.extract_strided_slice %210 {offsets = [0, 128], sizes = [2, 128], strides = [1, 1]} : vector<2x384xf32> to vector<2x128xf32>
    %222 = vector.extract_strided_slice %212 {offsets = [0, 128], sizes = [2, 128], strides = [1, 1]} : vector<2x384xf32> to vector<2x128xf32>
    %223 = arith.addf %221, %222 : vector<2x128xf32>
    %224 = arith.negf %223 : vector<2x128xf32>
    %225 = math.exp %224 : vector<2x128xf32>
    %cst_60 = arith.constant 1.000000e+00 : f32
    %226 = vector.broadcast %cst_60 : f32 to vector<2x128xf32>
    %227 = arith.addf %226, %225 : vector<2x128xf32>
    %228 = arith.divf %226, %227 : vector<2x128xf32>
    %229 = vector.extract_strided_slice %210 {offsets = [0, 256], sizes = [2, 128], strides = [1, 1]} : vector<2x384xf32> to vector<2x128xf32>
    %230 = vector.extract_strided_slice %212 {offsets = [0, 256], sizes = [2, 128], strides = [1, 1]} : vector<2x384xf32> to vector<2x128xf32>
    %c0_61 = arith.constant 0 : index
    %c0_62 = arith.constant 0 : index
    %231 = vector.load %arg7[%c0_61, %c0_62] : memref<1x128xf32, #tpu.memory_space<vmem>>, vector<1x128xf32>
    %232 = vector.broadcast %231 : vector<1x128xf32> to vector<2x128xf32>
    %233 = arith.addf %230, %232 : vector<2x128xf32>
    %234 = arith.mulf %220, %233 : vector<2x128xf32>
    %235 = arith.addf %229, %234 : vector<2x128xf32>
    %236 = math.tanh %235 : vector<2x128xf32>
    %cst_63 = arith.constant 1.000000e+00 : f32
    %237 = vector.broadcast %cst_63 : f32 to vector<2x128xf32>
    %238 = arith.subf %237, %228 : vector<2x128xf32>
    %239 = arith.mulf %238, %236 : vector<2x128xf32>
    %240 = arith.mulf %228, %209 : vector<2x128xf32>
    %241 = arith.addf %239, %240 : vector<2x128xf32>
    %242 = vector.extract_strided_slice %16 {offsets = [14, 0], sizes = [2, 384], strides = [1, 1]} : vector<16x384xf32> to vector<2x384xf32>
    %c0_64 = arith.constant 0 : index
    %c0_65 = arith.constant 0 : index
    %243 = vector.load %arg6[%c0_64, %c0_65] : memref<128x384xf32, #tpu.memory_space<vmem>>, vector<128x384xf32>
    %cst_66 = arith.constant dense<0.000000e+00> : vector<2x384xf32>
    %244 = tpu.matmul %241, %243, %cst_66 {dimension_numbers = #tpu.dot_dimension_numbers<[1], [0], [0], [1], [0, 0, 1, 1], [], []>} : vector<2x128xf32>, vector<128x384xf32>, vector<2x384xf32> -> vector<2x384xf32>
    %245 = vector.extract_strided_slice %242 {offsets = [0, 0], sizes = [2, 128], strides = [1, 1]} : vector<2x384xf32> to vector<2x128xf32>
    %246 = vector.extract_strided_slice %244 {offsets = [0, 0], sizes = [2, 128], strides = [1, 1]} : vector<2x384xf32> to vector<2x128xf32>
    %247 = arith.addf %245, %246 : vector<2x128xf32>
    %248 = arith.negf %247 : vector<2x128xf32>
    %249 = math.exp %248 : vector<2x128xf32>
    %cst_67 = arith.constant 1.000000e+00 : f32
    %250 = vector.broadcast %cst_67 : f32 to vector<2x128xf32>
    %251 = arith.addf %250, %249 : vector<2x128xf32>
    %252 = arith.divf %250, %251 : vector<2x128xf32>
    %253 = vector.extract_strided_slice %242 {offsets = [0, 128], sizes = [2, 128], strides = [1, 1]} : vector<2x384xf32> to vector<2x128xf32>
    %254 = vector.extract_strided_slice %244 {offsets = [0, 128], sizes = [2, 128], strides = [1, 1]} : vector<2x384xf32> to vector<2x128xf32>
    %255 = arith.addf %253, %254 : vector<2x128xf32>
    %256 = arith.negf %255 : vector<2x128xf32>
    %257 = math.exp %256 : vector<2x128xf32>
    %cst_68 = arith.constant 1.000000e+00 : f32
    %258 = vector.broadcast %cst_68 : f32 to vector<2x128xf32>
    %259 = arith.addf %258, %257 : vector<2x128xf32>
    %260 = arith.divf %258, %259 : vector<2x128xf32>
    %261 = vector.extract_strided_slice %242 {offsets = [0, 256], sizes = [2, 128], strides = [1, 1]} : vector<2x384xf32> to vector<2x128xf32>
    %262 = vector.extract_strided_slice %244 {offsets = [0, 256], sizes = [2, 128], strides = [1, 1]} : vector<2x384xf32> to vector<2x128xf32>
    %c0_69 = arith.constant 0 : index
    %c0_70 = arith.constant 0 : index
    %263 = vector.load %arg7[%c0_69, %c0_70] : memref<1x128xf32, #tpu.memory_space<vmem>>, vector<1x128xf32>
    %264 = vector.broadcast %263 : vector<1x128xf32> to vector<2x128xf32>
    %265 = arith.addf %262, %264 : vector<2x128xf32>
    %266 = arith.mulf %252, %265 : vector<2x128xf32>
    %267 = arith.addf %261, %266 : vector<2x128xf32>
    %268 = math.tanh %267 : vector<2x128xf32>
    %cst_71 = arith.constant 1.000000e+00 : f32
    %269 = vector.broadcast %cst_71 : f32 to vector<2x128xf32>
    %270 = arith.subf %269, %260 : vector<2x128xf32>
    %271 = arith.mulf %270, %268 : vector<2x128xf32>
    %272 = arith.mulf %260, %241 : vector<2x128xf32>
    %273 = arith.addf %271, %272 : vector<2x128xf32>
    %c0_72 = arith.constant 0 : index
    %c0_73 = arith.constant 0 : index
    %274 = vector.load %arg13[%c0_72, %c0_73] : memref<128x256xf32, #tpu.memory_space<vmem>>, vector<128x256xf32>
    %cst_74 = arith.constant dense<0.000000e+00> : vector<2x256xf32>
    %275 = tpu.matmul %273, %274, %cst_74 {dimension_numbers = #tpu.dot_dimension_numbers<[1], [0], [0], [1], [0, 0, 1, 1], [], []>} : vector<2x128xf32>, vector<128x256xf32>, vector<2x256xf32> -> vector<2x256xf32>
    %c0_75 = arith.constant 0 : index
    %c0_76 = arith.constant 0 : index
    %276 = vector.load %arg14[%c0_75, %c0_76] : memref<1x256xf32, #tpu.memory_space<vmem>>, vector<1x256xf32>
    %277 = vector.broadcast %276 : vector<1x256xf32> to vector<2x256xf32>
    %278 = arith.addf %275, %277 : vector<2x256xf32>
    %279 = vector.extract_strided_slice %278 {offsets = [0, 0], sizes = [2, 128], strides = [1, 1]} : vector<2x256xf32> to vector<2x128xf32>
    %280 = vector.extract_strided_slice %278 {offsets = [0, 128], sizes = [2, 128], strides = [1, 1]} : vector<2x256xf32> to vector<2x128xf32>
    %c0_77 = arith.constant 0 : index
    %c0_78 = arith.constant 0 : index
    %281 = vector.load %arg3[%c0_77, %c0_78] : memref<2x128xf32, #tpu.memory_space<vmem>>, vector<2x128xf32>
    %cst_79 = arith.constant 5.000000e-01 : f32
    %282 = vector.broadcast %cst_79 : f32 to vector<2x128xf32>
    %283 = arith.mulf %282, %280 : vector<2x128xf32>
    %284 = math.exp %283 : vector<2x128xf32>
    %285 = arith.mulf %281, %284 : vector<2x128xf32>
    %286 = arith.addf %279, %285 : vector<2x128xf32>
    %287 = tpu.iota {dimensions = array<i32: 1>} : vector<12x32xi32>
    %c0_80 = arith.constant 0 : index
    %c0_81 = arith.constant 0 : index
    %288 = vector.load %arg2[%c0_80, %c0_81] : memref<12x1xi32, #tpu.memory_space<vmem>>, vector<12x1xi32>
    %289 = vector.broadcast %288 : vector<12x1xi32> to vector<12x32xi32>
    %290 = arith.cmpi eq, %287, %289 : vector<12x32xi32>
    %291 = arith.extui %290 : vector<12x32xi1> to vector<12x32xi32>
    %292 = arith.sitofp %291 : vector<12x32xi32> to vector<12x32xf32>
    %c0_82 = arith.constant 0 : index
    %c0_83 = arith.constant 0 : index
    %293 = vector.load %arg8[%c0_82, %c0_83] : memref<32x384xf32, #tpu.memory_space<vmem>>, vector<32x384xf32>
    %cst_84 = arith.constant dense<0.000000e+00> : vector<12x384xf32>
    %294 = tpu.matmul %292, %293, %cst_84 {dimension_numbers = #tpu.dot_dimension_numbers<[1], [0], [0], [1], [0, 0, 1, 1], [], []>} : vector<12x32xf32>, vector<32x384xf32>, vector<12x384xf32> -> vector<12x384xf32>
    %c0_85 = arith.constant 0 : index
    %c0_86 = arith.constant 0 : index
    %295 = vector.load %arg9[%c0_85, %c0_86] : memref<128x384xf32, #tpu.memory_space<vmem>>, vector<128x384xf32>
    %cst_87 = arith.constant dense<0.000000e+00> : vector<2x384xf32>
    %296 = tpu.matmul %286, %295, %cst_87 {dimension_numbers = #tpu.dot_dimension_numbers<[1], [0], [0], [1], [0, 0, 1, 1], [], []>} : vector<2x128xf32>, vector<128x384xf32>, vector<2x384xf32> -> vector<2x384xf32>
    %c0_88 = arith.constant 0 : index
    %c0_89 = arith.constant 0 : index
    %297 = vector.load %arg10[%c0_88, %c0_89] : memref<1x384xf32, #tpu.memory_space<vmem>>, vector<1x384xf32>
    %298 = vector.broadcast %297 : vector<1x384xf32> to vector<2x384xf32>
    %299 = arith.addf %296, %298 : vector<2x384xf32>
    %300 = tpu.iota {dimensions = array<i32: 1>} : vector<2x128xi32>
    %c32_i32_90 = arith.constant 32 : i32
    %301 = vector.broadcast %c32_i32_90 : i32 to vector<2x128xi32>
    %302 = arith.cmpi slt, %300, %301 : vector<2x128xi32>
    %cst_91 = arith.constant 0.000000e+00 : f32
    %303 = vector.broadcast %cst_91 : f32 to vector<2x128xf32>
    %304 = arith.select %302, %273, %303 : vector<2x128xi1>, vector<2x128xf32>
    %305 = vector.extract_strided_slice %294 {offsets = [0, 0], sizes = [2, 384], strides = [1, 1]} : vector<12x384xf32> to vector<2x384xf32>
    %306 = arith.addf %305, %299 : vector<2x384xf32>
    %c0_92 = arith.constant 0 : index
    %c0_93 = arith.constant 0 : index
    %307 = vector.load %arg11[%c0_92, %c0_93] : memref<128x384xf32, #tpu.memory_space<vmem>>, vector<128x384xf32>
    %cst_94 = arith.constant dense<0.000000e+00> : vector<2x384xf32>
    %308 = tpu.matmul %304, %307, %cst_94 {dimension_numbers = #tpu.dot_dimension_numbers<[1], [0], [0], [1], [0, 0, 1, 1], [], []>} : vector<2x128xf32>, vector<128x384xf32>, vector<2x384xf32> -> vector<2x384xf32>
    %309 = vector.extract_strided_slice %306 {offsets = [0, 0], sizes = [2, 128], strides = [1, 1]} : vector<2x384xf32> to vector<2x128xf32>
    %310 = vector.extract_strided_slice %308 {offsets = [0, 0], sizes = [2, 128], strides = [1, 1]} : vector<2x384xf32> to vector<2x128xf32>
    %311 = arith.addf %309, %310 : vector<2x128xf32>
    %312 = arith.negf %311 : vector<2x128xf32>
    %313 = math.exp %312 : vector<2x128xf32>
    %cst_95 = arith.constant 1.000000e+00 : f32
    %314 = vector.broadcast %cst_95 : f32 to vector<2x128xf32>
    %315 = arith.addf %314, %313 : vector<2x128xf32>
    %316 = arith.divf %314, %315 : vector<2x128xf32>
    %317 = vector.extract_strided_slice %306 {offsets = [0, 128], sizes = [2, 128], strides = [1, 1]} : vector<2x384xf32> to vector<2x128xf32>
    %318 = vector.extract_strided_slice %308 {offsets = [0, 128], sizes = [2, 128], strides = [1, 1]} : vector<2x384xf32> to vector<2x128xf32>
    %319 = arith.addf %317, %318 : vector<2x128xf32>
    %320 = arith.negf %319 : vector<2x128xf32>
    %321 = math.exp %320 : vector<2x128xf32>
    %cst_96 = arith.constant 1.000000e+00 : f32
    %322 = vector.broadcast %cst_96 : f32 to vector<2x128xf32>
    %323 = arith.addf %322, %321 : vector<2x128xf32>
    %324 = arith.divf %322, %323 : vector<2x128xf32>
    %325 = vector.extract_strided_slice %306 {offsets = [0, 256], sizes = [2, 128], strides = [1, 1]} : vector<2x384xf32> to vector<2x128xf32>
    %326 = vector.extract_strided_slice %308 {offsets = [0, 256], sizes = [2, 128], strides = [1, 1]} : vector<2x384xf32> to vector<2x128xf32>
    %c0_97 = arith.constant 0 : index
    %c0_98 = arith.constant 0 : index
    %327 = vector.load %arg12[%c0_97, %c0_98] : memref<1x128xf32, #tpu.memory_space<vmem>>, vector<1x128xf32>
    %328 = vector.broadcast %327 : vector<1x128xf32> to vector<2x128xf32>
    %329 = arith.addf %326, %328 : vector<2x128xf32>
    %330 = arith.mulf %316, %329 : vector<2x128xf32>
    %331 = arith.addf %325, %330 : vector<2x128xf32>
    %332 = math.tanh %331 : vector<2x128xf32>
    %cst_99 = arith.constant 1.000000e+00 : f32
    %333 = vector.broadcast %cst_99 : f32 to vector<2x128xf32>
    %334 = arith.subf %333, %324 : vector<2x128xf32>
    %335 = arith.mulf %334, %332 : vector<2x128xf32>
    %336 = arith.mulf %324, %304 : vector<2x128xf32>
    %337 = arith.addf %335, %336 : vector<2x128xf32>
    %338 = vector.extract_strided_slice %294 {offsets = [2, 0], sizes = [2, 384], strides = [1, 1]} : vector<12x384xf32> to vector<2x384xf32>
    %339 = arith.addf %338, %299 : vector<2x384xf32>
    %c0_100 = arith.constant 0 : index
    %c0_101 = arith.constant 0 : index
    %340 = vector.load %arg11[%c0_100, %c0_101] : memref<128x384xf32, #tpu.memory_space<vmem>>, vector<128x384xf32>
    %cst_102 = arith.constant dense<0.000000e+00> : vector<2x384xf32>
    %341 = tpu.matmul %337, %340, %cst_102 {dimension_numbers = #tpu.dot_dimension_numbers<[1], [0], [0], [1], [0, 0, 1, 1], [], []>} : vector<2x128xf32>, vector<128x384xf32>, vector<2x384xf32> -> vector<2x384xf32>
    %342 = vector.extract_strided_slice %339 {offsets = [0, 0], sizes = [2, 128], strides = [1, 1]} : vector<2x384xf32> to vector<2x128xf32>
    %343 = vector.extract_strided_slice %341 {offsets = [0, 0], sizes = [2, 128], strides = [1, 1]} : vector<2x384xf32> to vector<2x128xf32>
    %344 = arith.addf %342, %343 : vector<2x128xf32>
    %345 = arith.negf %344 : vector<2x128xf32>
    %346 = math.exp %345 : vector<2x128xf32>
    %cst_103 = arith.constant 1.000000e+00 : f32
    %347 = vector.broadcast %cst_103 : f32 to vector<2x128xf32>
    %348 = arith.addf %347, %346 : vector<2x128xf32>
    %349 = arith.divf %347, %348 : vector<2x128xf32>
    %350 = vector.extract_strided_slice %339 {offsets = [0, 128], sizes = [2, 128], strides = [1, 1]} : vector<2x384xf32> to vector<2x128xf32>
    %351 = vector.extract_strided_slice %341 {offsets = [0, 128], sizes = [2, 128], strides = [1, 1]} : vector<2x384xf32> to vector<2x128xf32>
    %352 = arith.addf %350, %351 : vector<2x128xf32>
    %353 = arith.negf %352 : vector<2x128xf32>
    %354 = math.exp %353 : vector<2x128xf32>
    %cst_104 = arith.constant 1.000000e+00 : f32
    %355 = vector.broadcast %cst_104 : f32 to vector<2x128xf32>
    %356 = arith.addf %355, %354 : vector<2x128xf32>
    %357 = arith.divf %355, %356 : vector<2x128xf32>
    %358 = vector.extract_strided_slice %339 {offsets = [0, 256], sizes = [2, 128], strides = [1, 1]} : vector<2x384xf32> to vector<2x128xf32>
    %359 = vector.extract_strided_slice %341 {offsets = [0, 256], sizes = [2, 128], strides = [1, 1]} : vector<2x384xf32> to vector<2x128xf32>
    %c0_105 = arith.constant 0 : index
    %c0_106 = arith.constant 0 : index
    %360 = vector.load %arg12[%c0_105, %c0_106] : memref<1x128xf32, #tpu.memory_space<vmem>>, vector<1x128xf32>
    %361 = vector.broadcast %360 : vector<1x128xf32> to vector<2x128xf32>
    %362 = arith.addf %359, %361 : vector<2x128xf32>
    %363 = arith.mulf %349, %362 : vector<2x128xf32>
    %364 = arith.addf %358, %363 : vector<2x128xf32>
    %365 = math.tanh %364 : vector<2x128xf32>
    %cst_107 = arith.constant 1.000000e+00 : f32
    %366 = vector.broadcast %cst_107 : f32 to vector<2x128xf32>
    %367 = arith.subf %366, %357 : vector<2x128xf32>
    %368 = arith.mulf %367, %365 : vector<2x128xf32>
    %369 = arith.mulf %357, %337 : vector<2x128xf32>
    %370 = arith.addf %368, %369 : vector<2x128xf32>
    %371 = vector.extract_strided_slice %294 {offsets = [4, 0], sizes = [2, 384], strides = [1, 1]} : vector<12x384xf32> to vector<2x384xf32>
    %372 = arith.addf %371, %299 : vector<2x384xf32>
    %c0_108 = arith.constant 0 : index
    %c0_109 = arith.constant 0 : index
    %373 = vector.load %arg11[%c0_108, %c0_109] : memref<128x384xf32, #tpu.memory_space<vmem>>, vector<128x384xf32>
    %cst_110 = arith.constant dense<0.000000e+00> : vector<2x384xf32>
    %374 = tpu.matmul %370, %373, %cst_110 {dimension_numbers = #tpu.dot_dimension_numbers<[1], [0], [0], [1], [0, 0, 1, 1], [], []>} : vector<2x128xf32>, vector<128x384xf32>, vector<2x384xf32> -> vector<2x384xf32>
    %375 = vector.extract_strided_slice %372 {offsets = [0, 0], sizes = [2, 128], strides = [1, 1]} : vector<2x384xf32> to vector<2x128xf32>
    %376 = vector.extract_strided_slice %374 {offsets = [0, 0], sizes = [2, 128], strides = [1, 1]} : vector<2x384xf32> to vector<2x128xf32>
    %377 = arith.addf %375, %376 : vector<2x128xf32>
    %378 = arith.negf %377 : vector<2x128xf32>
    %379 = math.exp %378 : vector<2x128xf32>
    %cst_111 = arith.constant 1.000000e+00 : f32
    %380 = vector.broadcast %cst_111 : f32 to vector<2x128xf32>
    %381 = arith.addf %380, %379 : vector<2x128xf32>
    %382 = arith.divf %380, %381 : vector<2x128xf32>
    %383 = vector.extract_strided_slice %372 {offsets = [0, 128], sizes = [2, 128], strides = [1, 1]} : vector<2x384xf32> to vector<2x128xf32>
    %384 = vector.extract_strided_slice %374 {offsets = [0, 128], sizes = [2, 128], strides = [1, 1]} : vector<2x384xf32> to vector<2x128xf32>
    %385 = arith.addf %383, %384 : vector<2x128xf32>
    %386 = arith.negf %385 : vector<2x128xf32>
    %387 = math.exp %386 : vector<2x128xf32>
    %cst_112 = arith.constant 1.000000e+00 : f32
    %388 = vector.broadcast %cst_112 : f32 to vector<2x128xf32>
    %389 = arith.addf %388, %387 : vector<2x128xf32>
    %390 = arith.divf %388, %389 : vector<2x128xf32>
    %391 = vector.extract_strided_slice %372 {offsets = [0, 256], sizes = [2, 128], strides = [1, 1]} : vector<2x384xf32> to vector<2x128xf32>
    %392 = vector.extract_strided_slice %374 {offsets = [0, 256], sizes = [2, 128], strides = [1, 1]} : vector<2x384xf32> to vector<2x128xf32>
    %c0_113 = arith.constant 0 : index
    %c0_114 = arith.constant 0 : index
    %393 = vector.load %arg12[%c0_113, %c0_114] : memref<1x128xf32, #tpu.memory_space<vmem>>, vector<1x128xf32>
    %394 = vector.broadcast %393 : vector<1x128xf32> to vector<2x128xf32>
    %395 = arith.addf %392, %394 : vector<2x128xf32>
    %396 = arith.mulf %382, %395 : vector<2x128xf32>
    %397 = arith.addf %391, %396 : vector<2x128xf32>
    %398 = math.tanh %397 : vector<2x128xf32>
    %cst_115 = arith.constant 1.000000e+00 : f32
    %399 = vector.broadcast %cst_115 : f32 to vector<2x128xf32>
    %400 = arith.subf %399, %390 : vector<2x128xf32>
    %401 = arith.mulf %400, %398 : vector<2x128xf32>
    %402 = arith.mulf %390, %370 : vector<2x128xf32>
    %403 = arith.addf %401, %402 : vector<2x128xf32>
    %404 = vector.extract_strided_slice %294 {offsets = [6, 0], sizes = [2, 384], strides = [1, 1]} : vector<12x384xf32> to vector<2x384xf32>
    %405 = arith.addf %404, %299 : vector<2x384xf32>
    %c0_116 = arith.constant 0 : index
    %c0_117 = arith.constant 0 : index
    %406 = vector.load %arg11[%c0_116, %c0_117] : memref<128x384xf32, #tpu.memory_space<vmem>>, vector<128x384xf32>
    %cst_118 = arith.constant dense<0.000000e+00> : vector<2x384xf32>
    %407 = tpu.matmul %403, %406, %cst_118 {dimension_numbers = #tpu.dot_dimension_numbers<[1], [0], [0], [1], [0, 0, 1, 1], [], []>} : vector<2x128xf32>, vector<128x384xf32>, vector<2x384xf32> -> vector<2x384xf32>
    %408 = vector.extract_strided_slice %405 {offsets = [0, 0], sizes = [2, 128], strides = [1, 1]} : vector<2x384xf32> to vector<2x128xf32>
    %409 = vector.extract_strided_slice %407 {offsets = [0, 0], sizes = [2, 128], strides = [1, 1]} : vector<2x384xf32> to vector<2x128xf32>
    %410 = arith.addf %408, %409 : vector<2x128xf32>
    %411 = arith.negf %410 : vector<2x128xf32>
    %412 = math.exp %411 : vector<2x128xf32>
    %cst_119 = arith.constant 1.000000e+00 : f32
    %413 = vector.broadcast %cst_119 : f32 to vector<2x128xf32>
    %414 = arith.addf %413, %412 : vector<2x128xf32>
    %415 = arith.divf %413, %414 : vector<2x128xf32>
    %416 = vector.extract_strided_slice %405 {offsets = [0, 128], sizes = [2, 128], strides = [1, 1]} : vector<2x384xf32> to vector<2x128xf32>
    %417 = vector.extract_strided_slice %407 {offsets = [0, 128], sizes = [2, 128], strides = [1, 1]} : vector<2x384xf32> to vector<2x128xf32>
    %418 = arith.addf %416, %417 : vector<2x128xf32>
    %419 = arith.negf %418 : vector<2x128xf32>
    %420 = math.exp %419 : vector<2x128xf32>
    %cst_120 = arith.constant 1.000000e+00 : f32
    %421 = vector.broadcast %cst_120 : f32 to vector<2x128xf32>
    %422 = arith.addf %421, %420 : vector<2x128xf32>
    %423 = arith.divf %421, %422 : vector<2x128xf32>
    %424 = vector.extract_strided_slice %405 {offsets = [0, 256], sizes = [2, 128], strides = [1, 1]} : vector<2x384xf32> to vector<2x128xf32>
    %425 = vector.extract_strided_slice %407 {offsets = [0, 256], sizes = [2, 128], strides = [1, 1]} : vector<2x384xf32> to vector<2x128xf32>
    %c0_121 = arith.constant 0 : index
    %c0_122 = arith.constant 0 : index
    %426 = vector.load %arg12[%c0_121, %c0_122] : memref<1x128xf32, #tpu.memory_space<vmem>>, vector<1x128xf32>
    %427 = vector.broadcast %426 : vector<1x128xf32> to vector<2x128xf32>
    %428 = arith.addf %425, %427 : vector<2x128xf32>
    %429 = arith.mulf %415, %428 : vector<2x128xf32>
    %430 = arith.addf %424, %429 : vector<2x128xf32>
    %431 = math.tanh %430 : vector<2x128xf32>
    %cst_123 = arith.constant 1.000000e+00 : f32
    %432 = vector.broadcast %cst_123 : f32 to vector<2x128xf32>
    %433 = arith.subf %432, %423 : vector<2x128xf32>
    %434 = arith.mulf %433, %431 : vector<2x128xf32>
    %435 = arith.mulf %423, %403 : vector<2x128xf32>
    %436 = arith.addf %434, %435 : vector<2x128xf32>
    %437 = vector.extract_strided_slice %294 {offsets = [8, 0], sizes = [2, 384], strides = [1, 1]} : vector<12x384xf32> to vector<2x384xf32>
    %438 = arith.addf %437, %299 : vector<2x384xf32>
    %c0_124 = arith.constant 0 : index
    %c0_125 = arith.constant 0 : index
    %439 = vector.load %arg11[%c0_124, %c0_125] : memref<128x384xf32, #tpu.memory_space<vmem>>, vector<128x384xf32>
    %cst_126 = arith.constant dense<0.000000e+00> : vector<2x384xf32>
    %440 = tpu.matmul %436, %439, %cst_126 {dimension_numbers = #tpu.dot_dimension_numbers<[1], [0], [0], [1], [0, 0, 1, 1], [], []>} : vector<2x128xf32>, vector<128x384xf32>, vector<2x384xf32> -> vector<2x384xf32>
    %441 = vector.extract_strided_slice %438 {offsets = [0, 0], sizes = [2, 128], strides = [1, 1]} : vector<2x384xf32> to vector<2x128xf32>
    %442 = vector.extract_strided_slice %440 {offsets = [0, 0], sizes = [2, 128], strides = [1, 1]} : vector<2x384xf32> to vector<2x128xf32>
    %443 = arith.addf %441, %442 : vector<2x128xf32>
    %444 = arith.negf %443 : vector<2x128xf32>
    %445 = math.exp %444 : vector<2x128xf32>
    %cst_127 = arith.constant 1.000000e+00 : f32
    %446 = vector.broadcast %cst_127 : f32 to vector<2x128xf32>
    %447 = arith.addf %446, %445 : vector<2x128xf32>
    %448 = arith.divf %446, %447 : vector<2x128xf32>
    %449 = vector.extract_strided_slice %438 {offsets = [0, 128], sizes = [2, 128], strides = [1, 1]} : vector<2x384xf32> to vector<2x128xf32>
    %450 = vector.extract_strided_slice %440 {offsets = [0, 128], sizes = [2, 128], strides = [1, 1]} : vector<2x384xf32> to vector<2x128xf32>
    %451 = arith.addf %449, %450 : vector<2x128xf32>
    %452 = arith.negf %451 : vector<2x128xf32>
    %453 = math.exp %452 : vector<2x128xf32>
    %cst_128 = arith.constant 1.000000e+00 : f32
    %454 = vector.broadcast %cst_128 : f32 to vector<2x128xf32>
    %455 = arith.addf %454, %453 : vector<2x128xf32>
    %456 = arith.divf %454, %455 : vector<2x128xf32>
    %457 = vector.extract_strided_slice %438 {offsets = [0, 256], sizes = [2, 128], strides = [1, 1]} : vector<2x384xf32> to vector<2x128xf32>
    %458 = vector.extract_strided_slice %440 {offsets = [0, 256], sizes = [2, 128], strides = [1, 1]} : vector<2x384xf32> to vector<2x128xf32>
    %c0_129 = arith.constant 0 : index
    %c0_130 = arith.constant 0 : index
    %459 = vector.load %arg12[%c0_129, %c0_130] : memref<1x128xf32, #tpu.memory_space<vmem>>, vector<1x128xf32>
    %460 = vector.broadcast %459 : vector<1x128xf32> to vector<2x128xf32>
    %461 = arith.addf %458, %460 : vector<2x128xf32>
    %462 = arith.mulf %448, %461 : vector<2x128xf32>
    %463 = arith.addf %457, %462 : vector<2x128xf32>
    %464 = math.tanh %463 : vector<2x128xf32>
    %cst_131 = arith.constant 1.000000e+00 : f32
    %465 = vector.broadcast %cst_131 : f32 to vector<2x128xf32>
    %466 = arith.subf %465, %456 : vector<2x128xf32>
    %467 = arith.mulf %466, %464 : vector<2x128xf32>
    %468 = arith.mulf %456, %436 : vector<2x128xf32>
    %469 = arith.addf %467, %468 : vector<2x128xf32>
    %470 = vector.extract_strided_slice %294 {offsets = [10, 0], sizes = [2, 384], strides = [1, 1]} : vector<12x384xf32> to vector<2x384xf32>
    %471 = arith.addf %470, %299 : vector<2x384xf32>
    %c0_132 = arith.constant 0 : index
    %c0_133 = arith.constant 0 : index
    %472 = vector.load %arg11[%c0_132, %c0_133] : memref<128x384xf32, #tpu.memory_space<vmem>>, vector<128x384xf32>
    %cst_134 = arith.constant dense<0.000000e+00> : vector<2x384xf32>
    %473 = tpu.matmul %469, %472, %cst_134 {dimension_numbers = #tpu.dot_dimension_numbers<[1], [0], [0], [1], [0, 0, 1, 1], [], []>} : vector<2x128xf32>, vector<128x384xf32>, vector<2x384xf32> -> vector<2x384xf32>
    %474 = vector.extract_strided_slice %471 {offsets = [0, 0], sizes = [2, 128], strides = [1, 1]} : vector<2x384xf32> to vector<2x128xf32>
    %475 = vector.extract_strided_slice %473 {offsets = [0, 0], sizes = [2, 128], strides = [1, 1]} : vector<2x384xf32> to vector<2x128xf32>
    %476 = arith.addf %474, %475 : vector<2x128xf32>
    %477 = arith.negf %476 : vector<2x128xf32>
    %478 = math.exp %477 : vector<2x128xf32>
    %cst_135 = arith.constant 1.000000e+00 : f32
    %479 = vector.broadcast %cst_135 : f32 to vector<2x128xf32>
    %480 = arith.addf %479, %478 : vector<2x128xf32>
    %481 = arith.divf %479, %480 : vector<2x128xf32>
    %482 = vector.extract_strided_slice %471 {offsets = [0, 128], sizes = [2, 128], strides = [1, 1]} : vector<2x384xf32> to vector<2x128xf32>
    %483 = vector.extract_strided_slice %473 {offsets = [0, 128], sizes = [2, 128], strides = [1, 1]} : vector<2x384xf32> to vector<2x128xf32>
    %484 = arith.addf %482, %483 : vector<2x128xf32>
    %485 = arith.negf %484 : vector<2x128xf32>
    %486 = math.exp %485 : vector<2x128xf32>
    %cst_136 = arith.constant 1.000000e+00 : f32
    %487 = vector.broadcast %cst_136 : f32 to vector<2x128xf32>
    %488 = arith.addf %487, %486 : vector<2x128xf32>
    %489 = arith.divf %487, %488 : vector<2x128xf32>
    %490 = vector.extract_strided_slice %471 {offsets = [0, 256], sizes = [2, 128], strides = [1, 1]} : vector<2x384xf32> to vector<2x128xf32>
    %491 = vector.extract_strided_slice %473 {offsets = [0, 256], sizes = [2, 128], strides = [1, 1]} : vector<2x384xf32> to vector<2x128xf32>
    %c0_137 = arith.constant 0 : index
    %c0_138 = arith.constant 0 : index
    %492 = vector.load %arg12[%c0_137, %c0_138] : memref<1x128xf32, #tpu.memory_space<vmem>>, vector<1x128xf32>
    %493 = vector.broadcast %492 : vector<1x128xf32> to vector<2x128xf32>
    %494 = arith.addf %491, %493 : vector<2x128xf32>
    %495 = arith.mulf %481, %494 : vector<2x128xf32>
    %496 = arith.addf %490, %495 : vector<2x128xf32>
    %497 = math.tanh %496 : vector<2x128xf32>
    %cst_139 = arith.constant 1.000000e+00 : f32
    %498 = vector.broadcast %cst_139 : f32 to vector<2x128xf32>
    %499 = arith.subf %498, %489 : vector<2x128xf32>
    %500 = arith.mulf %499, %497 : vector<2x128xf32>
    %501 = arith.mulf %489, %469 : vector<2x128xf32>
    %502 = arith.addf %500, %501 : vector<2x128xf32>
    %503 = vector.extract_strided_slice %337 {offsets = [0, 0], sizes = [1, 128], strides = [1, 1]} : vector<2x128xf32> to vector<1x128xf32>
    %504 = vector.extract_strided_slice %370 {offsets = [0, 0], sizes = [1, 128], strides = [1, 1]} : vector<2x128xf32> to vector<1x128xf32>
    %505 = vector.extract_strided_slice %403 {offsets = [0, 0], sizes = [1, 128], strides = [1, 1]} : vector<2x128xf32> to vector<1x128xf32>
    %506 = vector.extract_strided_slice %436 {offsets = [0, 0], sizes = [1, 128], strides = [1, 1]} : vector<2x128xf32> to vector<1x128xf32>
    %507 = vector.extract_strided_slice %469 {offsets = [0, 0], sizes = [1, 128], strides = [1, 1]} : vector<2x128xf32> to vector<1x128xf32>
    %508 = vector.extract_strided_slice %502 {offsets = [0, 0], sizes = [1, 128], strides = [1, 1]} : vector<2x128xf32> to vector<1x128xf32>
    %509 = vector.extract_strided_slice %337 {offsets = [1, 0], sizes = [1, 128], strides = [1, 1]} : vector<2x128xf32> to vector<1x128xf32>
    %510 = vector.extract_strided_slice %370 {offsets = [1, 0], sizes = [1, 128], strides = [1, 1]} : vector<2x128xf32> to vector<1x128xf32>
    %511 = vector.extract_strided_slice %403 {offsets = [1, 0], sizes = [1, 128], strides = [1, 1]} : vector<2x128xf32> to vector<1x128xf32>
    %512 = vector.extract_strided_slice %436 {offsets = [1, 0], sizes = [1, 128], strides = [1, 1]} : vector<2x128xf32> to vector<1x128xf32>
    %513 = vector.extract_strided_slice %469 {offsets = [1, 0], sizes = [1, 128], strides = [1, 1]} : vector<2x128xf32> to vector<1x128xf32>
    %514 = vector.extract_strided_slice %502 {offsets = [1, 0], sizes = [1, 128], strides = [1, 1]} : vector<2x128xf32> to vector<1x128xf32>
    %515 = tpu.concatenate %503, %504, %505, %506, %507, %508, %509, %510, %511, %512, %513, %514 in 0 : vector<1x128xf32>, vector<1x128xf32>, vector<1x128xf32>, vector<1x128xf32>, vector<1x128xf32>, vector<1x128xf32>, vector<1x128xf32>, vector<1x128xf32>, vector<1x128xf32>, vector<1x128xf32>, vector<1x128xf32>, vector<1x128xf32> -> vector<12x128xf32>
    %c0_140 = arith.constant 0 : index
    %c0_141 = arith.constant 0 : index
    %516 = vector.load %arg15[%c0_140, %c0_141] : memref<128x128xf32, #tpu.memory_space<vmem>>, vector<128x128xf32>
    %cst_142 = arith.constant dense<0.000000e+00> : vector<12x128xf32>
    %517 = tpu.matmul %515, %516, %cst_142 {dimension_numbers = #tpu.dot_dimension_numbers<[1], [0], [0], [1], [0, 0, 1, 1], [], []>} : vector<12x128xf32>, vector<128x128xf32>, vector<12x128xf32> -> vector<12x128xf32>
    %c0_143 = arith.constant 0 : index
    %c0_144 = arith.constant 0 : index
    %518 = vector.load %arg16[%c0_143, %c0_144] : memref<1x128xf32, #tpu.memory_space<vmem>>, vector<1x128xf32>
    %519 = vector.broadcast %518 : vector<1x128xf32> to vector<12x128xf32>
    %520 = arith.addf %517, %519 : vector<12x128xf32>
    %cst_145 = arith.constant dense<0xFF800000> : vector<12xf32>
    %521 = vector.multi_reduction <maximumf>, %520, %cst_145 [1] : vector<12x128xf32> to vector<12xf32>
    %522 = vector.shape_cast %521 : vector<12xf32> to vector<12x1xf32>
    %523 = vector.broadcast %522 : vector<12x1xf32> to vector<12x128xf32>
    %524 = arith.subf %520, %523 : vector<12x128xf32>
    %525 = math.exp %524 : vector<12x128xf32>
    %cst_146 = arith.constant dense<0.000000e+00> : vector<12xf32>
    %526 = vector.multi_reduction <add>, %525, %cst_146 [1] : vector<12x128xf32> to vector<12xf32>
    %527 = vector.shape_cast %526 : vector<12xf32> to vector<12x1xf32>
    %528 = math.log %527 : vector<12x1xf32>
    %529 = vector.broadcast %528 : vector<12x1xf32> to vector<12x128xf32>
    %530 = arith.subf %524, %529 : vector<12x128xf32>
    %c0_147 = arith.constant 0 : index
    %c0_148 = arith.constant 0 : index
    %531 = vector.load %arg17[%c0_147, %c0_148] : memref<12x128xf32, #tpu.memory_space<vmem>>, vector<12x128xf32>
    tpu.vector_store %arg17[%c0_147, %c0_148], %530 {strides = array<i32>} : memref<12x128xf32, #tpu.memory_space<vmem>>, vector<12x128xf32>,
    return
  }
}

</mosaic_0001>

<bundles_post_ra>
// kernel: rnnvae_forward.1
= control target key start
LH: loop header
LB: loop body
LE: loop exit
PB: predicated region body
PF: predicated region fallthrough
CT: control target
= control target key end

     0   :  { %s7023_s0 = inlined_call_operand.vmem [shape: s32[16,1], index: 0, kind: input, shape index: {}]   ;;  %s7024_s1 = inlined_call_operand.vmem [shape: s32[16,1], index: 1, kind: input, shape index: {}]   ;;  %s7025_s2 = inlined_call_operand.vmem [shape: s32[12,1], index: 2, kind: input, shape index: {}]   ;;  %s7026_s3 = inlined_call_operand.vmem [shape: f32[2,128], index: 3, kind: input, shape index: {}]   ;;  %s7027_s4 = inlined_call_operand.hbm [shape: f32[64,384], index: 4, kind: input, shape index: {}]   ;;  %s7028_s5 = inlined_call_operand.vmem [shape: f32[1,384], index: 5, kind: input, shape index: {}]   ;;  %s7029_s6 = inlined_call_operand.hbm [shape: f32[128,384], index: 6, kind: input, shape index: {}]   ;;  %s7030_s7 = inlined_call_operand.vmem [shape: f32[1,128], index: 7, kind: input, shape index: {}]   ;;  %s7031_s8 = inlined_call_operand.hbm [shape: f32[32,384], index: 8, kind: input, shape index: {}]   ;;  %s7032_s9 = inlined_call_operand.hbm [shape: f32[128,384], index: 9, kind: input, shape index: {}]   ;;  %s7033_s10 = inlined_call_operand.vmem [shape: f32[1,384], index: 10, kind: input, shape index: {}]   ;;  %s7034_s11 = inlined_call_operand.hbm [shape: f32[128,384], index: 11, kind: input, shape index: {}]   ;;  %s7035_s12 = inlined_call_operand.vmem [shape: f32[1,128], index: 12, kind: input, shape index: {}]   ;;  %s7036_s13 = inlined_call_operand.hbm [shape: f32[128,256], index: 13, kind: input, shape index: {}]   ;;  %s7037_s14 = inlined_call_operand.vmem [shape: f32[1,256], index: 14, kind: input, shape index: {}]   ;;  %s7038_s15 = inlined_call_operand.vmem [shape: f32[128,128], index: 15, kind: input, shape index: {}]   ;;  %s7039_s16 = inlined_call_operand.vmem [shape: f32[1,128], index: 16, kind: input, shape index: {}]   ;;  %s7040_s17 = inlined_call_operand.hbm [shape: f32[12,128], index: 17, kind: output, shape index: {}]  }
   0x1   :  { %7043 = sst [smem:[#allocation19_spill]] %s7023_s0 }
   0x2   :  { %7044 = sst [smem:[#allocation20_spill]] %s7024_s1 }
   0x3   :  { %22 = vsyncpa [#allocation3], 0 }
   0x4   :  { %23 = vsyncpa [#allocation6], 0 }
   0x5   :  { %24 = vsyncpa [#allocation9], 0 }
   0x6   :  { %25 = vsyncpa [#allocation12], 0 }
   0x7   :  { %26 = vsyncpa [#allocation4], 0  ;;  %s5844_s24 = smov [#allocation5]   ;;  %s5845_s26 = smov [#allocation8]  }
   0x8   :  { %s54_s25 = sshll.u32 %s5844_s24, 4  ;;  %s80_s27 = sshll.u32 %s5845_s26, 4  ;;  %s55_s25 = int_to_ptr.vmem [resolvable:$true] %s54_s25  ;;  %s5951_s27 = int_to_ptr.vmem [resolvable:$true] %s80_s27 }
   0x9   :  { %s5680_s0 = scalar_lea.hbm %s7029_s6, 6144 }
   0xa   :  { %p5681_p0 = scmp.ne.s32.totalorder %s7029_s6, %s5680_s0  ;;  %p5684_p1 = scmp.lt.u32.totalorder %s5680_s0, %s7029_s6 }
   0xc   :  { %p5686_p2 = pnand %p5684_p1, %p5681_p0 }
   0xe   :  { %5689 = shalt.err (!%p5686_p2)
}
   0xf   :  { %s5690_s20 = scalar_lea.vmem %s55_s25, 6144  ;;  %p5695_p4 = scmp.lt.s32.totalorder %s55_s25, %s55_s25 }
  0x10   :  { %p5691_p3 = scmp.ne.s32.totalorder %s55_s25, %s5690_s20  ;;  %p5696_p5 = scmp.lt.s32.totalorder %s5690_s20, %s5690_s20 }
  0x12   :  { %p5697_p6 = por %p5696_p5, %p5695_p4 }
  0x14   :  { %p5698_p7 = pnand %p5697_p6, %p5691_p3 }
  0x16   :  { %5701 = shalt.err (!%p5698_p7)
}
  0x17   :  { %s5846_s21 = smov 384   ;;  %s5847_s22 = smov 24  }
  0x18   :  { %60 = dma.hbm_to_vmem [thread:$0]  %s7029_s6, 6144, %s55_s25, [#allocation6], %s5846_s21, %s5846_s21, %s5847_s22  }
  0x19   :  { %s5702_s29 = scalar_lea.hbm %s7032_s9, 6144 }
  0x1a   :  { %p5703_p8 = scmp.ne.s32.totalorder %s7032_s9, %s5702_s29  ;;  %p5706_p9 = scmp.lt.u32.totalorder %s5702_s29, %s7032_s9 }
  0x1c   :  { %p5708_p10 = pnand %p5706_p9, %p5703_p8 }
  0x1e   :  { %5711 = shalt.err (!%p5708_p10)
}
  0x1f   :  { %s5712_s1 = scalar_lea.vmem %s5951_s27, 6144  ;;  %p5717_p12 = scmp.lt.s32.totalorder %s5951_s27, %s5951_s27 }
  0x20   :  { %p5713_p11 = scmp.ne.s32.totalorder %s5951_s27, %s5712_s1  ;;  %p5718_p13 = scmp.lt.s32.totalorder %s5712_s1, %s5712_s1 }
  0x22   :  { %p5719_p0 = por %p5718_p13, %p5717_p12 }
  0x24   :  { %p5720_p1 = pnand %p5719_p0, %p5713_p11 }
  0x26   :  { %5723 = shalt.err (!%p5720_p1)
}
  0x27   :  { %86 = dma.hbm_to_vmem [thread:$0]  %s7032_s9, 6144, %s5951_s27, [#allocation9], %s5846_s21, %s5846_s21, %s5847_s22  }
  0x28   :  { %s5848_s20 = smov [#allocation2]   ;;  %s5849_s24 = smov [#allocation7]  }
  0x29   :  { %s40_s23 = sshll.u32 %s5848_s20, 4  ;;  %s68_s26 = sshll.u32 %s5849_s24, 4  ;;  %s41_s23 = int_to_ptr.vmem [resolvable:$true] %s40_s23  ;;  %s5988_s26 = int_to_ptr.vmem [resolvable:$true] %s68_s26 }
  0x2a   :  { %s5724_s0 = scalar_lea.hbm %s7027_s4, 3072 }
  0x2b   :  { %p5725_p2 = scmp.ne.s32.totalorder %s7027_s4, %s5724_s0  ;;  %p5728_p3 = scmp.lt.u32.totalorder %s5724_s0, %s7027_s4 }
  0x2d   :  { %p5730_p4 = pnand %p5728_p3, %p5725_p2 }
  0x2f   :  { %5733 = shalt.err (!%p5730_p4)
}
  0x30   :  { %s5734_s9 = scalar_lea.vmem %s41_s23, 3072  ;;  %p5739_p6 = scmp.lt.s32.totalorder %s41_s23, %s41_s23 }
  0x31   :  { %p5735_p5 = scmp.ne.s32.totalorder %s41_s23, %s5734_s9  ;;  %p5740_p7 = scmp.lt.s32.totalorder %s5734_s9, %s5734_s9 }
  0x33   :  { %p5741_p8 = por %p5740_p7, %p5739_p6 }
  0x35   :  { %p5742_p9 = pnand %p5741_p8, %p5735_p5 }
  0x37   :  { %5745 = shalt.err (!%p5742_p9)
}
  0x38   :  { %46 = dma.hbm_to_vmem [thread:$0]  %s7027_s4, 3072, %s41_s23, [#allocation3], %s5846_s21, %s5846_s21, %s5847_s22  }
  0x39   :  { %s5746_s24 = scalar_lea.hbm %s7031_s8, 1536 }
  0x3a   :  { %p5747_p10 = scmp.ne.s32.totalorder %s7031_s8, %s5746_s24  ;;  %p5750_p11 = scmp.lt.u32.totalorder %s5746_s24, %s7031_s8 }
  0x3c   :  { %p5752_p12 = pnand %p5750_p11, %p5747_p10 }
  0x3e   :  { %5755 = shalt.err (!%p5752_p12)
}
  0x3f   :  { %s5756_s18 = scalar_lea.vmem %s5988_s26, 1536  ;;  %p5761_p0 = scmp.lt.s32.totalorder %s5988_s26, %s5988_s26 }
  0x40   :  { %p5757_p13 = scmp.ne.s32.totalorder %s5988_s26, %s5756_s18  ;;  %p5762_p1 = scmp.lt.s32.totalorder %s5756_s18, %s5756_s18 }
  0x42   :  { %p5763_p2 = por %p5762_p1, %p5761_p0 }
  0x44   :  { %p5764_p3 = pnand %p5763_p2, %p5757_p13 }
  0x46   :  { %5767 = shalt.err (!%p5764_p3)
}
  0x47   :  { %74 = dma.hbm_to_vmem [thread:$0]  %s7031_s8, 1536, %s5988_s26, [#allocation6], %s5846_s21, %s5846_s21, %s5847_s22  }
  0x48   :  { %s5850_s19 = smov [#allocation10]   ;;  %s5851_s9 = smov [#allocation11]  }
  0x49   :  { %s94_s1 = sshll.u32 %s5850_s19, 4  ;;  %s108_s27 = sshll.u32 %s5851_s9, 4  ;;  %s95_s1 = int_to_ptr.vmem [resolvable:$true] %s94_s1  ;;  %s6025_s27 = int_to_ptr.vmem [resolvable:$true] %s108_s27 }
  0x4a   :  { %s5768_s20 = scalar_lea.hbm %s7034_s11, 6144 }
  0x4b   :  { %p5769_p4 = scmp.ne.s32.totalorder %s7034_s11, %s5768_s20  ;;  %p5772_p5 = scmp.lt.u32.totalorder %s5768_s20, %s7034_s11 }
  0x4d   :  { %p5774_p6 = pnand %p5772_p5, %p5769_p4 }
  0x4f   :  { %5777 = shalt.err (!%p5774_p6)
}
  0x50   :  { %s5778_s8 = scalar_lea.vmem %s95_s1, 6144  ;;  %p5783_p8 = scmp.lt.s32.totalorder %s95_s1, %s95_s1 }
  0x51   :  { %p5779_p7 = scmp.ne.s32.totalorder %s95_s1, %s5778_s8  ;;  %p5784_p9 = scmp.lt.s32.totalorder %s5778_s8, %s5778_s8 }
  0x53   :  { %p5785_p10 = por %p5784_p9, %p5783_p8 }
  0x55   :  { %p5786_p11 = pnand %p5785_p10, %p5779_p7 }
  0x57   :  { %5789 = shalt.err (!%p5786_p11)
}
  0x58   :  { %100 = dma.hbm_to_vmem [thread:$0]  %s7034_s11, 6144, %s95_s1, [#allocation9], %s5846_s21, %s5846_s21, %s5847_s22  }
  0x59   :  { %s5790_s23 = scalar_lea.hbm %s7036_s13, 4096 }
  0x5a   :  { %p5791_p12 = scmp.ne.s32.totalorder %s7036_s13, %s5790_s23  ;;  %p5794_p13 = scmp.lt.u32.totalorder %s5790_s23, %s7036_s13 }
  0x5c   :  { %p5796_p0 = pnand %p5794_p13, %p5791_p12 }
  0x5e   :  { %5799 = shalt.err (!%p5796_p0)
}
  0x5f   :  { %s5800_s20 = scalar_lea.vmem %s6025_s27, 4096  ;;  %p5805_p2 = scmp.lt.s32.totalorder %s6025_s27, %s6025_s27 }
  0x60   :  { %p5801_p1 = scmp.ne.s32.totalorder %s6025_s27, %s5800_s20  ;;  %p5806_p3 = scmp.lt.s32.totalorder %s5800_s20, %s5800_s20 }
  0x62   :  { %p5807_p4 = por %p5806_p3, %p5805_p2 }
  0x64   :  { %p5808_p5 = pnand %p5807_p4, %p5801_p1 }
  0x66   :  { %5811 = shalt.err (!%p5808_p5)
}
  0x67   :  { %s5852_s11 = smov 256   ;;  %s5853_s21 = smov 16  }
  0x68   :  { %114 = dma.hbm_to_vmem [thread:$0]  %s7036_s13, 4096, %s6025_s27, [#allocation12], %s5852_s11, %s5852_s11, %s5853_s21  }
  0x69   :  { %5834 = dma.done.wait [#allocation3], 3072  }
  0x6a   :  { %5835 = vsyncadd [#allocation3], 4294964224 }
  0x6b   :  { %5836 = dma.done.wait [#allocation6], 7680  }
  0x6c   :  { %5837 = vsyncadd [#allocation6], 4294959616 }
  0x6d   :  { %5838 = dma.done.wait [#allocation9], 12288  }
  0x6e   :  { %5839 = vsyncadd [#allocation9], 4294955008 }
  0x6f   :  { %5840 = dma.done.wait [#allocation12], 4096  }
  0x70   :  { %5841 = vsyncadd [#allocation12], 4294963200  ;;  %v5854_v0 = vmov 0   ;;  %s7045_s29 = sld [smem:[#allocation19_spill]]  ;;  %s7046_s26 = sld [smem:[#allocation20_spill]]  ;;  %v170_v7 = vld [vmem:[#allocation2 + $0x8] sm:$0xff]  ;;  %v143_v50 = vlaneseq }
  0x71   :  { %5527 = vset.pattern.permute.xlu0 %v5854_v0  ;;  %5528 = vset.pattern.permute.xlu1 %v5854_v0  ;;  %v173_v8 = vld [vmem:[#allocation2 + $0x20] sm:$0xff]  ;;  %v5855_v10 = vmov 0.0   ;;  %v172_v12 = vld [vmem:[#allocation2 + $0x18] sm:$0xff]  ;;  %v179_v14 = vld [vmem:[#allocation2 + $0x50] sm:$0xff]  ;;  %v5856_v49 = vmov 0.0|0.0   ;;  %vm210_vm3 = vcmask 523264  }
  0x72   :  { %v169_v9 = vld [vmem:[#allocation2] sm:$0xff]  ;;  %281 = vmatprep.mubr.f32.mxu0 %v5855_v10  ;;  %v4558_v11 = vpack.c.bf16 %v173_v8, %v170_v7  ;;  %v176_v13 = vld [vmem:[#allocation2 + $0x38] sm:$0xff]  ;;  %v175_v17 = vld [vmem:[#allocation2 + $0x30] sm:$0xff]  ;;  %v6083_v52 = vand.u32 127, %v143_v50  ;;  %vm5857_vm7 = vmmov 0   ;;  %vm1961_vm9 = vcmask 261120  }
  0x73   :  { %v4560_v15 = vpack.c.bf16 %v172_v12, %v169_v9  ;;  %v4562_v16 = vpack.c.bf16 %v179_v14, %v176_v13  ;;  %v178_v18 = vld [vmem:[#allocation2 + $0x48] sm:$0xff]  ;;  %v185_v20 = vld [vmem:[#allocation2 + $0x80] sm:$0xff]  ;;  %v184_v26 = vld [vmem:[#allocation2 + $0x78] sm:$0xff]  ;;  %vm3477_vm12 = vcmask 1040384   ;;  %vm3479_vm13 = vcmask 1041408  }
  0x74   :  { %v182_v19 = vld [vmem:[#allocation2 + $0x68] sm:$0xff]  ;;  %4559 = vmatprep.subr.bf16.mxu0 %v4558_v11  ;;  %v1935_v21 = vld [vmem:[%s7025_s2] sm:$0xff]  ;;  %v4564_v22 = vpack.c.bf16 %v178_v18, %v175_v17  ;;  %v188_v27 = vld [vmem:[#allocation2 + $0x98] sm:$0xff]  ;;  %vm2326_vm11 = vcmp.lt.s32.totalorder %v6083_v52, 32  ;;  %vm3481_vm14 = vcmask 1042432   ;;  %vm3483_vm15 = vcmask 1043456  }
  0x75   :  { %4561 = vmatpush1.bf16.msra.mxu0 %v4560_v15  ;;  %v1936_v23 = vld [vmem:[%s7025_s2 + $0x8] sm:$0xf]  ;;  %v4566_v24 = vpack.c.bf16 %v185_v20, %v182_v19  ;;  %v181_v25 = vld [vmem:[#allocation2 + $0x60] sm:$0xff]  ;;  %v191_v28 = vld [vmem:[#allocation2 + $0xb0] sm:$0xff] }
  0x76   :  { %v139_v1 = vld [vmem:[%s7045_s29] sm:$0xff]  ;;  %v140_v4 = vld [vmem:[%s7045_s29 + $0x8] sm:$0xff]  ;;  %4563 = vmatprep.subr.bf16.mxu0 %v4562_v16  ;;  %v4568_v29 = vpack.c.bf16 %v184_v26, %v181_v25  ;;  %v187_v30 = vld [vmem:[#allocation2 + $0x90] sm:$0xff]  ;;  %v4570_v31 = vpack.c.bf16 %v191_v28, %v188_v27 }
  0x77   :  { %v141_v2 = vld [vmem:[%s7046_s26] sm:$0xff]  ;;  %146 = vperm.xlu0 %5527, %v139_v1   ;;  %v142_v5 = vld [vmem:[%s7046_s26 + $0x8] sm:$0xff]  ;;  %149 = vperm.xlu1 %5528, %v140_v4   ;;  %v171_v33 = vld [vmem:[#allocation2 + $0x10] sm:$0xff] }
  0x78   :  { %v153_v3 = vadd.s32 32, %v141_v2  ;;  %v154_v6 = vadd.s32 32, %v142_v5  ;;  %v190_v32 = vld [vmem:[#allocation2 + $0xa8] sm:$0xff]  ;;  %v373_v36 = vld [vmem:[#allocation5 + $0x20] sm:$0xff]  ;;  %v180_v41 = vld [vmem:[#allocation2 + $0x58] sm:$0xff] }
  0x79   :  { %4565 = vmatpush1.bf16.msra.mxu0 %v4564_v22  ;;  %v174_v34 = vld [vmem:[#allocation2 + $0x28] sm:$0xff]  ;;  %v4572_v38 = vpack.c.bf16 %v190_v32, %v187_v30  ;;  %v177_v40 = vld [vmem:[#allocation2 + $0x40] sm:$0xff]  ;;  %v183_v43 = vld [vmem:[#allocation2 + $0x70] sm:$0xff] }
  0x7a   :  { %4567 = vmatprep.subr.bf16.mxu0 %v4566_v24  ;;  %v370_v35 = vld [vmem:[#allocation5 + $0x8] sm:$0xff]  ;;  %v4574_v37 = vpack.c.bf16 %v174_v34, %v171_v33  ;;  %v4578_v42 = vpack.c.bf16 %v180_v41, %v177_v40  ;;  %v189_v46 = vld [vmem:[#allocation2 + $0xa0] sm:$0xff]  ;;  %v192_v47 = vld [vmem:[#allocation2 + $0xb8] sm:$0xff] }
  0x7b   :  { %156 = vperm.xlu0 %5527, %v153_v3   ;;  %159 = vperm.xlu1 %5528, %v154_v6   ;;  %v6078_v39 = vpack.c.bf16 %v373_v36, %v370_v35  ;;  %v186_v44 = vld [vmem:[#allocation2 + $0x88] sm:$0xff]  ;;  %v4586_v48 = vpack.c.bf16 %v192_v47, %v189_v46  ;;  %v369_v54 = vld [vmem:[#allocation5] sm:$0xff]  ;;  %v372_v55 = vld [vmem:[#allocation5 + $0x18] sm:$0xff] }
  0x7c   :  { %4575 = vmatprep.subr.bf16.mxu1 %v4574_v37  ;;  %v4582_v45 = vpack.c.bf16 %v186_v44, %v183_v43  ;;  %v376_v56 = vld [vmem:[#allocation5 + $0x38] sm:$0xff]  ;;  %v379_v57 = vld [vmem:[#allocation5 + $0x50] sm:$0xff]  ;;  %v374_v60 = vld [vmem:[#allocation5 + $0x28] sm:$0xff]  ;;  %v6088_v61 = vpack.c.bf16 %v372_v55, %v369_v54 }
  0x7d   :  { %4569 = vmatpush1.bf16.msra.mxu0 %v4568_v29  ;;  %4577 = vmatpush3.bf16.msra.mxu1 %v4574_v37  ;;  %v371_v59 = vld [vmem:[#allocation5 + $0x10] sm:$0xff]  ;;  %v6090_v63 = vpack.c.bf16 %v379_v57, %v376_v56  ;;  %v378_v1 = vld [vmem:[#allocation5 + $0x48] sm:$0xff]  ;;  %v385_v4 = vld [vmem:[#allocation5 + $0x80] sm:$0xff] }
  0x7e   :  { %4571 = vmatprep.subr.bf16.mxu0 %v4570_v31  ;;  %4579 = vmatprep.subr.bf16.mxu1 %v4578_v42  ;;  %v375_v0 = vld [vmem:[#allocation5 + $0x30] sm:$0xff]  ;;  %v382_v3 = vld [vmem:[#allocation5 + $0x68] sm:$0xff]  ;;  %v6096_v5 = vpack.c.bf16 %v374_v60, %v371_v59  ;;  %v377_v7 = vld [vmem:[#allocation5 + $0x40] sm:$0xff] }
  0x7f   :  { %1938 = vperm.xlu0 %5527, %v1935_v21   ;;  %1941 = vperm.xlu1 %5528, %v1936_v23   ;;  %v380_v8 = vld [vmem:[#allocation5 + $0x58] sm:$0xff]  ;;  %v6102_v9 = vpack.c.bf16 %v378_v1, %v375_v0  ;;  %v6106_v11 = vpack.c.bf16 %v385_v4, %v382_v3  ;;  %v381_v12 = vld [vmem:[#allocation5 + $0x60] sm:$0xff]  ;;  %v391_v15 = vld [vmem:[#allocation5 + $0xb0] sm:$0xff] }
  0x80   :  { %v384_v13 = vld [vmem:[#allocation5 + $0x78] sm:$0xff]  ;;  %v6110_v16 = vpack.c.bf16 %v380_v8, %v377_v7  ;;  %v383_v17 = vld [vmem:[#allocation5 + $0x70] sm:$0xff]  ;;  %v386_v18 = vld [vmem:[#allocation5 + $0x88] sm:$0xff]  ;;  %v6217_v7 = vshrl.u32 %v143_v50, 7 }
  0x81   :  { %4573 = vmatpush1.bf16.msra.mxu0 %v4572_v38  ;;  %4581 = vmatpush3.bf16.msra.mxu1 %v4578_v42  ;;  %v388_v14 = vld [vmem:[#allocation5 + $0x98] sm:$0xff]  ;;  %v6117_v19 = vpack.c.bf16 %v384_v13, %v381_v12  ;;  %v387_v21 = vld [vmem:[#allocation5 + $0x90] sm:$0xff]  ;;  %v390_v22 = vld [vmem:[#allocation5 + $0xa8] sm:$0xff]  ;;  %v6124_v25 = vpack.c.bf16 %v386_v18, %v383_v17 }
  0x82   :  { %4591 = vmatprep.subr.bf16.mxu0 %v6078_v39  ;;  %4583 = vmatprep.subr.bf16.mxu1 %v4582_v45  ;;  %v6121_v20 = vpack.c.bf16 %v391_v15, %v388_v14  ;;  %v394_v23 = vld [vmem:[#allocation5 + $0xc8] sm:$0xff]  ;;  %v397_v24 = vld [vmem:[#allocation5 + $0xe0] sm:$0xff]  ;;  %v392_v27 = vld [vmem:[#allocation5 + $0xb8] sm:$0xff]  ;;  %v6128_v28 = vpack.c.bf16 %v390_v22, %v387_v21  ;;  %v205_v8 = vsub.s32 2, %v6217_v7  ;;  %v6224_v13 = vsub.s32 0, %v6217_v7 }
  0x83   :  { %v389_v26 = vld [vmem:[#allocation5 + $0xa0] sm:$0xff]  ;;  %v6131_v29 = vpack.c.bf16 %v397_v24, %v394_v23  ;;  %v396_v31 = vld [vmem:[#allocation5 + $0xd8] sm:$0xff]  ;;  %v403_v33 = vld [vmem:[#allocation5 + $0x110] sm:$0xff]  ;;  %v6229_v17 = vsub.s32 1, %v6217_v7 }
  0x84   :  { %v393_v30 = vld [vmem:[#allocation5 + $0xc0] sm:$0xff]  ;;  %v400_v32 = vld [vmem:[#allocation5 + $0xf8] sm:$0xff]  ;;  %v6134_v34 = vpack.c.bf16 %v392_v27, %v389_v26  ;;  %v395_v35 = vld [vmem:[#allocation5 + $0xd0] sm:$0xff] }
  0x85   :  { %4585 = vmatpush3.bf16.msra.mxu1 %v4582_v45  ;;  %v398_v36 = vld [vmem:[#allocation5 + $0xe8] sm:$0xff]  ;;  %v6138_v37 = vpack.c.bf16 %v396_v31, %v393_v30  ;;  %v6141_v38 = vpack.c.bf16 %v403_v33, %v400_v32  ;;  %v399_v40 = vld [vmem:[#allocation5 + $0xf0] sm:$0xff]  ;;  %v409_v43 = vld [vmem:[#allocation5 + $0x140] sm:$0xff] }
  0x86   :  { %4587 = vmatprep.subr.bf16.mxu1 %v4586_v48  ;;  %v402_v41 = vld [vmem:[#allocation5 + $0x108] sm:$0xff]  ;;  %v6144_v44 = vpack.c.bf16 %v398_v36, %v395_v35  ;;  %v401_v45 = vld [vmem:[#allocation5 + $0x100] sm:$0xff]  ;;  %v404_v46 = vld [vmem:[#allocation5 + $0x118] sm:$0xff] }
  0x87   :  { %v406_v42 = vld [vmem:[#allocation5 + $0x128] sm:$0xff]  ;;  %v6148_v47 = vpack.c.bf16 %v402_v41, %v399_v40  ;;  %v412_v54 = vld [vmem:[#allocation5 + $0x158] sm:$0xff]  ;;  %v415_v55 = vld [vmem:[#allocation5 + $0x170] sm:$0xff]  ;;  %v6154_v56 = vpack.c.bf16 %v404_v46, %v401_v45 }
  0x88   :  { %v407_v57 = vld [vmem:[#allocation5 + $0x130] sm:$0xff]  ;;  %v6161_v60 = vpack.c.bf16 %v415_v55, %v412_v54  ;;  %v414_v0 = vld [vmem:[#allocation5 + $0x168] sm:$0xff]  ;;  %v416_v3 = vld [vmem:[#allocation5 + $0x178] sm:$0xff] }
  0x89   :  { %4589 = vmatpush3.bf16.msra.mxu1 %v4586_v48  ;;  %v6151_v48 = vpack.c.bf16 %v409_v43, %v406_v42  ;;  %v193_v12 = vld [vmem:[%s7028_s5] sm:$0x7] }
  0x8a   :  { %4622 = vmatprep.subr.bf16.mxu1 %v5856_v49  ;;  %v206_v14 = vrot.slane %v193_v12, %v205_v8  ;;  %v198_v50 = vrot.slane %v193_v12, %v6224_v13  ;;  %v202_v24 = vrot.slane %v193_v12, %v6229_v17  ;;  %v6248_v55 = vld [vmem:[%s7030_s7] ss:$0 sm:$0xff] }
  0xf6   :  { %v147_v51 = vpop.permute.xlu0 %146  ;;  %v150_v53 = vpop.permute.xlu1 %149 }
  0xf7   :  { %vm152_vm0 = vcmp.eq.s32.totalorder %v6083_v52, %v150_v53  ;;  %vm151_vm1 = vcmp.eq.s32.totalorder %v6083_v52, %v147_v51  ;;  %v405_v51 = vld [vmem:[#allocation5 + $0x120] sm:$0xff]  ;;  %v408_v53 = vld [vmem:[#allocation5 + $0x138] sm:$0xff] }
  0xf8   :  { %v6158_v59 = vpack.c.bf16 %v408_v53, %v405_v51 }
  0xfa   :  { %v157_v58 = vpop.permute.xlu0 %156  ;;  %v160_v62 = vpop.permute.xlu1 %159 }
  0xfb   :  { %vm161_vm2 = vcmp.eq.s32.totalorder %v6083_v52, %v157_v58  ;;  %vm162_vm5 = vcmp.eq.s32.totalorder %v6083_v52, %v160_v62  ;;  %v410_v58 = vld [vmem:[#allocation5 + $0x148] sm:$0xff]  ;;  %v411_v62 = vld [vmem:[#allocation5 + $0x150] sm:$0xff] }
  0xfc   :  { %vm163_vm4 = vmor %vm151_vm1, %vm161_vm2  ;;  %v6164_v1 = vpack.c.bf16 %v410_v58, %v407_v57  ;;  %v6168_v4 = vpack.c.bf16 %v414_v0, %v411_v62  ;;  %vm3487_vm1 = vcmask 1045504   ;;  %vm3489_vm2 = vcmask 1046528  }
  0xfd   :  { %v3636_v2 = vsel %vm163_vm4, 1.0, %v5855_v10  ;;  %vm164_vm6 = vmor %vm152_vm0, %vm162_vm5  ;;  %vm3485_vm0 = vcmask 1044480  }
  0xfe   :  { %3638 = vmatmul.mubr.msk.f32.vlgmr.msra.gmra.mrb[0].mxu0 %vm210_vm3, %v3636_v2  ;;  %3984 = vmatprep.mubr.msk.f32.mxu1 %vm210_vm3, %v3636_v2  ;;  %v3637_v6 = vsel %vm164_vm6, 1.0, %v5855_v10  ;;  %v413_v2 = vld [vmem:[#allocation5 + $0x160] sm:$0xff] }
  0xff   :  { %4593 = vmatpush1.bf16.msra.mxu0 %v6088_v61  ;;  %287 = vmatprep.mubr.f32.mxu0 %v5855_v10 }
 0x100   :  { %4595 = vmatprep.subr.bf16.mxu0 %v6090_v63  ;;  %3985 = vmatmul.mubr.msk.f32.vlgmr.msra.gmra.mrb[0].mxu1 %vm210_vm3, %v3637_v6 }
 0x101   :  { %4624 = vmatpush3.bf16.msra.mxu1 %v6096_v5  ;;  %4019 = vmatprep.mubr.msk.f32.mxu1 %vm5857_vm7, %v5855_v10 }
 0x102   :  { %3639 = vmatmul.mubr.msk.f32.gmra.mrb[2].mxu0 %vm210_vm3, %v3637_v6  ;;  %4625 = vmatprep.subr.bf16.mxu1 %v5856_v49  ;;  %v6172_v6 = vpack.c.bf16 %v416_v3, %v413_v2 }
 0x103   :  { %4597 = vmatpush1.bf16.msra.mxu0 %v6102_v9  ;;  %481 = vmatprep.mubr.f32.mxu0 %v5855_v10 }
 0x104   :  { %4599 = vmatprep.subr.bf16.mxu0 %v6106_v11 }
 0x105   :  { %4627 = vmatpush3.bf16.msra.mxu1 %v6110_v16 }
 0x106   :  { %4628 = vmatprep.subr.bf16.mxu1 %v5856_v49 }
 0x107   :  { %4601 = vmatpush1.bf16.msra.mxu0 %v6117_v19 }
 0x108   :  { %4603 = vmatprep.subr.bf16.mxu0 %v6121_v20 }
 0x109   :  { %4630 = vmatpush3.bf16.msra.mxu1 %v6124_v25 }
 0x10a   :  { %4631 = vmatprep.subr.bf16.mxu1 %v5856_v49 }
 0x10b   :  { %4605 = vmatpush1.bf16.msra.mxu0 %v6128_v28 }
 0x10c   :  { %4607 = vmatprep.subr.bf16.mxu0 %v6131_v29 }
 0x10d   :  { %4633 = vmatpush3.bf16.msra.mxu1 %v6134_v34 }
 0x10e   :  { %4634 = vmatprep.subr.bf16.mxu1 %v5856_v49 }
 0x10f   :  { %4609 = vmatpush1.bf16.msra.mxu0 %v6138_v37 }
 0x110   :  { %4611 = vmatprep.subr.bf16.mxu0 %v6141_v38 }
 0x111   :  { %4636 = vmatpush3.bf16.msra.mxu1 %v6144_v44 }
 0x112   :  { %4637 = vmatprep.subr.bf16.mxu1 %v5856_v49 }
 0x113   :  { %4613 = vmatpush1.bf16.msra.mxu0 %v6148_v47 }
 0x114   :  { %4615 = vmatprep.subr.bf16.mxu0 %v6151_v48 }
 0x115   :  { %4639 = vmatpush3.bf16.msra.mxu1 %v6154_v56 }
 0x116   :  { %4640 = vmatprep.subr.bf16.mxu1 %v5856_v49 }
 0x117   :  { %4617 = vmatpush1.bf16.msra.mxu0 %v6158_v59 }
 0x118   :  { %4619 = vmatprep.subr.bf16.mxu0 %v6161_v60 }
 0x119   :  { %4642 = vmatpush3.bf16.msra.mxu1 %v6164_v1 }
 0x11a   :  { %4643 = vmatprep.subr.bf16.mxu1 %v5856_v49 }
 0x11b   :  { %4621 = vmatpush1.bf16.msra.mxu0 %v6168_v4 }
 0x11c   :  { %4647 = vmatprep.subr.bf16.mxu0 %v6078_v39 }
 0x11d   :  { %4645 = vmatpush3.bf16.msra.mxu1 %v6172_v6 }
 0x11e   :  { %482 = vmatmul.mubr.f32.vlgmr.msra.gmra.mrb[4].mxu0 %v5855_v10  ;;  %4678 = vmatprep.subr.bf16.mxu1 %v5856_v49 }
 0x11f   :  { %4649 = vmatpush1.bf16.msra.mxu0 %v6088_v61  ;;  %651 = vmatprep.mubr.f32.mxu0 %v5855_v10 }
 0x120   :  { %4020 = vmatmul.mubr.f32.vlgmr.msra.gmra.mrb[2].mxu1 %v5855_v10  ;;  %4651 = vmatprep.subr.bf16.mxu0 %v6090_v63 }
 0x121   :  { %4680 = vmatpush3.bf16.msra.mxu1 %v6096_v5  ;;  %4054 = vmatprep.mubr.msk.f32.mxu1 %vm5857_vm7, %v5855_v10 }
 0x122   :  { %4681 = vmatprep.subr.bf16.mxu1 %v5856_v49 }
 0x123   :  { %4653 = vmatpush1.bf16.msra.mxu0 %v6102_v9 }
 0x124   :  { %4655 = vmatprep.subr.bf16.mxu0 %v6106_v11 }
 0x125   :  { %4683 = vmatpush3.bf16.msra.mxu1 %v6110_v16 }
 0x126   :  { %4684 = vmatprep.subr.bf16.mxu1 %v5856_v49 }
 0x127   :  { %4657 = vmatpush1.bf16.msra.mxu0 %v6117_v19 }
 0x128   :  { %4659 = vmatprep.subr.bf16.mxu0 %v6121_v20 }
 0x129   :  { %4686 = vmatpush3.bf16.msra.mxu1 %v6124_v25 }
 0x12a   :  { %4687 = vmatprep.subr.bf16.mxu1 %v5856_v49 }
 0x12b   :  { %4661 = vmatpush1.bf16.msra.mxu0 %v6128_v28 }
 0x12c   :  { %4663 = vmatprep.subr.bf16.mxu0 %v6131_v29 }
 0x12d   :  { %4689 = vmatpush3.bf16.msra.mxu1 %v6134_v34 }
 0x12e   :  { %4690 = vmatprep.subr.bf16.mxu1 %v5856_v49 }
 0x12f   :  { %4665 = vmatpush1.bf16.msra.mxu0 %v6138_v37 }
 0x130   :  { %4667 = vmatprep.subr.bf16.mxu0 %v6141_v38 }
 0x131   :  { %4692 = vmatpush3.bf16.msra.mxu1 %v6144_v44 }
 0x132   :  { %4693 = vmatprep.subr.bf16.mxu1 %v5856_v49 }
 0x133   :  { %4669 = vmatpush1.bf16.msra.mxu0 %v6148_v47 }
 0x134   :  { %4671 = vmatprep.subr.bf16.mxu0 %v6151_v48 }
 0x135   :  { %4695 = vmatpush3.bf16.msra.mxu1 %v6154_v56 }
 0x136   :  { %4696 = vmatprep.subr.bf16.mxu1 %v5856_v49 }
 0x137   :  { %4673 = vmatpush1.bf16.msra.mxu0 %v6158_v59 }
 0x138   :  { %4675 = vmatprep.subr.bf16.mxu0 %v6161_v60 }
 0x139   :  { %4698 = vmatpush3.bf16.msra.mxu1 %v6164_v1 }
 0x13a   :  { %4699 = vmatprep.subr.bf16.mxu1 %v5856_v49 }
 0x13b   :  { %4677 = vmatpush1.bf16.msra.mxu0 %v6168_v4 }
 0x13c   :  { %4703 = vmatprep.subr.bf16.mxu0 %v6078_v39 }
 0x13d   :  { %4701 = vmatpush3.bf16.msra.mxu1 %v6172_v6 }
 0x13e   :  { %4734 = vmatprep.subr.bf16.mxu1 %v5856_v49 }
 0x1d1   :  { %v283_v15 = vpop.f32.mrb[0].mxu0 }
 0x1d2   :  { %v285_v18 = vpop.f32.mrb[1].mxu0  ;;  %v6239_v32 = vadd.f32 %v283_v15, %v198_v50 }
 0x1d3   :  { %v3986_v21 = vpop.f32.mrb[0].mxu1  ;;  %v6242_v40 = vadd.f32 %v285_v18, %v202_v24 }
 0x1d4   :  { %v6232_v22 = vadd.f32 %v3986_v21, %v206_v14  ;;  %v360_v23 = vpop.f32.mrb[1].mxu1 }
 0x1d5   :  { %v289_v26 = vpop.f32.mrb[2].mxu0  ;;  %v6251_v0 = vadd.f32 %v360_v23, %v206_v14 }
 0x1d6   :  { %v6235_v27 = vadd.f32 %v289_v26, %v198_v50  ;;  %v291_v30 = vpop.f32.mrb[3].mxu0 }
 0x1d7   :  { %v6237_v31 = vadd.f32 %v291_v30, %v202_v24 }
 0x1f1   :  { %v483_v33 = vpop.f32.mrb[4].mxu0 }
 0x1f2   :  { %v558_v35 = vadd.f32 %v483_v33, %v6239_v32  ;;  %v485_v36 = vpop.f32.mrb[5].mxu0 }
 0x1f3   :  { %v554_v41 = vpop.f32.mrb[2].mxu1  ;;  %v565_v45 = vadd.f32 %v485_v36, %v6242_v40 }
 0x1f4   :  { %v3642_v42 = vmul.f32 -1.442695, %v558_v35  ;;  %v4021_v43 = vpop.f32.mrb[3].mxu1  ;;  %v579_v58 = vadd.f32 %v6248_v55, %v554_v41 }
 0x1f5   :  { %v3643_v46 = vmul.f32 -1.442695, %v565_v45 }
 0x1f6   :  { %5529 = vpow2.f32 %v3642_v42 }
 0x1f7   :  { %5531 = vpow2.f32 %v3643_v46 }
 0x200   :  { %v5530_v51 = vpop.eup %5529 }
 0x201   :  { %v562_v53 = vadd.f32 1.0, %v5530_v51  ;;  %v5532_v54 = vpop.eup %5531 }
 0x202   :  { %v569_v57 = vadd.f32 1.0, %v5532_v54 }
 0x203   :  { %5533 = vrcp.f32 %v562_v53 }
 0x204   :  { %5535 = vrcp.f32 %v569_v57 }
 0x20d   :  { %v5534_v62 = vpop.eup %5533 }
 0x20e   :  { %v580_v2 = vmul.f32 %v5534_v62, %v579_v58  ;;  %v5536_v12 = vpop.eup %5535 }
 0x20f   :  { %v583_v15 = vsub.f32 1.0, %v5536_v12  ;;  %v585_v50 = vmul.f32 0.0, %v5536_v12 }
 0x210   :  { %v581_v3 = vadd.f32 %v580_v2, %v6251_v0 }
 0x212   :  { %5537 = vtanh.f32 %v581_v3 }
 0x21c   :  { %v5538_v18 = vpop.eup %5537 }
 0x21d   :  { %v584_v21 = vmul.f32 %v5538_v18, %v583_v15 }
 0x21f   :  { %v586_v24 = vadd.f32 %v585_v50, %v584_v21 }
 0x221   :  { %652 = vmatmul.mubr.f32.vlgmr.msra.gmra.mrb[6].mxu0 %v586_v24  ;;  %4055 = vmatmul.mubr.f32.vlgmr.msra.gmra.mrb[4].mxu1 %v586_v24  ;;  %v758_v62 = vrot.slane %v586_v24, 6 }
 0x222   :  { %4705 = vmatpush1.bf16.msra.mxu0 %v6088_v61  ;;  %4736 = vmatpush3.bf16.msra.mxu1 %v6096_v5 }
 0x223   :  { %4707 = vmatprep.subr.bf16.mxu0 %v6090_v63  ;;  %4737 = vmatprep.subr.bf16.mxu1 %v5856_v49 }
 0x224   :  { %829 = vmatprep.mubr.f32.mxu0 %v5855_v10  ;;  %4089 = vmatprep.mubr.msk.f32.mxu1 %vm5857_vm7, %v5855_v10 }
 0x226   :  { %4709 = vmatpush1.bf16.msra.mxu0 %v6102_v9  ;;  %4739 = vmatpush3.bf16.msra.mxu1 %v6110_v16 }
 0x227   :  { %4711 = vmatprep.subr.bf16.mxu0 %v6106_v11  ;;  %4740 = vmatprep.subr.bf16.mxu1 %v5856_v49 }
 0x22a   :  { %4713 = vmatpush1.bf16.msra.mxu0 %v6117_v19  ;;  %4742 = vmatpush3.bf16.msra.mxu1 %v6124_v25 }
 0x22b   :  { %4715 = vmatprep.subr.bf16.mxu0 %v6121_v20  ;;  %4743 = vmatprep.subr.bf16.mxu1 %v5856_v49 }
 0x22e   :  { %4717 = vmatpush1.bf16.msra.mxu0 %v6128_v28  ;;  %4745 = vmatpush3.bf16.msra.mxu1 %v6134_v34 }
 0x22f   :  { %4719 = vmatprep.subr.bf16.mxu0 %v6131_v29  ;;  %4746 = vmatprep.subr.bf16.mxu1 %v5856_v49 }
 0x232   :  { %4721 = vmatpush1.bf16.msra.mxu0 %v6138_v37  ;;  %4748 = vmatpush3.bf16.msra.mxu1 %v6144_v44 }
 0x233   :  { %4723 = vmatprep.subr.bf16.mxu0 %v6141_v38  ;;  %4749 = vmatprep.subr.bf16.mxu1 %v5856_v49 }
 0x236   :  { %4725 = vmatpush1.bf16.msra.mxu0 %v6148_v47  ;;  %4751 = vmatpush3.bf16.msra.mxu1 %v6154_v56 }
 0x237   :  { %4727 = vmatprep.subr.bf16.mxu0 %v6151_v48  ;;  %4752 = vmatprep.subr.bf16.mxu1 %v5856_v49 }
 0x23a   :  { %4729 = vmatpush1.bf16.msra.mxu0 %v6158_v59  ;;  %4754 = vmatpush3.bf16.msra.mxu1 %v6164_v1 }
 0x23b   :  { %4731 = vmatprep.subr.bf16.mxu0 %v6161_v60  ;;  %4755 = vmatprep.subr.bf16.mxu1 %v5856_v49 }
 0x23e   :  { %4733 = vmatpush1.bf16.msra.mxu0 %v6168_v4  ;;  %4757 = vmatpush3.bf16.msra.mxu1 %v6172_v6 }
 0x23f   :  { %4759 = vmatprep.subr.bf16.mxu0 %v6078_v39  ;;  %4790 = vmatprep.subr.bf16.mxu1 %v5856_v49 }
 0x2f4   :  { %v653_v14 = vpop.f32.mrb[6].mxu0  ;;  %v724_v23 = vpop.f32.mrb[4].mxu1 }
 0x2f5   :  { %v729_v26 = vrot.slane %v653_v14, 6  ;;  %v655_v30 = vpop.f32.mrb[7].mxu0  ;;  %v4056_v33 = vpop.f32.mrb[5].mxu1  ;;  %v748_v54 = vadd.f32 %v6248_v55, %v724_v23 }
 0x2f6   :  { %v739_v35 = vrot.slane %v655_v30, 6 }
 0x2f7   :  { %v731_v36 = vadd.f32 %v729_v26, %v6239_v32  ;;  %v750_v57 = vrot.slane %v748_v54, 6 }
 0x2f8   :  { %v741_v41 = vadd.f32 %v739_v35, %v6242_v40 }
 0x2f9   :  { %v3645_v42 = vmul.f32 -1.442695, %v731_v36 }
 0x2fa   :  { %v3646_v43 = vmul.f32 -1.442695, %v741_v41 }
 0x2fb   :  { %5539 = vpow2.f32 %v3645_v42 }
 0x2fc   :  { %5541 = vpow2.f32 %v3646_v43 }
 0x305   :  { %v5540_v45 = vpop.eup %5539 }
 0x306   :  { %v5542_v46 = vpop.eup %5541  ;;  %v735_v51 = vadd.f32 1.0, %v5540_v45 }
 0x307   :  { %v745_v53 = vadd.f32 1.0, %v5542_v46 }
 0x308   :  { %5543 = vrcp.f32 %v735_v51 }
 0x309   :  { %5545 = vrcp.f32 %v745_v53 }
 0x312   :  { %v5544_v58 = vpop.eup %5543 }
 0x313   :  { %v5546_v2 = vpop.eup %5545  ;;  %v752_v3 = vmul.f32 %v5544_v58, %v750_v57 }
 0x314   :  { %v760_v12 = vmul.f32 %v5546_v2, %v758_v62  ;;  %v755_v18 = vsub.f32 1.0, %v5546_v2 }
 0x315   :  { %v753_v15 = vadd.f32 %v752_v3, %v6251_v0 }
 0x317   :  { %5547 = vtanh.f32 %v753_v15 }
 0x321   :  { %v5548_v21 = vpop.eup %5547 }
 0x322   :  { %v756_v50 = vmul.f32 %v5548_v21, %v755_v18 }
 0x324   :  { %v6293_v14 = vadd.f32 %v760_v12, %v756_v50 }
 0x326   :  { %v763_v26 = vrot.slane %v6293_v14, 2  ;;  %v935_v2 = vrot.slane %v6293_v14, 6 }
 0x328   :  { %830 = vmatmul.mubr.f32.vlgmr.msra.gmra.mrb[8].mxu0 %v763_v26  ;;  %4090 = vmatmul.mubr.f32.vlgmr.msra.gmra.mrb[6].mxu1 %v763_v26 }
 0x329   :  { %4761 = vmatpush1.bf16.msra.mxu0 %v6088_v61  ;;  %4792 = vmatpush3.bf16.msra.mxu1 %v6096_v5 }
 0x32a   :  { %4763 = vmatprep.subr.bf16.mxu0 %v6090_v63  ;;  %4793 = vmatprep.subr.bf16.mxu1 %v5856_v49 }
 0x32b   :  { %1006 = vmatprep.mubr.f32.mxu0 %v5855_v10  ;;  %4124 = vmatprep.mubr.msk.f32.mxu1 %vm5857_vm7, %v5855_v10 }
 0x32d   :  { %4765 = vmatpush1.bf16.msra.mxu0 %v6102_v9  ;;  %4795 = vmatpush3.bf16.msra.mxu1 %v6110_v16 }
 0x32e   :  { %4767 = vmatprep.subr.bf16.mxu0 %v6106_v11  ;;  %4796 = vmatprep.subr.bf16.mxu1 %v5856_v49 }
 0x331   :  { %4769 = vmatpush1.bf16.msra.mxu0 %v6117_v19  ;;  %4798 = vmatpush3.bf16.msra.mxu1 %v6124_v25 }
 0x332   :  { %4771 = vmatprep.subr.bf16.mxu0 %v6121_v20  ;;  %4799 = vmatprep.subr.bf16.mxu1 %v5856_v49 }
 0x335   :  { %4773 = vmatpush1.bf16.msra.mxu0 %v6128_v28  ;;  %4801 = vmatpush3.bf16.msra.mxu1 %v6134_v34 }
 0x336   :  { %4775 = vmatprep.subr.bf16.mxu0 %v6131_v29  ;;  %4802 = vmatprep.subr.bf16.mxu1 %v5856_v49 }
 0x339   :  { %4777 = vmatpush1.bf16.msra.mxu0 %v6138_v37  ;;  %4804 = vmatpush3.bf16.msra.mxu1 %v6144_v44 }
 0x33a   :  { %4779 = vmatprep.subr.bf16.mxu0 %v6141_v38  ;;  %4805 = vmatprep.subr.bf16.mxu1 %v5856_v49 }
 0x33d   :  { %4781 = vmatpush1.bf16.msra.mxu0 %v6148_v47  ;;  %4807 = vmatpush3.bf16.msra.mxu1 %v6154_v56 }
 0x33e   :  { %4783 = vmatprep.subr.bf16.mxu0 %v6151_v48  ;;  %4808 = vmatprep.subr.bf16.mxu1 %v5856_v49 }
 0x341   :  { %4785 = vmatpush1.bf16.msra.mxu0 %v6158_v59  ;;  %4810 = vmatpush3.bf16.msra.mxu1 %v6164_v1 }
 0x342   :  { %4787 = vmatprep.subr.bf16.mxu0 %v6161_v60  ;;  %4811 = vmatprep.subr.bf16.mxu1 %v5856_v49 }
 0x345   :  { %4789 = vmatpush1.bf16.msra.mxu0 %v6168_v4  ;;  %4813 = vmatpush3.bf16.msra.mxu1 %v6172_v6 }
 0x346   :  { %4815 = vmatprep.subr.bf16.mxu0 %v6078_v39  ;;  %4846 = vmatprep.subr.bf16.mxu1 %v5856_v49 }
 0x3fb   :  { %v831_v24 = vpop.f32.mrb[8].mxu0  ;;  %v902_v23 = vpop.f32.mrb[6].mxu1 }
 0x3fc   :  { %v907_v30 = vrot.slane %v831_v24, 4  ;;  %v833_v33 = vpop.f32.mrb[9].mxu0  ;;  %v4091_v35 = vpop.f32.mrb[7].mxu1  ;;  %v926_v57 = vadd.f32 %v6248_v55, %v902_v23 }
 0x3fd   :  { %v917_v36 = vrot.slane %v833_v33, 4 }
 0x3fe   :  { %v909_v41 = vadd.f32 %v907_v30, %v6239_v32  ;;  %v928_v58 = vrot.slane %v926_v57, 4 }
 0x3ff   :  { %v919_v42 = vadd.f32 %v917_v36, %v6242_v40 }
 0x400   :  { %v3647_v43 = vmul.f32 -1.442695, %v909_v41 }
 0x401   :  { %v3648_v45 = vmul.f32 -1.442695, %v919_v42 }
 0x402   :  { %5549 = vpow2.f32 %v3647_v43 }
 0x403   :  { %5551 = vpow2.f32 %v3648_v45 }
 0x40c   :  { %v5550_v46 = vpop.eup %5549 }
 0x40d   :  { %v5552_v51 = vpop.eup %5551  ;;  %v913_v53 = vadd.f32 1.0, %v5550_v46 }
 0x40e   :  { %v923_v54 = vadd.f32 1.0, %v5552_v51 }
 0x40f   :  { %5553 = vrcp.f32 %v913_v53 }
 0x410   :  { %5555 = vrcp.f32 %v923_v54 }
 0x419   :  { %v5554_v62 = vpop.eup %5553 }
 0x41a   :  { %v5556_v3 = vpop.eup %5555  ;;  %v930_v12 = vmul.f32 %v5554_v62, %v928_v58 }
 0x41b   :  { %v937_v15 = vmul.f32 %v5556_v3, %v935_v2  ;;  %v933_v21 = vsub.f32 1.0, %v5556_v3 }
 0x41c   :  { %v931_v18 = vadd.f32 %v930_v12, %v6251_v0 }
 0x41e   :  { %5557 = vtanh.f32 %v931_v18 }
 0x428   :  { %v5558_v50 = vpop.eup %5557 }
 0x429   :  { %v934_v26 = vmul.f32 %v5558_v50, %v933_v21 }
 0x42b   :  { %v6336_v24 = vadd.f32 %v937_v15, %v934_v26 }
 0x42d   :  { %v940_v30 = vrot.slane %v6336_v24, 4  ;;  %v1112_v3 = vrot.slane %v6336_v24, 6 }
 0x42f   :  { %1007 = vmatmul.mubr.f32.vlgmr.msra.gmra.mrb[10].mxu0 %v940_v30  ;;  %4125 = vmatmul.mubr.f32.vlgmr.msra.gmra.mrb[8].mxu1 %v940_v30 }
 0x430   :  { %4817 = vmatpush1.bf16.msra.mxu0 %v6088_v61  ;;  %4848 = vmatpush3.bf16.msra.mxu1 %v6096_v5 }
 0x431   :  { %4819 = vmatprep.subr.bf16.mxu0 %v6090_v63  ;;  %4849 = vmatprep.subr.bf16.mxu1 %v5856_v49 }
 0x432   :  { %1183 = vmatprep.mubr.f32.mxu0 %v5855_v10  ;;  %4159 = vmatprep.mubr.msk.f32.mxu1 %vm5857_vm7, %v5855_v10 }
 0x434   :  { %4821 = vmatpush1.bf16.msra.mxu0 %v6102_v9  ;;  %4851 = vmatpush3.bf16.msra.mxu1 %v6110_v16 }
 0x435   :  { %4823 = vmatprep.subr.bf16.mxu0 %v6106_v11  ;;  %4852 = vmatprep.subr.bf16.mxu1 %v5856_v49 }
 0x438   :  { %4825 = vmatpush1.bf16.msra.mxu0 %v6117_v19  ;;  %4854 = vmatpush3.bf16.msra.mxu1 %v6124_v25 }
 0x439   :  { %4827 = vmatprep.subr.bf16.mxu0 %v6121_v20  ;;  %4855 = vmatprep.subr.bf16.mxu1 %v5856_v49 }
 0x43c   :  { %4829 = vmatpush1.bf16.msra.mxu0 %v6128_v28  ;;  %4857 = vmatpush3.bf16.msra.mxu1 %v6134_v34 }
 0x43d   :  { %4831 = vmatprep.subr.bf16.mxu0 %v6131_v29  ;;  %4858 = vmatprep.subr.bf16.mxu1 %v5856_v49 }
 0x440   :  { %4833 = vmatpush1.bf16.msra.mxu0 %v6138_v37  ;;  %4860 = vmatpush3.bf16.msra.mxu1 %v6144_v44 }
 0x441   :  { %4835 = vmatprep.subr.bf16.mxu0 %v6141_v38  ;;  %4861 = vmatprep.subr.bf16.mxu1 %v5856_v49 }
 0x444   :  { %4837 = vmatpush1.bf16.msra.mxu0 %v6148_v47  ;;  %4863 = vmatpush3.bf16.msra.mxu1 %v6154_v56 }
 0x445   :  { %4839 = vmatprep.subr.bf16.mxu0 %v6151_v48  ;;  %4864 = vmatprep.subr.bf16.mxu1 %v5856_v49 }
 0x448   :  { %4841 = vmatpush1.bf16.msra.mxu0 %v6158_v59  ;;  %4866 = vmatpush3.bf16.msra.mxu1 %v6164_v1 }
 0x449   :  { %4843 = vmatprep.subr.bf16.mxu0 %v6161_v60  ;;  %4867 = vmatprep.subr.bf16.mxu1 %v5856_v49 }
 0x44c   :  { %4845 = vmatpush1.bf16.msra.mxu0 %v6168_v4  ;;  %4869 = vmatpush3.bf16.msra.mxu1 %v6172_v6 }
 0x44d   :  { %4871 = vmatprep.subr.bf16.mxu0 %v6078_v39  ;;  %4902 = vmatprep.subr.bf16.mxu1 %v5856_v49 }
 0x502   :  { %v1008_v14 = vpop.f32.mrb[10].mxu0  ;;  %v1079_v23 = vpop.f32.mrb[8].mxu1 }
 0x503   :  { %v1084_v33 = vrot.slane %v1008_v14, 2  ;;  %v1010_v35 = vpop.f32.mrb[11].mxu0  ;;  %v4126_v36 = vpop.f32.mrb[9].mxu1  ;;  %v1103_v58 = vadd.f32 %v6248_v55, %v1079_v23 }
 0x504   :  { %v1094_v41 = vrot.slane %v1010_v35, 2 }
 0x505   :  { %v1086_v42 = vadd.f32 %v1084_v33, %v6239_v32  ;;  %v1105_v62 = vrot.slane %v1103_v58, 2 }
 0x506   :  { %v1096_v43 = vadd.f32 %v1094_v41, %v6242_v40 }
 0x507   :  { %v3649_v45 = vmul.f32 -1.442695, %v1086_v42 }
 0x508   :  { %v3650_v46 = vmul.f32 -1.442695, %v1096_v43 }
 0x509   :  { %5559 = vpow2.f32 %v3649_v45 }
 0x50a   :  { %5561 = vpow2.f32 %v3650_v46 }
 0x513   :  { %v5560_v51 = vpop.eup %5559 }
 0x514   :  { %v5562_v53 = vpop.eup %5561  ;;  %v1090_v54 = vadd.f32 1.0, %v5560_v51 }
 0x515   :  { %v1100_v57 = vadd.f32 1.0, %v5562_v53 }
 0x516   :  { %5563 = vrcp.f32 %v1090_v54 }
 0x517   :  { %5565 = vrcp.f32 %v1100_v57 }
 0x520   :  { %v5564_v2 = vpop.eup %5563 }
 0x521   :  { %v5566_v12 = vpop.eup %5565  ;;  %v1107_v32 = vmul.f32 %v5564_v2, %v1105_v62 }
 0x522   :  { %v1114_v15 = vmul.f32 %v5566_v12, %v1112_v3  ;;  %v1110_v18 = vsub.f32 1.0, %v5566_v12 }
 0x523   :  { %v1108_v40 = vadd.f32 %v1107_v32, %v6251_v0 }
 0x525   :  { %5567 = vtanh.f32 %v1108_v40 }
 0x52f   :  { %v5568_v21 = vpop.eup %5567 }
 0x530   :  { %v1111_v50 = vmul.f32 %v5568_v21, %v1110_v18 }
 0x532   :  { %v1115_v26 = vadd.f32 %v1114_v15, %v1111_v50 }
 0x534   :  { %v1117_v30 = vrot.slane %v1115_v26, 6 }
 0x536   :  { %1184 = vmatmul.mubr.f32.vlgmr.msra.gmra.mrb[12].mxu0 %v1117_v30  ;;  %4160 = vmatmul.mubr.f32.vlgmr.msra.gmra.mrb[10].mxu1 %v1117_v30 }
 0x537   :  { %4873 = vmatpush1.bf16.msra.mxu0 %v6088_v61  ;;  %4904 = vmatpush3.bf16.msra.mxu1 %v6096_v5 }
 0x538   :  { %4875 = vmatprep.subr.bf16.mxu0 %v6090_v63  ;;  %4905 = vmatprep.subr.bf16.mxu1 %v5856_v49 }
 0x539   :  { %1346 = vmatprep.mubr.f32.mxu0 %v5855_v10  ;;  %4194 = vmatprep.mubr.msk.f32.mxu1 %vm5857_vm7, %v5855_v10 }
 0x53b   :  { %4877 = vmatpush1.bf16.msra.mxu0 %v6102_v9  ;;  %4907 = vmatpush3.bf16.msra.mxu1 %v6110_v16 }
 0x53c   :  { %4879 = vmatprep.subr.bf16.mxu0 %v6106_v11  ;;  %4908 = vmatprep.subr.bf16.mxu1 %v5856_v49 }
 0x53f   :  { %4881 = vmatpush1.bf16.msra.mxu0 %v6117_v19  ;;  %4910 = vmatpush3.bf16.msra.mxu1 %v6124_v25 }
 0x540   :  { %4883 = vmatprep.subr.bf16.mxu0 %v6121_v20  ;;  %4911 = vmatprep.subr.bf16.mxu1 %v5856_v49 }
 0x543   :  { %4885 = vmatpush1.bf16.msra.mxu0 %v6128_v28  ;;  %4913 = vmatpush3.bf16.msra.mxu1 %v6134_v34 }
 0x544   :  { %4887 = vmatprep.subr.bf16.mxu0 %v6131_v29  ;;  %4914 = vmatprep.subr.bf16.mxu1 %v5856_v49 }
 0x547   :  { %4889 = vmatpush1.bf16.msra.mxu0 %v6138_v37  ;;  %4916 = vmatpush3.bf16.msra.mxu1 %v6144_v44 }
 0x548   :  { %4891 = vmatprep.subr.bf16.mxu0 %v6141_v38  ;;  %4917 = vmatprep.subr.bf16.mxu1 %v5856_v49 }
 0x54b   :  { %4893 = vmatpush1.bf16.msra.mxu0 %v6148_v47  ;;  %4919 = vmatpush3.bf16.msra.mxu1 %v6154_v56 }
 0x54c   :  { %4895 = vmatprep.subr.bf16.mxu0 %v6151_v48  ;;  %4920 = vmatprep.subr.bf16.mxu1 %v5856_v49 }
 0x54f   :  { %4897 = vmatpush1.bf16.msra.mxu0 %v6158_v59  ;;  %4922 = vmatpush3.bf16.msra.mxu1 %v6164_v1 }
 0x550   :  { %4899 = vmatprep.subr.bf16.mxu0 %v6161_v60  ;;  %4923 = vmatprep.subr.bf16.mxu1 %v5856_v49 }
 0x553   :  { %4901 = vmatpush1.bf16.msra.mxu0 %v6168_v4  ;;  %4925 = vmatpush3.bf16.msra.mxu1 %v6172_v6 }
 0x554   :  { %4927 = vmatprep.subr.bf16.mxu0 %v6078_v39  ;;  %4958 = vmatprep.subr.bf16.mxu1 %v5856_v49 }
 0x609   :  { %v1185_v0 = vpop.f32.mrb[12].mxu0  ;;  %v1256_v24 = vpop.f32.mrb[10].mxu1 }
 0x60a   :  { %v1260_v14 = vadd.f32 %v1185_v0, %v6235_v27  ;;  %v1187_v23 = vpop.f32.mrb[13].mxu0  ;;  %v4161_v33 = vpop.f32.mrb[11].mxu1  ;;  %v1274_v51 = vadd.f32 %v6248_v55, %v1256_v24 }
 0x60b   :  { %v1267_v36 = vadd.f32 %v1187_v23, %v6237_v31 }
 0x60c   :  { %v3651_v35 = vmul.f32 -1.442695, %v1260_v14 }
 0x60d   :  { %v3652_v41 = vmul.f32 -1.442695, %v1267_v36 }
 0x60e   :  { %5569 = vpow2.f32 %v3651_v35 }
 0x60f   :  { %5571 = vpow2.f32 %v3652_v41 }
 0x618   :  { %v5570_v42 = vpop.eup %5569 }
 0x619   :  { %v1264_v43 = vadd.f32 1.0, %v5570_v42  ;;  %v5572_v45 = vpop.eup %5571 }
 0x61a   :  { %v1271_v46 = vadd.f32 1.0, %v5572_v45 }
 0x61b   :  { %5573 = vrcp.f32 %v1264_v43 }
 0x61c   :  { %5575 = vrcp.f32 %v1271_v46 }
 0x625   :  { %v5574_v53 = vpop.eup %5573 }
 0x626   :  { %v1275_v54 = vmul.f32 %v5574_v53, %v1274_v51  ;;  %v5576_v58 = vpop.eup %5575 }
 0x627   :  { %v1278_v62 = vsub.f32 1.0, %v5576_v58  ;;  %v1280_v12 = vmul.f32 %v5576_v58, %v1117_v30 }
 0x628   :  { %v1276_v57 = vadd.f32 %v1275_v54, %v6232_v22 }
 0x62a   :  { %5577 = vtanh.f32 %v1276_v57 }
 0x634   :  { %v5578_v2 = vpop.eup %5577 }
 0x635   :  { %v1279_v3 = vmul.f32 %v5578_v2, %v1278_v62 }
 0x637   :  { %v1281_v32 = vadd.f32 %v1280_v12, %v1279_v3 }
 0x639   :  { %1347 = vmatmul.mubr.f32.vlgmr.msra.gmra.mrb[14].mxu0 %v1281_v32  ;;  %4195 = vmatmul.mubr.f32.vlgmr.msra.gmra.mrb[12].mxu1 %v1281_v32  ;;  %v1453_v43 = vrot.slane %v1281_v32, 6 }
 0x63a   :  { %4929 = vmatpush1.bf16.msra.mxu0 %v6088_v61  ;;  %4960 = vmatpush3.bf16.msra.mxu1 %v6096_v5 }
 0x63b   :  { %4931 = vmatprep.subr.bf16.mxu0 %v6090_v63  ;;  %4961 = vmatprep.subr.bf16.mxu1 %v5856_v49 }
 0x63c   :  { %1524 = vmatprep.mubr.f32.mxu0 %v5855_v10  ;;  %4229 = vmatprep.mubr.msk.f32.mxu1 %vm5857_vm7, %v5855_v10 }
 0x63e   :  { %4933 = vmatpush1.bf16.msra.mxu0 %v6102_v9  ;;  %4963 = vmatpush3.bf16.msra.mxu1 %v6110_v16 }
 0x63f   :  { %4935 = vmatprep.subr.bf16.mxu0 %v6106_v11  ;;  %4964 = vmatprep.subr.bf16.mxu1 %v5856_v49 }
 0x642   :  { %4937 = vmatpush1.bf16.msra.mxu0 %v6117_v19  ;;  %4966 = vmatpush3.bf16.msra.mxu1 %v6124_v25 }
 0x643   :  { %4939 = vmatprep.subr.bf16.mxu0 %v6121_v20  ;;  %4967 = vmatprep.subr.bf16.mxu1 %v5856_v49 }
 0x646   :  { %4941 = vmatpush1.bf16.msra.mxu0 %v6128_v28  ;;  %4969 = vmatpush3.bf16.msra.mxu1 %v6134_v34 }
 0x647   :  { %4943 = vmatprep.subr.bf16.mxu0 %v6131_v29  ;;  %4970 = vmatprep.subr.bf16.mxu1 %v5856_v49 }
 0x64a   :  { %4945 = vmatpush1.bf16.msra.mxu0 %v6138_v37  ;;  %4972 = vmatpush3.bf16.msra.mxu1 %v6144_v44 }
 0x64b   :  { %4947 = vmatprep.subr.bf16.mxu0 %v6141_v38  ;;  %4973 = vmatprep.subr.bf16.mxu1 %v5856_v49 }
 0x64e   :  { %4949 = vmatpush1.bf16.msra.mxu0 %v6148_v47  ;;  %4975 = vmatpush3.bf16.msra.mxu1 %v6154_v56 }
 0x64f   :  { %4951 = vmatprep.subr.bf16.mxu0 %v6151_v48  ;;  %4976 = vmatprep.subr.bf16.mxu1 %v5856_v49 }
 0x652   :  { %4953 = vmatpush1.bf16.msra.mxu0 %v6158_v59  ;;  %4978 = vmatpush3.bf16.msra.mxu1 %v6164_v1 }
 0x653   :  { %4955 = vmatprep.subr.bf16.mxu0 %v6161_v60  ;;  %4979 = vmatprep.subr.bf16.mxu1 %v5856_v49 }
 0x656   :  { %4957 = vmatpush1.bf16.msra.mxu0 %v6168_v4  ;;  %4981 = vmatpush3.bf16.msra.mxu1 %v6172_v6 }
 0x657   :  { %5014 = vmatprep.subr.bf16.mxu1 %v5856_v49  ;;  %4983 = vmatprep.subr.bf16.mxu0 %v6078_v39 }
 0x70c   :  { %v1348_v15 = vpop.f32.mrb[14].mxu0  ;;  %v1419_v40 = vpop.f32.mrb[12].mxu1 }
 0x70d   :  { %v1424_v18 = vrot.slane %v1348_v15, 6  ;;  %v1350_v21 = vpop.f32.mrb[15].mxu0  ;;  %v4196_v50 = vpop.f32.mrb[13].mxu1  ;;  %v1443_v39 = vadd.f32 %v6248_v55, %v1419_v40 }
 0x70e   :  { %v1434_v26 = vrot.slane %v1350_v21, 6  ;;  %v1939_v40 = vpop.permute.xlu0 %1938  ;;  %v1957_v21 = vld [vmem:[#allocation7 + $0x40] sm:$0xff]  ;;  %v1960_v50 = vld [vmem:[#allocation7 + $0x58] sm:$0xff] }
 0x70f   :  { %v1426_v30 = vadd.f32 %v1424_v18, %v6235_v27  ;;  %v1445_v41 = vrot.slane %v1443_v39, 6  ;;  %vm1943_vm8 = vcmp.eq.s32.totalorder %v6083_v52, %v1939_v40  ;;  %v1813_v39 = vld [vmem:[#allocation11 + $0x10] sm:$0xff] }
 0x710   :  { %v1436_v0 = vadd.f32 %v1434_v26, %v6237_v31 }
 0x711   :  { %v3653_v24 = vmul.f32 -1.442695, %v1426_v30  ;;  %v5082_v30 = vpack.c.bf16 %v1960_v50, %v1957_v21  ;;  %v1841_v21 = vld [vmem:[#allocation11 + $0xf0] sm:$0xff]  ;;  %v1950_v50 = vld [vmem:[#allocation7 + $0x8] sm:$0xff] }
 0x712   :  { %v3654_v14 = vmul.f32 -1.442695, %v1436_v0  ;;  %v6503_v0 = vsel %vm1943_vm8, 1.0, %v5855_v10 }
 0x713   :  { %5579 = vpow2.f32 %v3653_v24  ;;  %v1942_v24 = vpop.permute.xlu1 %1941 }
 0x714   :  { %5581 = vpow2.f32 %v3654_v14  ;;  %vm1944_vm10 = vcmp.eq.s32.totalorder %v6083_v52, %v1942_v24  ;;  %v2168_v52 = vld [vmem:[%s7033_s10] sm:$0x7] }
 0x715   :  { %v6510_v14 = vsel %vm1944_vm10, 1.0, %v5855_v10 }
 0x71d   :  { %v5580_v23 = vpop.eup %5579 }
 0x71e   :  { %v5582_v33 = vpop.eup %5581  ;;  %v1430_v35 = vadd.f32 1.0, %v5580_v23  ;;  %v1812_v23 = vld [vmem:[#allocation11 + $0x8] sm:$0xff] }
 0x71f   :  { %v1440_v36 = vadd.f32 1.0, %v5582_v33  ;;  %v1814_v33 = vld [vmem:[#allocation11 + $0x18] sm:$0xff] }
 0x720   :  { %5583 = vrcp.f32 %v1430_v35  ;;  %v5038_v35 = vpack.c.bf16 %v1814_v33, %v1812_v23  ;;  %v2121_v23 = vld [vmem:[#allocation8 + $0x8] sm:$0xff]  ;;  %v2124_v33 = vld [vmem:[#allocation8 + $0x20] sm:$0xff] }
 0x721   :  { %5585 = vrcp.f32 %v1440_v36  ;;  %v1811_v36 = vld [vmem:[#allocation11] sm:$0xff] }
 0x72a   :  { %v5584_v42 = vpop.eup %5583 }
 0x72b   :  { %v5586_v45 = vpop.eup %5585  ;;  %v1447_v46 = vmul.f32 %v5584_v42, %v1445_v41  ;;  %v5040_v41 = vpack.c.bf16 %v1813_v39, %v1811_v36  ;;  %v1816_v42 = vld [vmem:[#allocation11 + $0x28] sm:$0xff]  ;;  %v5086_v36 = vpack.c.bf16 %v2124_v33, %v2121_v23  ;;  %v2123_v39 = vld [vmem:[#allocation8 + $0x18] sm:$0xff] }
 0x72c   :  { %v1455_v51 = vmul.f32 %v5586_v45, %v1453_v43  ;;  %v1450_v54 = vsub.f32 1.0, %v5586_v45  ;;  %v1818_v43 = vld [vmem:[#allocation11 + $0x38] sm:$0xff]  ;;  %v1958_v33 = vld [vmem:[#allocation7 + $0x48] sm:$0xff] }
 0x72d   :  { %v1448_v53 = vadd.f32 %v1447_v46, %v6232_v22  ;;  %v5042_v45 = vpack.c.bf16 %v1818_v43, %v1816_v42  ;;  %v1815_v46 = vld [vmem:[#allocation11 + $0x20] sm:$0xff]  ;;  %v2127_v42 = vld [vmem:[#allocation8 + $0x38] sm:$0xff]  ;;  %v2130_v43 = vld [vmem:[#allocation8 + $0x50] sm:$0xff] }
 0x72f   :  { %5587 = vtanh.f32 %v1448_v53 }
 0x739   :  { %v5588_v57 = vpop.eup %5587 }
 0x73a   :  { %v1451_v58 = vmul.f32 %v5588_v57, %v1450_v54  ;;  %v1820_v54 = vld [vmem:[#allocation11 + $0x48] sm:$0xff]  ;;  %v1822_v57 = vld [vmem:[#allocation11 + $0x58] sm:$0xff] }
 0x73c   :  { %v6457_v62 = vadd.f32 %v1455_v51, %v1451_v58  ;;  %v1817_v51 = vld [vmem:[#allocation11 + $0x30] sm:$0xff]  ;;  %v5046_v58 = vpack.c.bf16 %v1822_v57, %v1820_v54  ;;  %v2133_v54 = vld [vmem:[#allocation8 + $0x68] sm:$0xff]  ;;  %v2136_v57 = vld [vmem:[#allocation8 + $0x80] sm:$0xff] }
 0x73d   :  { %v5044_v53 = vpack.c.bf16 %v1817_v51, %v1815_v46  ;;  %v5090_v46 = vpack.c.bf16 %v2130_v43, %v2127_v42  ;;  %v2129_v51 = vld [vmem:[#allocation8 + $0x48] sm:$0xff]  ;;  %v2131_v42 = vld [vmem:[#allocation8 + $0x58] sm:$0xff] }
 0x73e   :  { %v1458_v2 = vrot.slane %v6457_v62, 2 }
 0x740   :  { %1525 = vmatmul.mubr.f32.vlgmr.msra.gmra.mrb[16].mxu0 %v1458_v2  ;;  %4230 = vmatmul.mubr.f32.vlgmr.msra.gmra.mrb[14].mxu1 %v1458_v2  ;;  %v1821_v2 = vld [vmem:[#allocation11 + $0x50] sm:$0xff] }
 0x741   :  { %5016 = vmatpush3.bf16.msra.mxu1 %v6096_v5  ;;  %4985 = vmatpush1.bf16.msra.mxu0 %v6088_v61  ;;  %v1951_v61 = vld [vmem:[#allocation7 + $0x10] sm:$0xff] }
 0x742   :  { %5017 = vmatprep.subr.bf16.mxu1 %v5856_v49  ;;  %4987 = vmatprep.subr.bf16.mxu0 %v6090_v63  ;;  %v1954_v63 = vld [vmem:[#allocation7 + $0x28] sm:$0xff] }
 0x743   :  { %1701 = vmatprep.mubr.f32.mxu0 %v5855_v10  ;;  %4264 = vmatprep.mubr.msk.f32.mxu1 %vm5857_vm7, %v5855_v10  ;;  %v5078_v5 = vpack.c.bf16 %v1954_v63, %v1951_v61  ;;  %v1824_v63 = vld [vmem:[#allocation11 + $0x68] sm:$0xff] }
 0x745   :  { %5019 = vmatpush3.bf16.msra.mxu1 %v6110_v16  ;;  %4989 = vmatpush1.bf16.msra.mxu0 %v6102_v9 }
 0x746   :  { %5020 = vmatprep.subr.bf16.mxu1 %v5856_v49  ;;  %4991 = vmatprep.subr.bf16.mxu0 %v6106_v11 }
 0x749   :  { %5022 = vmatpush3.bf16.msra.mxu1 %v6124_v25  ;;  %4993 = vmatpush1.bf16.msra.mxu0 %v6117_v19 }
 0x74a   :  { %5023 = vmatprep.subr.bf16.mxu1 %v5856_v49  ;;  %4995 = vmatprep.subr.bf16.mxu0 %v6121_v20 }
 0x74d   :  { %5025 = vmatpush3.bf16.msra.mxu1 %v6134_v34  ;;  %4997 = vmatpush1.bf16.msra.mxu0 %v6128_v28 }
 0x74e   :  { %5026 = vmatprep.subr.bf16.mxu1 %v5856_v49  ;;  %4999 = vmatprep.subr.bf16.mxu0 %v6131_v29 }
 0x751   :  { %5028 = vmatpush3.bf16.msra.mxu1 %v6144_v44  ;;  %5001 = vmatpush1.bf16.msra.mxu0 %v6138_v37 }
 0x752   :  { %5029 = vmatprep.subr.bf16.mxu1 %v5856_v49  ;;  %5003 = vmatprep.subr.bf16.mxu0 %v6141_v38 }
 0x755   :  { %5031 = vmatpush3.bf16.msra.mxu1 %v6154_v56  ;;  %5005 = vmatpush1.bf16.msra.mxu0 %v6148_v47 }
 0x756   :  { %5032 = vmatprep.subr.bf16.mxu1 %v5856_v49  ;;  %5007 = vmatprep.subr.bf16.mxu0 %v6151_v48 }
 0x759   :  { %5034 = vmatpush3.bf16.msra.mxu1 %v6164_v1  ;;  %5009 = vmatpush1.bf16.msra.mxu0 %v6158_v59  ;;  %v1630_v1 = vrot.slane %v6457_v62, 6  ;;  %v1819_v62 = vld [vmem:[#allocation11 + $0x40] sm:$0xff] }
 0x75a   :  { %5035 = vmatprep.subr.bf16.mxu1 %v5856_v49  ;;  %5011 = vmatprep.subr.bf16.mxu0 %v6161_v60  ;;  %v5048_v61 = vpack.c.bf16 %v1821_v2, %v1819_v62  ;;  %v2132_v62 = vld [vmem:[#allocation8 + $0x60] sm:$0xff]  ;;  %v2135_v2 = vld [vmem:[#allocation8 + $0x78] sm:$0xff] }
 0x75d   :  { %5037 = vmatpush3.bf16.msra.mxu1 %v6172_v6  ;;  %5013 = vmatpush1.bf16.msra.mxu0 %v6168_v4 }
 0x75e   :  { %5079 = vmatprep.subr.bf16.mxu1 %v5078_v5  ;;  %5039 = vmatprep.subr.bf16.mxu0 %v5038_v35  ;;  %v2120_v35 = vld [vmem:[#allocation8] sm:$0xff] }
 0x813   :  { %v1526_v9 = vpop.f32.mrb[16].mxu0  ;;  %v1597_v11 = vpop.f32.mrb[14].mxu1 }
 0x814   :  { %v1602_v16 = vrot.slane %v1526_v9, 4  ;;  %v1528_v19 = vpop.f32.mrb[17].mxu0  ;;  %v4231_v20 = vpop.f32.mrb[15].mxu1  ;;  %v1621_v56 = vadd.f32 %v6248_v55, %v1597_v11  ;;  %v1823_v11 = vld [vmem:[#allocation11 + $0x60] sm:$0xff] }
 0x815   :  { %v1612_v25 = vrot.slane %v1528_v19, 4  ;;  %v1828_v20 = vld [vmem:[#allocation11 + $0x88] sm:$0xff] }
 0x816   :  { %v1604_v28 = vadd.f32 %v1602_v16, %v6235_v27  ;;  %v1623_v59 = vrot.slane %v1621_v56, 4  ;;  %v1825_v16 = vld [vmem:[#allocation11 + $0x70] sm:$0xff] }
 0x817   :  { %v1614_v29 = vadd.f32 %v1612_v25, %v6237_v31  ;;  %v5052_v19 = vpack.c.bf16 %v1825_v16, %v1823_v11  ;;  %v1830_v25 = vld [vmem:[#allocation11 + $0x98] sm:$0xff]  ;;  %v1833_v56 = vld [vmem:[#allocation11 + $0xb0] sm:$0xff] }
 0x818   :  { %v3655_v34 = vmul.f32 -1.442695, %v1604_v28  ;;  %v5054_v28 = vpack.c.bf16 %v1830_v25, %v1828_v20 }
 0x819   :  { %v3656_v37 = vmul.f32 -1.442695, %v1614_v29  ;;  %v1827_v29 = vld [vmem:[#allocation11 + $0x80] sm:$0xff] }
 0x81a   :  { %5589 = vpow2.f32 %v3655_v34  ;;  %v1829_v34 = vld [vmem:[#allocation11 + $0x90] sm:$0xff] }
 0x81b   :  { %5591 = vpow2.f32 %v3656_v37  ;;  %v5056_v37 = vpack.c.bf16 %v1829_v34, %v1827_v29 }
 0x824   :  { %v5590_v38 = vpop.eup %5589 }
 0x825   :  { %v5592_v44 = vpop.eup %5591  ;;  %v1608_v47 = vadd.f32 1.0, %v5590_v38  ;;  %v1832_v38 = vld [vmem:[#allocation11 + $0xa8] sm:$0xff] }
 0x826   :  { %v1618_v48 = vadd.f32 1.0, %v5592_v44  ;;  %v1834_v44 = vld [vmem:[#allocation11 + $0xb8] sm:$0xff] }
 0x827   :  { %5593 = vrcp.f32 %v1608_v47  ;;  %v1831_v47 = vld [vmem:[#allocation11 + $0xa0] sm:$0xff] }
 0x828   :  { %5595 = vrcp.f32 %v1618_v48  ;;  %v5058_v48 = vpack.c.bf16 %v1834_v44, %v1832_v38 }
 0x831   :  { %v5594_v60 = vpop.eup %5593 }
 0x832   :  { %v5596_v4 = vpop.eup %5595  ;;  %v1625_v6 = vmul.f32 %v5594_v60, %v1623_v59  ;;  %v1836_v59 = vld [vmem:[#allocation11 + $0xc8] sm:$0xff]  ;;  %v1838_v60 = vld [vmem:[#allocation11 + $0xd8] sm:$0xff] }
 0x833   :  { %v1632_v3 = vmul.f32 %v5596_v4, %v1630_v1  ;;  %v1628_v32 = vsub.f32 1.0, %v5596_v4  ;;  %v5060_v1 = vpack.c.bf16 %v1833_v56, %v1831_v47  ;;  %v5062_v4 = vpack.c.bf16 %v1838_v60, %v1836_v59 }
 0x834   :  { %v1626_v12 = vadd.f32 %v1625_v6, %v6232_v22  ;;  %v1835_v6 = vld [vmem:[#allocation11 + $0xc0] sm:$0xff] }
 0x836   :  { %5597 = vtanh.f32 %v1626_v12  ;;  %v1840_v12 = vld [vmem:[#allocation11 + $0xe8] sm:$0xff] }
 0x840   :  { %v5598_v15 = vpop.eup %5597 }
 0x841   :  { %v1629_v18 = vmul.f32 %v5598_v15, %v1628_v32  ;;  %v1842_v32 = vld [vmem:[#allocation11 + $0xf8] sm:$0xff] }
 0x842   :  { %v5066_v40 = vpack.c.bf16 %v1842_v32, %v1840_v12 }
 0x843   :  { %v6498_v26 = vadd.f32 %v1632_v3, %v1629_v18  ;;  %v1837_v3 = vld [vmem:[#allocation11 + $0xd0] sm:$0xff]  ;;  %v1839_v18 = vld [vmem:[#allocation11 + $0xe0] sm:$0xff] }
 0x844   :  { %v5064_v15 = vpack.c.bf16 %v1837_v3, %v1835_v6 }
 0x845   :  { %v1635_v55 = vrot.slane %v6498_v26, 4  ;;  %v1807_v60 = vrot.slane %v6498_v26, 6  ;;  %v1955_v26 = vld [vmem:[#allocation7 + $0x30] sm:$0xff] }
 0x847   :  { %1702 = vmatmul.mubr.f32.vlgmr.msra.gmra.mrb[18].mxu0 %v1635_v55  ;;  %4265 = vmatmul.mubr.f32.vlgmr.msra.gmra.mrb[16].mxu1 %v1635_v55  ;;  %v1953_v55 = vld [vmem:[#allocation7 + $0x20] sm:$0xff] }
 0x848   :  { %5081 = vmatpush3.bf16.msra.mxu1 %v5078_v5  ;;  %4275 = vmatprep.mubr.msk.f32.mxu1 %vm1961_vm9, %v6503_v0  ;;  %v1826_v5 = vld [vmem:[#allocation11 + $0x78] sm:$0xff]  ;;  %v5070_v24 = vpack.c.bf16 %v1953_v55, %v1950_v50  ;;  %v1959_v50 = vld [vmem:[#allocation7 + $0x50] sm:$0xff] }
 0x849   :  { %5083 = vmatprep.subr.bf16.mxu1 %v5082_v30  ;;  %1922 = vmatprep.mubr.f32.mxu0 %v5855_v10  ;;  %v5050_v9 = vpack.c.bf16 %v1826_v5, %v1824_v63 }
 0x84a   :  { %5041 = vmatpush1.bf16.msra.mxu0 %v5040_v41  ;;  %v5088_v41 = vpack.c.bf16 %v2123_v39, %v2120_v35  ;;  %v5076_v35 = vpack.c.bf16 %v1958_v33, %v1955_v26  ;;  %v2167_v33 = vld [vmem:[#allocation8 + $0x178] sm:$0xff] }
 0x84b   :  { %5043 = vmatprep.subr.bf16.mxu0 %v5042_v45  ;;  %v2126_v45 = vld [vmem:[#allocation8 + $0x30] sm:$0xff] }
 0x84c   :  { %5085 = vmatpush3.bf16.msra.mxu1 %v5082_v30  ;;  %v5068_v30 = vpack.c.bf16 %v1841_v21, %v1839_v18  ;;  %v1952_v18 = vld [vmem:[#allocation7 + $0x18] sm:$0xff] }
 0x84d   :  { %5087 = vmatprep.subr.bf16.mxu1 %v5086_v36  ;;  %v1956_v21 = vld [vmem:[#allocation7 + $0x38] sm:$0xff]  ;;  %v2125_v36 = vld [vmem:[#allocation8 + $0x28] sm:$0xff] }
 0x84e   :  { %5045 = vmatpush1.bf16.msra.mxu0 %v5044_v53  ;;  %v5092_v53 = vpack.c.bf16 %v2129_v51, %v2126_v45  ;;  %v5074_v23 = vpack.c.bf16 %v1959_v50, %v1956_v21  ;;  %v2134_v45 = vld [vmem:[#allocation8 + $0x70] sm:$0xff] }
 0x84f   :  { %4276 = vmatmul.mubr.msk.f32.vlgmr.msra.gmra.mrb[18].mxu1 %vm1961_vm9, %v6510_v14  ;;  %5047 = vmatprep.subr.bf16.mxu0 %v5046_v58  ;;  %v5094_v58 = vpack.c.bf16 %v2136_v57, %v2133_v54  ;;  %v2138_v57 = vld [vmem:[#allocation8 + $0x90] sm:$0xff] }
 0x850   :  { %2249 = vmatprep.mubr.f32.mxu1 %v5855_v10  ;;  %5089 = vmatpush1.bf16.msra.mxu1 %v5088_v41  ;;  %v2128_v41 = vld [vmem:[#allocation8 + $0x40] sm:$0xff] }
 0x851   :  { %5091 = vmatprep.subr.bf16.mxu1 %v5090_v46  ;;  %v5122_v43 = vpack.c.bf16 %v2131_v42, %v2128_v41  ;;  %v2137_v46 = vld [vmem:[#allocation8 + $0x88] sm:$0xff]  ;;  %v1843_v41 = vld [vmem:[%s7037_s14] sm:$0x3] }
 0x852   :  { %5049 = vmatpush1.bf16.msra.mxu0 %v5048_v61  ;;  %v5096_v61 = vpack.c.bf16 %v2135_v2, %v2132_v62  ;;  %v5125_v51 = vpack.c.bf16 %v2137_v46, %v2134_v45  ;;  %v2140_v62 = vld [vmem:[#allocation8 + $0xa0] sm:$0xff]  ;;  %v1852_v42 = vrot.slane %v1843_v41, %v6229_v17 }
 0x853   :  { %5051 = vmatprep.subr.bf16.mxu0 %v5050_v9 }
 0x854   :  { %5093 = vmatpush1.bf16.msra.mxu1 %v5092_v53  ;;  %v2142_v53 = vld [vmem:[#allocation8 + $0xb0] sm:$0xff] }
 0x855   :  { %5095 = vmatprep.subr.bf16.mxu1 %v5094_v58  ;;  %v2141_v58 = vld [vmem:[#allocation8 + $0xa8] sm:$0xff] }
 0x856   :  { %5053 = vmatpush1.bf16.msra.mxu0 %v5052_v19  ;;  %v5100_v2 = vpack.c.bf16 %v2141_v58, %v2138_v57 }
 0x857   :  { %5055 = vmatprep.subr.bf16.mxu0 %v5054_v28 }
 0x858   :  { %5097 = vmatpush1.bf16.msra.mxu1 %v5096_v61  ;;  %v2143_v61 = vld [vmem:[#allocation8 + $0xb8] sm:$0xff] }
 0x85a   :  { %5057 = vmatpush1.bf16.msra.mxu0 %v5056_v37 }
 0x85b   :  { %5059 = vmatprep.subr.bf16.mxu0 %v5058_v48 }
 0x85e   :  { %5061 = vmatpush1.bf16.msra.mxu0 %v5060_v1 }
 0x85f   :  { %5063 = vmatprep.subr.bf16.mxu0 %v5062_v4 }
 0x862   :  { %5065 = vmatpush1.bf16.msra.mxu0 %v5064_v15 }
 0x863   :  { %5067 = vmatprep.subr.bf16.mxu0 %v5066_v40  ;;  %v1949_v40 = vld [vmem:[#allocation7] sm:$0xff] }
 0x866   :  { %5069 = vmatpush1.bf16.msra.mxu0 %v5068_v30  ;;  %v5072_v30 = vpack.c.bf16 %v1952_v18, %v1949_v40  ;;  %v2163_v40 = vld [vmem:[#allocation8 + $0x158] sm:$0xff]  ;;  %v2166_v18 = vld [vmem:[#allocation8 + $0x170] sm:$0xff] }
 0x867   :  { %5071 = vmatprep.subr.bf16.mxu0 %v5070_v24  ;;  %v5114_v50 = vpack.c.bf16 %v2166_v18, %v2163_v40 }
 0x91a   :  { %v1703_v63 = vpop.f32.mrb[18].mxu0  ;;  %v1774_v5 = vpop.f32.mrb[16].mxu1 }
 0x91b   :  { %v1779_v9 = vrot.slane %v1703_v63, 2  ;;  %v1705_v11 = vpop.f32.mrb[19].mxu0  ;;  %v4266_v16 = vpop.f32.mrb[17].mxu1  ;;  %v2145_v63 = vld [vmem:[#allocation8 + $0xc8] sm:$0xff] }
 0x91c   :  { %v1789_v19 = vrot.slane %v1705_v11, 2  ;;  %v2144_v11 = vld [vmem:[#allocation8 + $0xc0] sm:$0xff]  ;;  %v2147_v16 = vld [vmem:[#allocation8 + $0xd8] sm:$0xff] }
 0x91d   :  { %v1781_v20 = vadd.f32 %v1779_v9, %v6235_v27  ;;  %v5679_v27 = vld [vmem:[%s7030_s7] ss:$0 sm:$0xff] }
 0x91e   :  { %v1791_v25 = vadd.f32 %v1789_v19, %v6237_v31  ;;  %v1798_v56 = vadd.f32 %v5679_v27, %v1774_v5  ;;  %v2148_v5 = vld [vmem:[#allocation8 + $0xe0] sm:$0xff]  ;;  %v2146_v19 = vld [vmem:[#allocation8 + $0xd0] sm:$0xff] }
 0x91f   :  { %v3657_v28 = vmul.f32 -1.442695, %v1781_v20  ;;  %v5102_v9 = vpack.c.bf16 %v2148_v5, %v2145_v63  ;;  %v5104_v20 = vpack.c.bf16 %v2147_v16, %v2144_v11  ;;  %v2152_v27 = vld [vmem:[#allocation8 + $0x100] sm:$0xff]  ;;  %v2333_v63 = vld [vmem:[#allocation10 + $0x10] sm:$0xff]  ;;  %v2336_v5 = vld [vmem:[#allocation10 + $0x28] sm:$0xff] }
 0x920   :  { %v3658_v29 = vmul.f32 -1.442695, %v1791_v25  ;;  %v1800_v31 = vrot.slane %v1798_v56, 2  ;;  %v2149_v25 = vld [vmem:[#allocation8 + $0xe8] sm:$0xff]  ;;  %v2338_v11 = vld [vmem:[#allocation10 + $0x38] sm:$0xff]  ;;  %v2341_v16 = vld [vmem:[#allocation10 + $0x50] sm:$0xff] }
 0x921   :  { %5599 = vpow2.f32 %v3657_v28  ;;  %v5131_v28 = vpack.c.bf16 %v2149_v25, %v2146_v19 }
 0x922   :  { %5601 = vpow2.f32 %v3658_v29  ;;  %v6517_v34 = vpop.f32.mrb[18].mxu1  ;;  %v2151_v29 = vld [vmem:[#allocation8 + $0xf8] sm:$0xff] }
 0x923   :  { %v6519_v37 = vpop.f32.mrb[19].mxu1 }
 0x92b   :  { %v5600_v38 = vpop.eup %5599 }
 0x92c   :  { %v5602_v44 = vpop.eup %5601  ;;  %v1785_v47 = vadd.f32 1.0, %v5600_v38  ;;  %v2154_v38 = vld [vmem:[#allocation8 + $0x110] sm:$0xff] }
 0x92d   :  { %v1795_v48 = vadd.f32 1.0, %v5602_v44  ;;  %v5106_v44 = vpack.c.bf16 %v2154_v38, %v2151_v29  ;;  %v2337_v29 = vld [vmem:[#allocation10 + $0x30] sm:$0xff] }
 0x92e   :  { %5603 = vrcp.f32 %v1785_v47  ;;  %v2150_v47 = vld [vmem:[#allocation8 + $0xf0] sm:$0xff] }
 0x92f   :  { %5605 = vrcp.f32 %v1795_v48  ;;  %v2153_v48 = vld [vmem:[#allocation8 + $0x108] sm:$0xff] }
 0x930   :  { %v5108_v56 = vpack.c.bf16 %v2153_v48, %v2150_v47  ;;  %v2340_v47 = vld [vmem:[#allocation10 + $0x48] sm:$0xff]  ;;  %v2339_v48 = vld [vmem:[#allocation10 + $0x40] sm:$0xff] }
 0x938   :  { %v5604_v59 = vpop.eup %5603 }
 0x939   :  { %v5606_v1 = vpop.eup %5605  ;;  %v1802_v4 = vmul.f32 %v5604_v59, %v1800_v31  ;;  %v2155_v31 = vld [vmem:[#allocation8 + $0x118] sm:$0xff] }
 0x93a   :  { %v1809_v6 = vmul.f32 %v5606_v1, %v1807_v60  ;;  %v1805_v12 = vsub.f32 1.0, %v5606_v1  ;;  %v5134_v59 = vpack.c.bf16 %v2155_v31, %v2152_v27  ;;  %v2157_v60 = vld [vmem:[#allocation8 + $0x128] sm:$0xff]  ;;  %v2160_v1 = vld [vmem:[#allocation8 + $0x140] sm:$0xff]  ;;  %v2342_v27 = vld [vmem:[#allocation10 + $0x58] sm:$0xff] }
 0x93b   :  { %v1803_v3 = vadd.f32 %v1802_v4, %v6232_v22  ;;  %v2122_v22 = vld [vmem:[#allocation8 + $0x10] sm:$0xff]  ;;  %v5110_v4 = vpack.c.bf16 %v2160_v1, %v2157_v60  ;;  %v2347_v31 = vld [vmem:[#allocation10 + $0x80] sm:$0xff]  ;;  %v6575_v60 = vpack.c.bf16 %v2342_v27, %v2339_v48  ;;  %v2372_v48 = vld [vmem:[#allocation10 + $0x148] sm:$0xff] }
 0x93c   :  { %v5119_v39 = vpack.c.bf16 %v2125_v36, %v2122_v22  ;;  %v2335_v22 = vld [vmem:[#allocation10 + $0x20] sm:$0xff]  ;;  %v2374_v27 = vld [vmem:[#allocation10 + $0x158] sm:$0xff] }
 0x93d   :  { %5607 = vtanh.f32 %v1803_v3  ;;  %v2159_v3 = vld [vmem:[#allocation8 + $0x138] sm:$0xff]  ;;  %v2343_v1 = vld [vmem:[#allocation10 + $0x60] sm:$0xff] }
 0x947   :  { %v5608_v32 = vpop.eup %5607 }
 0x948   :  { %v1806_v15 = vmul.f32 %v5608_v32, %v1805_v12  ;;  %v2158_v12 = vld [vmem:[#allocation8 + $0x130] sm:$0xff] }
 0x94a   :  { %v6526_v55 = vadd.f32 %v1809_v6, %v1806_v15  ;;  %v2156_v6 = vld [vmem:[#allocation8 + $0x120] sm:$0xff]  ;;  %v2161_v15 = vld [vmem:[#allocation8 + $0x148] sm:$0xff] }
 0x94b   :  { %v5112_v32 = vpack.c.bf16 %v2159_v3, %v2156_v6  ;;  %v5137_v21 = vpack.c.bf16 %v2161_v15, %v2158_v12  ;;  %v2346_v6 = vld [vmem:[#allocation10 + $0x78] sm:$0xff]  ;;  %v2345_v3 = vld [vmem:[#allocation10 + $0x70] sm:$0xff]  ;;  %v2348_v12 = vld [vmem:[#allocation10 + $0x88] sm:$0xff] }
 0x94c   :  { %v1856_v24 = vrot.slane %v6526_v55, 6  ;;  %v2353_v15 = vld [vmem:[#allocation10 + $0xb0] sm:$0xff]  ;;  %v6586_v40 = vpack.c.bf16 %v2346_v6, %v2343_v1  ;;  %v6588_v18 = vpack.c.bf16 %v2348_v12, %v2345_v3  ;;  %v2376_v12 = vld [vmem:[#allocation10 + $0x168] sm:$0xff] }
 0x94d   :  { %v2373_v6 = vld [vmem:[#allocation10 + $0x150] sm:$0xff] }
 0x94e   :  { %1923 = vmatmul.mubr.f32.vlgmr.msra.gmra.mrb[20].mxu0 %v1856_v24  ;;  %v2165_v24 = vld [vmem:[#allocation8 + $0x168] sm:$0xff] }
 0x94f   :  { %5073 = vmatpush1.bf16.msra.mxu0 %v5072_v30  ;;  %2032 = vmatprep.mubr.f32.mxu0 %v5855_v10  ;;  %v2162_v30 = vld [vmem:[#allocation8 + $0x150] sm:$0xff] }
 0x950   :  { %5075 = vmatprep.subr.bf16.mxu0 %v5074_v23  ;;  %v2164_v23 = vld [vmem:[#allocation8 + $0x160] sm:$0xff]  ;;  %v5116_v26 = vpack.c.bf16 %v2165_v24, %v2162_v30  ;;  %v2352_v30 = vld [vmem:[#allocation10 + $0xa8] sm:$0xff] }
 0x951   :  { %v5140_v36 = vpack.c.bf16 %v2167_v33, %v2164_v23  ;;  %v2351_v24 = vld [vmem:[#allocation10 + $0xa0] sm:$0xff]  ;;  %v2354_v23 = vld [vmem:[#allocation10 + $0xb8] sm:$0xff] }
 0x952   :  { %v2359_v33 = vld [vmem:[#allocation10 + $0xe0] sm:$0xff] }
 0x953   :  { %5077 = vmatpush1.bf16.msra.mxu0 %v5076_v35  ;;  %v2332_v35 = vld [vmem:[#allocation10 + $0x8] sm:$0xff] }
 0x954   :  { %5118 = vmatprep.subr.bf16.mxu0 %v5856_v49 }
 0x956   :  { %3661 = vmatmul.mubr.msk.f32.vlgmr.msra.gmra.mrb[22].mxu0 %vm1961_vm9, %v6503_v0  ;;  %v2139_v0 = vld [vmem:[#allocation8 + $0x98] sm:$0xff] }
 0x957   :  { %2038 = vmatprep.mubr.f32.mxu0 %v5855_v10  ;;  %5120 = vmatpush3.bf16.msra.mxu0 %v5119_v39  ;;  %v5098_v54 = vpack.c.bf16 %v2142_v53, %v2139_v0  ;;  %v6544_v39 = vpack.c.bf16 %v2335_v22, %v2332_v35  ;;  %v6598_v22 = vpack.c.bf16 %v2354_v23, %v2351_v24  ;;  %v2327_v24 = vsel %vm2326_vm11, %v6526_v55, 0.0 }
 0x958   :  { %5121 = vmatprep.subr.bf16.mxu0 %v5856_v49  ;;  %v6646_v23 = vrot.slane %v2327_v24, 6  ;;  %v2173_v55 = vrot.slane %v2168_v52, %v6224_v13 }
 0x959   :  { %5099 = vmatprep.subr.bf16.mxu1 %v5098_v54 }
 0x95a   :  { %3662 = vmatmul.mubr.msk.f32.gmra.mrb[24].mxu0 %vm1961_vm9, %v6510_v14  ;;  %v5128_v14 = vpack.c.bf16 %v2143_v61, %v2140_v62  ;;  %5101 = vmatpush1.bf16.msra.mxu1 %v5100_v2  ;;  %v1848_v62 = vrot.slane %v1843_v41, %v6224_v13  ;;  %v1929_v2 = vld [vmem:[%s7026_s3] sm:$0x3] }
 0x95b   :  { %5123 = vmatpush3.bf16.msra.mxu0 %v5122_v43  ;;  %4310 = vmatprep.mubr.msk.f32.mxu0 %vm5857_vm7, %v5855_v10  ;;  %v2331_v61 = vld [vmem:[#allocation10] sm:$0xff] }
 0x95c   :  { %5124 = vmatprep.subr.bf16.mxu0 %v5856_v49  ;;  %5103 = vmatprep.subr.bf16.mxu1 %v5102_v9 }
 0x95e   :  { %5105 = vmatpush1.bf16.msra.mxu1 %v5104_v20 }
 0x95f   :  { %5126 = vmatpush3.bf16.msra.mxu0 %v5125_v51  ;;  %5107 = vmatprep.subr.bf16.mxu1 %v5106_v44  ;;  %v6569_v44 = vpack.c.bf16 %v2341_v16, %v2338_v11  ;;  %v2371_v11 = vld [vmem:[#allocation10 + $0x140] sm:$0xff] }
 0x960   :  { %5127 = vmatprep.subr.bf16.mxu0 %v5856_v49 }
 0x962   :  { %5109 = vmatpush1.bf16.msra.mxu1 %v5108_v56  ;;  %v2344_v56 = vld [vmem:[#allocation10 + $0x68] sm:$0xff] }
 0x963   :  { %5129 = vmatpush3.bf16.msra.mxu0 %v5128_v14  ;;  %5111 = vmatprep.subr.bf16.mxu1 %v5110_v4  ;;  %v2334_v14 = vld [vmem:[#allocation10 + $0x18] sm:$0xff]  ;;  %v6579_v4 = vpack.c.bf16 %v2347_v31, %v2344_v56  ;;  %v2377_v56 = vld [vmem:[#allocation10 + $0x170] sm:$0xff] }
 0x964   :  { %5130 = vmatprep.subr.bf16.mxu0 %v5856_v49  ;;  %v6565_v25 = vpack.c.bf16 %v2334_v14, %v2331_v61  ;;  %v2364_v14 = vld [vmem:[#allocation10 + $0x108] sm:$0xff]  ;;  %v6632_v3 = vpack.c.bf16 %v2377_v56, %v2374_v27 }
 0x966   :  { %5113 = vmatpush1.bf16.msra.mxu1 %v5112_v32  ;;  %v2350_v32 = vld [vmem:[#allocation10 + $0x98] sm:$0xff] }
 0x967   :  { %5132 = vmatpush3.bf16.msra.mxu0 %v5131_v28  ;;  %5115 = vmatprep.subr.bf16.mxu1 %v5114_v50  ;;  %v6567_v28 = vpack.c.bf16 %v2336_v5, %v2333_v63  ;;  %v6592_v50 = vpack.c.bf16 %v2353_v15, %v2350_v32  ;;  %v2363_v63 = vld [vmem:[#allocation10 + $0x100] sm:$0xff]  ;;  %v2366_v5 = vld [vmem:[#allocation10 + $0x118] sm:$0xff] }
 0x968   :  { %5133 = vmatprep.subr.bf16.mxu0 %v5856_v49  ;;  %v2375_v32 = vld [vmem:[#allocation10 + $0x160] sm:$0xff]  ;;  %v2378_v15 = vld [vmem:[#allocation10 + $0x178] sm:$0xff] }
 0x96a   :  { %5117 = vmatpush1.bf16.msra.mxu1 %v5116_v26  ;;  %v2356_v26 = vld [vmem:[#allocation10 + $0xc8] sm:$0xff] }
 0x96b   :  { %5135 = vmatpush3.bf16.msra.mxu0 %v5134_v59  ;;  %5143 = vmatprep.subr.bf16.mxu1 %v6544_v39  ;;  %v6573_v59 = vpack.c.bf16 %v2340_v47, %v2337_v29  ;;  %v6602_v41 = vpack.c.bf16 %v2359_v33, %v2356_v26  ;;  %v2369_v47 = vld [vmem:[#allocation10 + $0x130] sm:$0xff]  ;;  %v2181_v26 = vrot.slane %v2168_v52, %v205_v8 }
 0x96c   :  { %5136 = vmatprep.subr.bf16.mxu0 %v5856_v49  ;;  %v6628_v1 = vpack.c.bf16 %v2372_v48, %v2369_v47  ;;  %v2177_v33 = vrot.slane %v2168_v52, %v6229_v17 }
 0x96f   :  { %5138 = vmatpush3.bf16.msra.mxu0 %v5137_v21  ;;  %v2349_v21 = vld [vmem:[#allocation10 + $0x90] sm:$0xff] }
 0x970   :  { %5139 = vmatprep.subr.bf16.mxu0 %v5856_v49  ;;  %v6596_v35 = vpack.c.bf16 %v2352_v30, %v2349_v21  ;;  %v6637_v21 = vpack.c.bf16 %v2376_v12, %v2373_v6  ;;  %v6639_v30 = vpack.c.bf16 %v2378_v15, %v2375_v32 }
 0x973   :  { %5141 = vmatpush3.bf16.msra.mxu0 %v5140_v36  ;;  %v2355_v36 = vld [vmem:[#allocation10 + $0xc0] sm:$0xff] }
 0x974   :  { %5174 = vmatprep.subr.bf16.mxu0 %v5856_v49 }
 0xa21   :  { %v1924_v43 = vpop.f32.mrb[20].mxu0 }
 0xa22   :  { %v1926_v45 = vpop.f32.mrb[21].mxu0  ;;  %v1925_v19 = vadd.f32 %v1924_v43, %v1848_v62  ;;  %v2357_v43 = vld [vmem:[#allocation10 + $0xd0] sm:$0xff] }
 0xa23   :  { %v1927_v46 = vadd.f32 %v1926_v45, %v1852_v42  ;;  %v2358_v42 = vld [vmem:[#allocation10 + $0xd8] sm:$0xff]  ;;  %v2360_v45 = vld [vmem:[#allocation10 + $0xe8] sm:$0xff] }
 0xa24   :  { %v6608_v62 = vpack.c.bf16 %v2360_v45, %v2357_v43 }
 0xa25   :  { %v1930_v51 = vmul.f32 0.5, %v1927_v46  ;;  %v2362_v46 = vld [vmem:[#allocation10 + $0xf8] sm:$0xff] }
 0xa27   :  { %v1931_v0 = vmul.f32 1.442695, %v1930_v51  ;;  %v2365_v51 = vld [vmem:[#allocation10 + $0x110] sm:$0xff] }
 0xa28   :  { %v6612_v61 = vpack.c.bf16 %v2365_v51, %v2362_v46 }
 0xa29   :  { %5609 = vpow2.f32 %v1931_v0  ;;  %v6553_v53 = vpop.f32.mrb[22].mxu0  ;;  %v6606_v0 = vpack.c.bf16 %v2358_v42, %v2355_v36 }
 0xa2a   :  { %v6555_v54 = vpop.f32.mrb[23].mxu0 }
 0xa2d   :  { %v6557_v57 = vpop.f32.mrb[24].mxu0 }
 0xa2e   :  { %v6559_v58 = vpop.f32.mrb[25].mxu0 }
 0xa33   :  { %v5610_v9 = vpop.eup %5609 }
 0xa34   :  { %v1933_v20 = vmul.f32 %v5610_v9, %v1929_v2  ;;  %v2361_v2 = vld [vmem:[#allocation10 + $0xf0] sm:$0xff]  ;;  %v2368_v9 = vld [vmem:[#allocation10 + $0x128] sm:$0xff] }
 0xa35   :  { %v6616_v16 = vpack.c.bf16 %v2364_v14, %v2361_v2  ;;  %v6622_v29 = vpack.c.bf16 %v2371_v11, %v2368_v9 }
 0xa36   :  { %v1934_v38 = vadd.f32 %v1933_v20, %v1925_v19  ;;  %v6618_v19 = vpack.c.bf16 %v2366_v5, %v2363_v63  ;;  %v2367_v20 = vld [vmem:[#allocation10 + $0x120] sm:$0xff] }
 0xa38   :  { %2250 = vmatmul.mubr.f32.vlgmr.msra.gmra.mrb[20].mxu1 %v1934_v38  ;;  %4311 = vmatmul.mubr.f32.vlgmr.msra.gmra.mrb[26].mxu0 %v1934_v38  ;;  %v2370_v38 = vld [vmem:[#allocation10 + $0x138] sm:$0xff] }
 0xa39   :  { %5145 = vmatpush1.bf16.msra.mxu1 %v6565_v25  ;;  %5176 = vmatpush3.bf16.msra.mxu0 %v6567_v28  ;;  %v6626_v31 = vpack.c.bf16 %v2370_v38, %v2367_v20 }
 0xa3a   :  { %5147 = vmatprep.subr.bf16.mxu1 %v6569_v44  ;;  %5177 = vmatprep.subr.bf16.mxu0 %v5856_v49 }
 0xa3b   :  { %2446 = vmatprep.mubr.f32.mxu1 %v5855_v10  ;;  %4345 = vmatprep.mubr.msk.f32.mxu0 %vm5857_vm7, %v5855_v10 }
 0xa3d   :  { %5149 = vmatpush1.bf16.msra.mxu1 %v6573_v59  ;;  %5179 = vmatpush3.bf16.msra.mxu0 %v6575_v60 }
 0xa3e   :  { %5151 = vmatprep.subr.bf16.mxu1 %v6579_v4  ;;  %5180 = vmatprep.subr.bf16.mxu0 %v5856_v49 }
 0xa41   :  { %5153 = vmatpush1.bf16.msra.mxu1 %v6586_v40  ;;  %5182 = vmatpush3.bf16.msra.mxu0 %v6588_v18 }
 0xa42   :  { %5155 = vmatprep.subr.bf16.mxu1 %v6592_v50  ;;  %5183 = vmatprep.subr.bf16.mxu0 %v5856_v49 }
 0xa45   :  { %5157 = vmatpush1.bf16.msra.mxu1 %v6596_v35  ;;  %5185 = vmatpush3.bf16.msra.mxu0 %v6598_v22 }
 0xa46   :  { %5159 = vmatprep.subr.bf16.mxu1 %v6602_v41  ;;  %5186 = vmatprep.subr.bf16.mxu0 %v5856_v49 }
 0xa49   :  { %5161 = vmatpush1.bf16.msra.mxu1 %v6606_v0  ;;  %5188 = vmatpush3.bf16.msra.mxu0 %v6608_v62 }
 0xa4a   :  { %5163 = vmatprep.subr.bf16.mxu1 %v6612_v61  ;;  %5189 = vmatprep.subr.bf16.mxu0 %v5856_v49 }
 0xa4d   :  { %5165 = vmatpush1.bf16.msra.mxu1 %v6616_v16  ;;  %5191 = vmatpush3.bf16.msra.mxu0 %v6618_v19 }
 0xa4e   :  { %5167 = vmatprep.subr.bf16.mxu1 %v6622_v29  ;;  %5192 = vmatprep.subr.bf16.mxu0 %v5856_v49 }
 0xa51   :  { %5169 = vmatpush1.bf16.msra.mxu1 %v6626_v31  ;;  %5194 = vmatpush3.bf16.msra.mxu0 %v6628_v1 }
 0xa52   :  { %5171 = vmatprep.subr.bf16.mxu1 %v6632_v3  ;;  %5195 = vmatprep.subr.bf16.mxu0 %v5856_v49 }
 0xa55   :  { %5173 = vmatpush1.bf16.msra.mxu1 %v6637_v21  ;;  %5197 = vmatpush3.bf16.msra.mxu0 %v6639_v30 }
 0xa56   :  { %5199 = vmatprep.subr.bf16.mxu1 %v6544_v39  ;;  %5230 = vmatprep.subr.bf16.mxu0 %v5856_v49 }
 0xa58   :  { %2447 = vmatmul.mubr.f32.vlgmr.msra.gmra.mrb[22].mxu1 %v6646_v23  ;;  %4346 = vmatmul.mubr.f32.vlgmr.msra.gmra.mrb[28].mxu0 %v6646_v23 }
 0xa59   :  { %5201 = vmatpush1.bf16.msra.mxu1 %v6565_v25  ;;  %5232 = vmatpush3.bf16.msra.mxu0 %v6567_v28 }
 0xa5a   :  { %5203 = vmatprep.subr.bf16.mxu1 %v6569_v44  ;;  %5233 = vmatprep.subr.bf16.mxu0 %v5856_v49 }
 0xa5b   :  { %2628 = vmatprep.mubr.f32.mxu1 %v5855_v10  ;;  %4380 = vmatprep.mubr.msk.f32.mxu0 %vm5857_vm7, %v5855_v10 }
 0xa5d   :  { %5205 = vmatpush1.bf16.msra.mxu1 %v6573_v59  ;;  %5235 = vmatpush3.bf16.msra.mxu0 %v6575_v60 }
 0xa5e   :  { %5207 = vmatprep.subr.bf16.mxu1 %v6579_v4  ;;  %5236 = vmatprep.subr.bf16.mxu0 %v5856_v49 }
 0xa61   :  { %5209 = vmatpush1.bf16.msra.mxu1 %v6586_v40  ;;  %5238 = vmatpush3.bf16.msra.mxu0 %v6588_v18 }
 0xa62   :  { %5211 = vmatprep.subr.bf16.mxu1 %v6592_v50  ;;  %5239 = vmatprep.subr.bf16.mxu0 %v5856_v49 }
 0xa65   :  { %5213 = vmatpush1.bf16.msra.mxu1 %v6596_v35  ;;  %5241 = vmatpush3.bf16.msra.mxu0 %v6598_v22 }
 0xa66   :  { %5215 = vmatprep.subr.bf16.mxu1 %v6602_v41  ;;  %5242 = vmatprep.subr.bf16.mxu0 %v5856_v49 }
 0xa69   :  { %5217 = vmatpush1.bf16.msra.mxu1 %v6606_v0  ;;  %5244 = vmatpush3.bf16.msra.mxu0 %v6608_v62 }
 0xa6a   :  { %5219 = vmatprep.subr.bf16.mxu1 %v6612_v61  ;;  %5245 = vmatprep.subr.bf16.mxu0 %v5856_v49 }
 0xa6d   :  { %5221 = vmatpush1.bf16.msra.mxu1 %v6616_v16  ;;  %5247 = vmatpush3.bf16.msra.mxu0 %v6618_v19 }
 0xa6e   :  { %5223 = vmatprep.subr.bf16.mxu1 %v6622_v29  ;;  %5248 = vmatprep.subr.bf16.mxu0 %v5856_v49 }
 0xa71   :  { %5225 = vmatpush1.bf16.msra.mxu1 %v6626_v31  ;;  %5250 = vmatpush3.bf16.msra.mxu0 %v6628_v1 }
 0xa72   :  { %5227 = vmatprep.subr.bf16.mxu1 %v6632_v3  ;;  %5251 = vmatprep.subr.bf16.mxu0 %v5856_v49 }
 0xa75   :  { %5229 = vmatpush1.bf16.msra.mxu1 %v6637_v21  ;;  %5253 = vmatpush3.bf16.msra.mxu0 %v6639_v30 }
 0xa76   :  { %5255 = vmatprep.subr.bf16.mxu1 %v6544_v39  ;;  %5286 = vmatprep.subr.bf16.mxu0 %v5856_v49 }
 0xb0b   :  { %v2251_v36 = vpop.f32.mrb[20].mxu1  ;;  %v2322_v42 = vpop.f32.mrb[26].mxu0 }
 0xb0c   :  { %v2252_v43 = vadd.f32 %v2251_v36, %v2173_v55  ;;  %v2323_v45 = vadd.f32 %v2322_v42, %v2181_v26  ;;  %v2253_v46 = vpop.f32.mrb[21].mxu1  ;;  %v4312_v51 = vpop.f32.mrb[27].mxu0 }
 0xb0d   :  { %v2254_v2 = vadd.f32 %v2253_v46, %v2177_v33 }
 0xb0e   :  { %v2328_v14 = vadd.f32 %v2252_v43, %v6553_v53  ;;  %v2330_v63 = vadd.f32 %v2323_v45, %v6519_v37  ;;  %v2555_v5 = vrot.slane %v2252_v43, 6  ;;  %v2557_v9 = vrot.slane %v2323_v45, 6 }
 0xb0f   :  { %v2329_v13 = vadd.f32 %v2254_v2, %v6555_v54  ;;  %v2556_v11 = vrot.slane %v2254_v2, 6  ;;  %v2739_v7 = vrot.slane %v2252_v43, 4  ;;  %v2741_v8 = vrot.slane %v2323_v45, 4 }
 0xb10   :  { %v6698_v17 = vadd.f32 %v2555_v5, %v6553_v53  ;;  %v6701_v20 = vadd.f32 %v2557_v9, %v6519_v37  ;;  %v2740_v38 = vrot.slane %v2254_v2, 4  ;;  %v2925_v47 = vrot.slane %v2252_v43, 2 }
 0xb11   :  { %v6704_v48 = vadd.f32 %v2556_v11, %v6555_v54  ;;  %v6707_v27 = vadd.f32 %v2739_v7, %v6553_v53  ;;  %v6710_v56 = vadd.f32 %v2741_v8, %v6519_v37  ;;  %v2927_v6 = vrot.slane %v2323_v45, 2 }
 0xb12   :  { %v6713_v12 = vadd.f32 %v2740_v38, %v6555_v54  ;;  %v6716_v32 = vadd.f32 %v2925_v47, %v6553_v53  ;;  %v2926_v15 = vrot.slane %v2254_v2, 2  ;;  %v6719_v24 = vadd.f32 %v2252_v43, %v6557_v57 }
 0xb13   :  { %v6722_v52 = vadd.f32 %v2927_v6, %v6519_v37  ;;  %v6725_v55 = vadd.f32 %v6517_v34, %v2323_v45  ;;  %v6728_v26 = vadd.f32 %v2254_v2, %v6559_v58  ;;  %v6731_v33 = vadd.f32 %v2555_v5, %v6557_v57 }
 0xb14   :  { %v6734_v36 = vadd.f32 %v2926_v15, %v6555_v54  ;;  %v6737_v53 = vadd.f32 %v6517_v34, %v2557_v9  ;;  %v6740_v42 = vadd.f32 %v2556_v11, %v6559_v58  ;;  %v6745_v34 = vld [vmem:[%s7035_s12] ss:$0 sm:$0xff] }
 0xb2b   :  { %v2448_v37 = vpop.f32.mrb[22].mxu1  ;;  %v2519_v43 = vpop.f32.mrb[28].mxu0 }
 0xb2c   :  { %v2523_v46 = vadd.f32 %v2448_v37, %v2328_v14  ;;  %v2450_v45 = vpop.f32.mrb[23].mxu1  ;;  %v4347_v51 = vpop.f32.mrb[29].mxu0  ;;  %v2544_v9 = vadd.f32 %v6745_v34, %v2519_v43 }
 0xb2d   :  { %v2530_v7 = vadd.f32 %v2450_v45, %v2329_v13 }
 0xb2e   :  { %v3665_v2 = vmul.f32 -1.442695, %v2523_v46 }
 0xb2f   :  { %v3666_v8 = vmul.f32 -1.442695, %v2530_v7 }
 0xb30   :  { %5611 = vpow2.f32 %v3665_v2 }
 0xb31   :  { %5613 = vpow2.f32 %v3666_v8 }
 0xb3a   :  { %v5612_v57 = vpop.eup %5611 }
 0xb3b   :  { %v2527_v5 = vadd.f32 1.0, %v5612_v57  ;;  %v5614_v54 = vpop.eup %5613 }
 0xb3c   :  { %v2534_v58 = vadd.f32 1.0, %v5614_v54 }
 0xb3d   :  { %5615 = vrcp.f32 %v2527_v5 }
 0xb3e   :  { %5617 = vrcp.f32 %v2534_v58 }
 0xb47   :  { %v5616_v14 = vpop.eup %5615 }
 0xb48   :  { %v2545_v11 = vmul.f32 %v5616_v14, %v2544_v9  ;;  %v5618_v38 = vpop.eup %5617 }
 0xb49   :  { %v2548_v47 = vsub.f32 1.0, %v5618_v38  ;;  %v2550_v37 = vmul.f32 %v5618_v38, %v6646_v23 }
 0xb4a   :  { %v2546_v13 = vadd.f32 %v2545_v11, %v2330_v63 }
 0xb4c   :  { %5619 = vtanh.f32 %v2546_v13 }
 0xb56   :  { %v5620_v6 = vpop.eup %5619 }
 0xb57   :  { %v2549_v15 = vmul.f32 %v5620_v6, %v2548_v47 }
 0xb59   :  { %v6749_v46 = vadd.f32 %v2550_v37, %v2549_v15 }
 0xb5b   :  { %2629 = vmatmul.mubr.f32.vlgmr.msra.gmra.mrb[24].mxu1 %v6749_v46  ;;  %4381 = vmatmul.mubr.f32.vlgmr.msra.gmra.mrb[30].mxu0 %v6749_v46  ;;  %v2735_v15 = vrot.slane %v6749_v46, 6 }
 0xb5c   :  { %5257 = vmatpush1.bf16.msra.mxu1 %v6565_v25  ;;  %5288 = vmatpush3.bf16.msra.mxu0 %v6567_v28 }
 0xb5d   :  { %5259 = vmatprep.subr.bf16.mxu1 %v6569_v44  ;;  %5289 = vmatprep.subr.bf16.mxu0 %v5856_v49 }
 0xb5e   :  { %2815 = vmatprep.mubr.f32.mxu1 %v5855_v10  ;;  %4415 = vmatprep.mubr.msk.f32.mxu0 %vm5857_vm7, %v5855_v10 }
 0xb60   :  { %5261 = vmatpush1.bf16.msra.mxu1 %v6573_v59  ;;  %5291 = vmatpush3.bf16.msra.mxu0 %v6575_v60 }
 0xb61   :  { %5263 = vmatprep.subr.bf16.mxu1 %v6579_v4  ;;  %5292 = vmatprep.subr.bf16.mxu0 %v5856_v49 }
 0xb64   :  { %5265 = vmatpush1.bf16.msra.mxu1 %v6586_v40  ;;  %5294 = vmatpush3.bf16.msra.mxu0 %v6588_v18 }
 0xb65   :  { %5267 = vmatprep.subr.bf16.mxu1 %v6592_v50  ;;  %5295 = vmatprep.subr.bf16.mxu0 %v5856_v49 }
 0xb68   :  { %5269 = vmatpush1.bf16.msra.mxu1 %v6596_v35  ;;  %5297 = vmatpush3.bf16.msra.mxu0 %v6598_v22 }
 0xb69   :  { %5271 = vmatprep.subr.bf16.mxu1 %v6602_v41  ;;  %5298 = vmatprep.subr.bf16.mxu0 %v5856_v49 }
 0xb6c   :  { %5273 = vmatpush1.bf16.msra.mxu1 %v6606_v0  ;;  %5300 = vmatpush3.bf16.msra.mxu0 %v6608_v62 }
 0xb6d   :  { %5275 = vmatprep.subr.bf16.mxu1 %v6612_v61  ;;  %5301 = vmatprep.subr.bf16.mxu0 %v5856_v49 }
 0xb70   :  { %5277 = vmatpush1.bf16.msra.mxu1 %v6616_v16  ;;  %5303 = vmatpush3.bf16.msra.mxu0 %v6618_v19 }
 0xb71   :  { %5279 = vmatprep.subr.bf16.mxu1 %v6622_v29  ;;  %5304 = vmatprep.subr.bf16.mxu0 %v5856_v49 }
 0xb74   :  { %5281 = vmatpush1.bf16.msra.mxu1 %v6626_v31  ;;  %5306 = vmatpush3.bf16.msra.mxu0 %v6628_v1 }
 0xb75   :  { %5283 = vmatprep.subr.bf16.mxu1 %v6632_v3  ;;  %5307 = vmatprep.subr.bf16.mxu0 %v5856_v49 }
 0xb78   :  { %5285 = vmatpush1.bf16.msra.mxu1 %v6637_v21  ;;  %5309 = vmatpush3.bf16.msra.mxu0 %v6639_v30 }
 0xb79   :  { %5311 = vmatprep.subr.bf16.mxu1 %v6544_v39  ;;  %5342 = vmatprep.subr.bf16.mxu0 %v5856_v49 }
 0xc2e   :  { %v2630_v23 = vpop.f32.mrb[24].mxu1  ;;  %v2701_v63 = vpop.f32.mrb[30].mxu0 }
 0xc2f   :  { %v2706_v43 = vrot.slane %v2630_v23, 6  ;;  %v2632_v45 = vpop.f32.mrb[25].mxu1  ;;  %v4382_v51 = vpop.f32.mrb[31].mxu0  ;;  %v2725_v14 = vadd.f32 %v6745_v34, %v2701_v63 }
 0xc30   :  { %v2716_v7 = vrot.slane %v2632_v45, 6 }
 0xc31   :  { %v2708_v2 = vadd.f32 %v2706_v43, %v6698_v17  ;;  %v2727_v13 = vrot.slane %v2725_v14, 6 }
 0xc32   :  { %v2718_v8 = vadd.f32 %v2716_v7, %v6704_v48 }
 0xc33   :  { %v3668_v57 = vmul.f32 -1.442695, %v2708_v2 }
 0xc34   :  { %v3669_v5 = vmul.f32 -1.442695, %v2718_v8 }
 0xc35   :  { %5621 = vpow2.f32 %v3668_v57 }
 0xc36   :  { %5623 = vpow2.f32 %v3669_v5 }
 0xc3f   :  { %v5622_v54 = vpop.eup %5621 }
 0xc40   :  { %v2712_v58 = vadd.f32 1.0, %v5622_v54  ;;  %v5624_v9 = vpop.eup %5623 }
 0xc41   :  { %v2722_v11 = vadd.f32 1.0, %v5624_v9 }
 0xc42   :  { %5625 = vrcp.f32 %v2712_v58 }
 0xc43   :  { %5627 = vrcp.f32 %v2722_v11 }
 0xc4c   :  { %v5626_v38 = vpop.eup %5625 }
 0xc4d   :  { %v2729_v47 = vmul.f32 %v5626_v38, %v2727_v13  ;;  %v5628_v17 = vpop.eup %5627 }
 0xc4e   :  { %v2732_v48 = vsub.f32 1.0, %v5628_v17  ;;  %v2737_v43 = vmul.f32 %v5628_v17, %v2735_v15 }
 0xc4f   :  { %v2730_v6 = vadd.f32 %v2729_v47, %v6701_v20 }
 0xc51   :  { %5629 = vtanh.f32 %v2730_v6 }
 0xc5b   :  { %v5630_v37 = vpop.eup %5629 }
 0xc5c   :  { %v2733_v23 = vmul.f32 %v5630_v37, %v2732_v48 }
 0xc5e   :  { %v6793_v45 = vadd.f32 %v2737_v43, %v2733_v23 }
 0xc60   :  { %v2749_v51 = vrot.slane %v6793_v45, 2  ;;  %v2921_v48 = vrot.slane %v6793_v45, 6 }
 0xc62   :  { %2816 = vmatmul.mubr.f32.vlgmr.msra.gmra.mrb[26].mxu1 %v2749_v51  ;;  %4416 = vmatmul.mubr.f32.vlgmr.msra.gmra.mrb[32].mxu0 %v2749_v51 }
 0xc63   :  { %5313 = vmatpush1.bf16.msra.mxu1 %v6565_v25  ;;  %5344 = vmatpush3.bf16.msra.mxu0 %v6567_v28 }
 0xc64   :  { %5315 = vmatprep.subr.bf16.mxu1 %v6569_v44  ;;  %5345 = vmatprep.subr.bf16.mxu0 %v5856_v49 }
 0xc65   :  { %3001 = vmatprep.mubr.f32.mxu1 %v5855_v10  ;;  %4450 = vmatprep.mubr.msk.f32.mxu0 %vm5857_vm7, %v5855_v10 }
 0xc67   :  { %5317 = vmatpush1.bf16.msra.mxu1 %v6573_v59  ;;  %5347 = vmatpush3.bf16.msra.mxu0 %v6575_v60 }
 0xc68   :  { %5319 = vmatprep.subr.bf16.mxu1 %v6579_v4  ;;  %5348 = vmatprep.subr.bf16.mxu0 %v5856_v49 }
 0xc6b   :  { %5321 = vmatpush1.bf16.msra.mxu1 %v6586_v40  ;;  %5350 = vmatpush3.bf16.msra.mxu0 %v6588_v18 }
 0xc6c   :  { %5323 = vmatprep.subr.bf16.mxu1 %v6592_v50  ;;  %5351 = vmatprep.subr.bf16.mxu0 %v5856_v49 }
 0xc6f   :  { %5325 = vmatpush1.bf16.msra.mxu1 %v6596_v35  ;;  %5353 = vmatpush3.bf16.msra.mxu0 %v6598_v22 }
 0xc70   :  { %5327 = vmatprep.subr.bf16.mxu1 %v6602_v41  ;;  %5354 = vmatprep.subr.bf16.mxu0 %v5856_v49 }
 0xc73   :  { %5329 = vmatpush1.bf16.msra.mxu1 %v6606_v0  ;;  %5356 = vmatpush3.bf16.msra.mxu0 %v6608_v62 }
 0xc74   :  { %5331 = vmatprep.subr.bf16.mxu1 %v6612_v61  ;;  %5357 = vmatprep.subr.bf16.mxu0 %v5856_v49 }
 0xc77   :  { %5333 = vmatpush1.bf16.msra.mxu1 %v6616_v16  ;;  %5359 = vmatpush3.bf16.msra.mxu0 %v6618_v19 }
 0xc78   :  { %5335 = vmatprep.subr.bf16.mxu1 %v6622_v29  ;;  %5360 = vmatprep.subr.bf16.mxu0 %v5856_v49 }
 0xc7b   :  { %5337 = vmatpush1.bf16.msra.mxu1 %v6626_v31  ;;  %5362 = vmatpush3.bf16.msra.mxu0 %v6628_v1 }
 0xc7c   :  { %5339 = vmatprep.subr.bf16.mxu1 %v6632_v3  ;;  %5363 = vmatprep.subr.bf16.mxu0 %v5856_v49 }
 0xc7f   :  { %5341 = vmatpush1.bf16.msra.mxu1 %v6637_v21  ;;  %5365 = vmatpush3.bf16.msra.mxu0 %v6639_v30 }
 0xc80   :  { %5367 = vmatprep.subr.bf16.mxu1 %v6544_v39  ;;  %5398 = vmatprep.subr.bf16.mxu0 %v5856_v49 }
 0xd35   :  { %v2817_v20 = vpop.f32.mrb[26].mxu1  ;;  %v2888_v63 = vpop.f32.mrb[32].mxu0 }
 0xd36   :  { %v2893_v7 = vrot.slane %v2817_v20, 4  ;;  %v2819_v2 = vpop.f32.mrb[27].mxu1  ;;  %v4417_v8 = vpop.f32.mrb[33].mxu0  ;;  %v2912_v47 = vadd.f32 %v6745_v34, %v2888_v63  ;;  %v3458_v20 = vrot.slane %v6793_v45, 1 }
 0xd37   :  { %v2903_v57 = vrot.slane %v2819_v2, 4 }
 0xd38   :  { %v2895_v5 = vadd.f32 %v2893_v7, %v6707_v27  ;;  %v2914_v6 = vrot.slane %v2912_v47, 4  ;;  %v3478_v8 = vsel %vm3477_vm12, %v6749_v46, %v3458_v20 }
 0xd39   :  { %v2905_v54 = vadd.f32 %v2903_v57, %v6713_v12 }
 0xd3a   :  { %v3670_v58 = vmul.f32 -1.442695, %v2895_v5 }
 0xd3b   :  { %v3671_v9 = vmul.f32 -1.442695, %v2905_v54 }
 0xd3c   :  { %5631 = vpow2.f32 %v3670_v58 }
 0xd3d   :  { %5633 = vpow2.f32 %v3671_v9 }
 0xd46   :  { %v5632_v14 = vpop.eup %5631 }
 0xd47   :  { %v5634_v11 = vpop.eup %5633  ;;  %v2899_v13 = vadd.f32 1.0, %v5632_v14 }
 0xd48   :  { %v2909_v38 = vadd.f32 1.0, %v5634_v11 }
 0xd49   :  { %5635 = vrcp.f32 %v2899_v13 }
 0xd4a   :  { %5637 = vrcp.f32 %v2909_v38 }
 0xd53   :  { %v5636_v17 = vpop.eup %5635 }
 0xd54   :  { %v5638_v15 = vpop.eup %5637  ;;  %v2916_v27 = vmul.f32 %v5636_v17, %v2914_v6 }
 0xd55   :  { %v2923_v37 = vmul.f32 %v5638_v15, %v2921_v48  ;;  %v2919_v23 = vsub.f32 1.0, %v5638_v15 }
 0xd56   :  { %v2917_v12 = vadd.f32 %v2916_v27, %v6710_v56 }
 0xd58   :  { %5639 = vtanh.f32 %v2917_v12 }
 0xd62   :  { %v5640_v43 = vpop.eup %5639 }
 0xd63   :  { %v2920_v51 = vmul.f32 %v5640_v43, %v2919_v23 }
 0xd65   :  { %v6837_v7 = vadd.f32 %v2923_v37, %v2920_v51 }
 0xd67   :  { %v2935_v63 = vrot.slane %v6837_v7, 4  ;;  %v3460_v2 = vrot.slane %v6837_v7, 2  ;;  %v3107_v12 = vrot.slane %v6837_v7, 6 }
 0xd69   :  { %3002 = vmatmul.mubr.f32.vlgmr.msra.gmra.mrb[28].mxu1 %v2935_v63  ;;  %4451 = vmatmul.mubr.f32.vlgmr.msra.gmra.mrb[34].mxu0 %v2935_v63  ;;  %v6844_v56 = vsel %vm3479_vm13, %v3478_v8, %v3460_v2 }
 0xd6a   :  { %5369 = vmatpush1.bf16.msra.mxu1 %v6565_v25  ;;  %5400 = vmatpush3.bf16.msra.mxu0 %v6567_v28 }
 0xd6b   :  { %5371 = vmatprep.subr.bf16.mxu1 %v6569_v44  ;;  %5401 = vmatprep.subr.bf16.mxu0 %v5856_v49 }
 0xd6c   :  { %3181 = vmatprep.mubr.f32.mxu1 %v5855_v10  ;;  %4485 = vmatprep.mubr.msk.f32.mxu0 %vm5857_vm7, %v5855_v10 }
 0xd6e   :  { %5373 = vmatpush1.bf16.msra.mxu1 %v6573_v59  ;;  %5403 = vmatpush3.bf16.msra.mxu0 %v6575_v60 }
 0xd6f   :  { %5375 = vmatprep.subr.bf16.mxu1 %v6579_v4  ;;  %5404 = vmatprep.subr.bf16.mxu0 %v5856_v49 }
 0xd72   :  { %5377 = vmatpush1.bf16.msra.mxu1 %v6586_v40  ;;  %5406 = vmatpush3.bf16.msra.mxu0 %v6588_v18 }
 0xd73   :  { %5379 = vmatprep.subr.bf16.mxu1 %v6592_v50  ;;  %5407 = vmatprep.subr.bf16.mxu0 %v5856_v49 }
 0xd76   :  { %5381 = vmatpush1.bf16.msra.mxu1 %v6596_v35  ;;  %5409 = vmatpush3.bf16.msra.mxu0 %v6598_v22 }
 0xd77   :  { %5383 = vmatprep.subr.bf16.mxu1 %v6602_v41  ;;  %5410 = vmatprep.subr.bf16.mxu0 %v5856_v49 }
 0xd7a   :  { %5385 = vmatpush1.bf16.msra.mxu1 %v6606_v0  ;;  %5412 = vmatpush3.bf16.msra.mxu0 %v6608_v62 }
 0xd7b   :  { %5387 = vmatprep.subr.bf16.mxu1 %v6612_v61  ;;  %5413 = vmatprep.subr.bf16.mxu0 %v5856_v49 }
 0xd7e   :  { %5389 = vmatpush1.bf16.msra.mxu1 %v6616_v16  ;;  %5415 = vmatpush3.bf16.msra.mxu0 %v6618_v19 }
 0xd7f   :  { %5391 = vmatprep.subr.bf16.mxu1 %v6622_v29  ;;  %5416 = vmatprep.subr.bf16.mxu0 %v5856_v49 }
 0xd82   :  { %5393 = vmatpush1.bf16.msra.mxu1 %v6626_v31  ;;  %5418 = vmatpush3.bf16.msra.mxu0 %v6628_v1 }
 0xd83   :  { %5395 = vmatprep.subr.bf16.mxu1 %v6632_v3  ;;  %5419 = vmatprep.subr.bf16.mxu0 %v5856_v49 }
 0xd86   :  { %5397 = vmatpush1.bf16.msra.mxu1 %v6637_v21  ;;  %5421 = vmatpush3.bf16.msra.mxu0 %v6639_v30 }
 0xd87   :  { %5423 = vmatprep.subr.bf16.mxu1 %v6544_v39  ;;  %5454 = vmatprep.subr.bf16.mxu0 %v5856_v49 }
 0xe3c   :  { %v3003_v57 = vpop.f32.mrb[28].mxu1  ;;  %v3074_v5 = vpop.f32.mrb[34].mxu0 }
 0xe3d   :  { %v3079_v54 = vrot.slane %v3003_v57, 2  ;;  %v3005_v58 = vpop.f32.mrb[29].mxu1  ;;  %v4452_v9 = vpop.f32.mrb[35].mxu0  ;;  %v3098_v15 = vadd.f32 %v6745_v34, %v3074_v5 }
 0xe3e   :  { %v3089_v14 = vrot.slane %v3005_v58, 2  ;;  %v3497_v58 = vld [vmem:[%s7038_s15 + $0x18] sm:$0xff] }
 0xe3f   :  { %v3081_v11 = vadd.f32 %v3079_v54, %v6716_v32  ;;  %v3100_v27 = vrot.slane %v3098_v15, 2  ;;  %v3496_v54 = vld [vmem:[%s7038_s15 + $0x10] sm:$0xff] }
 0xe40   :  { %v3091_v13 = vadd.f32 %v3089_v14, %v6734_v36  ;;  %v5482_v9 = vpack.c.bf16 %v3497_v58, %v3496_v54  ;;  %v3498_v14 = vld [vmem:[%s7038_s15 + $0x20] sm:$0xff]  ;;  %v3504_v15 = vld [vmem:[%s7038_s15 + $0x50] sm:$0xff] }
 0xe41   :  { %v3672_v38 = vmul.f32 -1.442695, %v3081_v11  ;;  %v3499_v11 = vld [vmem:[%s7038_s15 + $0x28] sm:$0xff] }
 0xe42   :  { %v3673_v47 = vmul.f32 -1.442695, %v3091_v13  ;;  %v5486_v13 = vpack.c.bf16 %v3499_v11, %v3498_v14 }
 0xe43   :  { %5641 = vpow2.f32 %v3672_v38  ;;  %v3500_v38 = vld [vmem:[%s7038_s15 + $0x30] sm:$0xff] }
 0xe44   :  { %5643 = vpow2.f32 %v3673_v47  ;;  %v3501_v47 = vld [vmem:[%s7038_s15 + $0x38] sm:$0xff] }
 0xe4d   :  { %v5642_v6 = vpop.eup %5641 }
 0xe4e   :  { %v5644_v17 = vpop.eup %5643  ;;  %v3085_v48 = vadd.f32 1.0, %v5642_v6  ;;  %v3502_v6 = vld [vmem:[%s7038_s15 + $0x40] sm:$0xff] }
 0xe4f   :  { %v3095_v39 = vadd.f32 1.0, %v5644_v17  ;;  %v5490_v17 = vpack.c.bf16 %v3501_v47, %v3500_v38 }
 0xe50   :  { %5645 = vrcp.f32 %v3085_v48  ;;  %v3503_v48 = vld [vmem:[%s7038_s15 + $0x48] sm:$0xff] }
 0xe51   :  { %5647 = vrcp.f32 %v3095_v39  ;;  %v5494_v39 = vpack.c.bf16 %v3503_v48, %v3502_v6 }
 0xe5a   :  { %v5646_v37 = vpop.eup %5645 }
 0xe5b   :  { %v5648_v23 = vpop.eup %5647  ;;  %v3102_v32 = vmul.f32 %v5646_v37, %v3100_v27  ;;  %v3505_v27 = vld [vmem:[%s7038_s15 + $0x58] sm:$0xff] }
 0xe5c   :  { %v3109_v43 = vmul.f32 %v5648_v23, %v3107_v12  ;;  %v3105_v51 = vsub.f32 1.0, %v5648_v23  ;;  %v5498_v37 = vpack.c.bf16 %v3505_v27, %v3504_v15  ;;  %v3506_v12 = vld [vmem:[%s7038_s15 + $0x60] sm:$0xff]  ;;  %v3507_v23 = vld [vmem:[%s7038_s15 + $0x68] sm:$0xff] }
 0xe5d   :  { %v3103_v36 = vadd.f32 %v3102_v32, %v6722_v52  ;;  %v5502_v32 = vpack.c.bf16 %v3507_v23, %v3506_v12 }
 0xe5f   :  { %5649 = vtanh.f32 %v3103_v36  ;;  %v3509_v36 = vld [vmem:[%s7038_s15 + $0x78] sm:$0xff] }
 0xe69   :  { %v5650_v20 = vpop.eup %5649 }
 0xe6a   :  { %v3106_v63 = vmul.f32 %v5650_v20, %v3105_v51 }
 0xe6c   :  { %v3110_v2 = vadd.f32 %v3109_v43, %v3106_v63  ;;  %v3508_v43 = vld [vmem:[%s7038_s15 + $0x70] sm:$0xff] }
 0xe6d   :  { %v5506_v51 = vpack.c.bf16 %v3509_v36, %v3508_v43 }
 0xe6e   :  { %v6886_v8 = vrot.slane %v3110_v2, 6  ;;  %v3462_v57 = vrot.slane %v3110_v2, 3 }
 0xe70   :  { %3182 = vmatmul.mubr.f32.vlgmr.msra.gmra.mrb[30].mxu1 %v6886_v8  ;;  %4486 = vmatmul.mubr.f32.vlgmr.msra.gmra.mrb[36].mxu0 %v6886_v8  ;;  %v6892_v5 = vsel %vm3481_vm14, %v6844_v56, %v3462_v57 }
 0xe71   :  { %5425 = vmatpush1.bf16.msra.mxu1 %v6565_v25  ;;  %5456 = vmatpush3.bf16.msra.mxu0 %v6567_v28 }
 0xe72   :  { %5427 = vmatprep.subr.bf16.mxu1 %v6569_v44  ;;  %5457 = vmatprep.subr.bf16.mxu0 %v5856_v49 }
 0xe73   :  { %3347 = vmatprep.mubr.f32.mxu1 %v5855_v10  ;;  %4520 = vmatprep.mubr.msk.f32.mxu0 %vm5857_vm7, %v5855_v10 }
 0xe75   :  { %5429 = vmatpush1.bf16.msra.mxu1 %v6573_v59  ;;  %5459 = vmatpush3.bf16.msra.mxu0 %v6575_v60 }
 0xe76   :  { %5431 = vmatprep.subr.bf16.mxu1 %v6579_v4  ;;  %5460 = vmatprep.subr.bf16.mxu0 %v5856_v49 }
 0xe79   :  { %5433 = vmatpush1.bf16.msra.mxu1 %v6586_v40  ;;  %5462 = vmatpush3.bf16.msra.mxu0 %v6588_v18 }
 0xe7a   :  { %5435 = vmatprep.subr.bf16.mxu1 %v6592_v50  ;;  %5463 = vmatprep.subr.bf16.mxu0 %v5856_v49 }
 0xe7d   :  { %5437 = vmatpush1.bf16.msra.mxu1 %v6596_v35  ;;  %5465 = vmatpush3.bf16.msra.mxu0 %v6598_v22 }
 0xe7e   :  { %5439 = vmatprep.subr.bf16.mxu1 %v6602_v41  ;;  %5466 = vmatprep.subr.bf16.mxu0 %v5856_v49 }
 0xe81   :  { %5441 = vmatpush1.bf16.msra.mxu1 %v6606_v0  ;;  %5468 = vmatpush3.bf16.msra.mxu0 %v6608_v62 }
 0xe82   :  { %5443 = vmatprep.subr.bf16.mxu1 %v6612_v61  ;;  %5469 = vmatprep.subr.bf16.mxu0 %v5856_v49 }
 0xe85   :  { %5445 = vmatpush1.bf16.msra.mxu1 %v6616_v16  ;;  %5471 = vmatpush3.bf16.msra.mxu0 %v6618_v19 }
 0xe86   :  { %5447 = vmatprep.subr.bf16.mxu1 %v6622_v29  ;;  %5472 = vmatprep.subr.bf16.mxu0 %v5856_v49 }
 0xe89   :  { %5449 = vmatpush1.bf16.msra.mxu1 %v6626_v31  ;;  %5474 = vmatpush3.bf16.msra.mxu0 %v6628_v1 }
 0xe8a   :  { %5451 = vmatprep.subr.bf16.mxu1 %v6632_v3  ;;  %5475 = vmatprep.subr.bf16.mxu0 %v5856_v49  ;;  %v3473_v3 = vrot.slane %v6837_v7, 5  ;;  %v3495_v7 = vld [vmem:[%s7038_s15 + $0x8] sm:$0xff] }
 0xe8d   :  { %5453 = vmatpush1.bf16.msra.mxu1 %v6637_v21  ;;  %5477 = vmatpush3.bf16.msra.mxu0 %v6639_v30 }
 0xf43   :  { %v3183_v10 = vpop.f32.mrb[30].mxu1  ;;  %v3254_v25 = vpop.f32.mrb[36].mxu0 }
 0xf44   :  { %v3258_v28 = vadd.f32 %v3183_v10, %v6719_v24  ;;  %v3185_v44 = vpop.f32.mrb[31].mxu1  ;;  %v4487_v59 = vpop.f32.mrb[37].mxu0  ;;  %v3272_v22 = vadd.f32 %v6745_v34, %v3254_v25  ;;  %v3491_v24 = vsel %vm3477_vm12, %v3473_v3, %v6886_v8 }
 0xf45   :  { %v3265_v60 = vadd.f32 %v3185_v44, %v6728_v26  ;;  %v3494_v26 = vld [vmem:[%s7038_s15] sm:$0xff] }
 0xf46   :  { %v3674_v4 = vmul.f32 -1.442695, %v3258_v28  ;;  %v5478_v56 = vpack.c.bf16 %v3495_v7, %v3494_v26 }
 0xf47   :  { %v3675_v40 = vmul.f32 -1.442695, %v3265_v60 }
 0xf48   :  { %5651 = vpow2.f32 %v3674_v4  ;;  %5479 = vmatprep.subr.bf16.mxu1 %v5478_v56 }
 0xf49   :  { %5653 = vpow2.f32 %v3675_v40 }
 0xf52   :  { %v5652_v18 = vpop.eup %5651 }
 0xf53   :  { %v3262_v50 = vadd.f32 1.0, %v5652_v18  ;;  %v5654_v49 = vpop.eup %5653 }
 0xf54   :  { %v3269_v35 = vadd.f32 1.0, %v5654_v49 }
 0xf55   :  { %5655 = vrcp.f32 %v3262_v50 }
 0xf56   :  { %5657 = vrcp.f32 %v3269_v35 }
 0xf5f   :  { %v5656_v41 = vpop.eup %5655 }
 0xf60   :  { %v3273_v0 = vmul.f32 %v5656_v41, %v3272_v22  ;;  %v5658_v61 = vpop.eup %5657 }
 0xf61   :  { %v3276_v16 = vsub.f32 1.0, %v5658_v61  ;;  %v3278_v31 = vmul.f32 %v5658_v61, %v6886_v8 }
 0xf62   :  { %v3274_v62 = vadd.f32 %v3273_v0, %v6725_v55 }
 0xf64   :  { %5659 = vtanh.f32 %v3274_v62 }
 0xf6e   :  { %v5660_v19 = vpop.eup %5659 }
 0xf6f   :  { %v3277_v29 = vmul.f32 %v5660_v19, %v3276_v16 }
 0xf71   :  { %v6932_v1 = vadd.f32 %v3278_v31, %v3277_v29  ;;  %v3469_v29 = vrot.slane %v6749_v46, 3  ;;  %v3471_v31 = vrot.slane %v6793_v45, 4 }
 0xf73   :  { %3348 = vmatmul.mubr.f32.vlgmr.msra.gmra.mrb[32].mxu1 %v6932_v1  ;;  %4521 = vmatmul.mubr.f32.vlgmr.msra.gmra.mrb[38].mxu0 %v6932_v1  ;;  %v3464_v21 = vrot.slane %v6932_v1, 4  ;;  %v3475_v30 = vrot.slane %v6932_v1, 7  ;;  %v3454_v35 = vrot.slane %v6932_v1, 6 }
 0xf74   :  { %5481 = vmatpush3.bf16.msra.mxu1 %v5478_v56 }
 0xf75   :  { %v6943_v52 = vsel %vm3483_vm15, %v6892_v5, %v3464_v21  ;;  %v6946_v55 = vsel %vm3479_vm13, %v3491_v24, %v3475_v30  ;;  %5483 = vmatprep.subr.bf16.mxu1 %v5482_v9  ;;  %v3678_v21 = vld [vmem:[%s7039_s16] ss:$0 sm:$0xff]  ;;  %s5858_s16 = smov [#allocation13]  }
 0xf76   :  { %s3621_s26 = sshll.u32 %s5858_s16, 4  ;;  %s3622_s26 = int_to_ptr.vmem [resolvable:$true] %s3621_s26 }
 0xf77   :  { %s5812_s13 = scalar_lea.vmem %s3622_s26, 256  ;;  %p5817_p7 = scmp.lt.s32.totalorder %s3622_s26, %s3622_s26 }
 0xf78   :  { %5485 = vmatpush3.bf16.msra.mxu1 %v5482_v9  ;;  %p5813_p6 = scmp.ne.s32.totalorder %s3622_s26, %s5812_s13  ;;  %p5818_p8 = scmp.lt.s32.totalorder %s5812_s13, %s5812_s13 }
 0xf79   :  { %5487 = vmatprep.subr.bf16.mxu1 %v5486_v13 }
 0xf7a   :  { %p5819_p9 = por %p5818_p8, %p5817_p7 }
 0xf7c   :  { %5489 = vmatpush3.bf16.msra.mxu1 %v5486_v13  ;;  %p5820_p10 = pnand %p5819_p9, %p5813_p6 }
 0xf7d   :  { %5491 = vmatprep.subr.bf16.mxu1 %v5490_v17 }
 0xf80   :  { %5493 = vmatpush3.bf16.msra.mxu1 %v5490_v17 }
 0xf81   :  { %5495 = vmatprep.subr.bf16.mxu1 %v5494_v39 }
 0xf84   :  { %5497 = vmatpush3.bf16.msra.mxu1 %v5494_v39 }
 0xf85   :  { %5499 = vmatprep.subr.bf16.mxu1 %v5498_v37 }
 0xf88   :  { %5501 = vmatpush3.bf16.msra.mxu1 %v5498_v37 }
 0xf89   :  { %5503 = vmatprep.subr.bf16.mxu1 %v5502_v32 }
 0xf8c   :  { %5505 = vmatpush3.bf16.msra.mxu1 %v5502_v32 }
 0xf8d   :  { %5507 = vmatprep.subr.bf16.mxu1 %v5506_v51 }
 0xf90   :  { %5509 = vmatpush3.bf16.msra.mxu1 %v5506_v51 }
0x1046   :  { %v3349_v20 = vpop.f32.mrb[32].mxu1  ;;  %v3420_v63 = vpop.f32.mrb[38].mxu0 }
0x1047   :  { %v3425_v2 = vrot.slane %v3349_v20, 6  ;;  %v3351_v8 = vpop.f32.mrb[33].mxu1  ;;  %v4522_v57 = vpop.f32.mrb[39].mxu0  ;;  %v3444_v18 = vadd.f32 %v6745_v34, %v3420_v63 }
0x1048   :  { %v3435_v5 = vrot.slane %v3351_v8, 6 }
0x1049   :  { %v3427_v10 = vadd.f32 %v3425_v2, %v6731_v33  ;;  %v3446_v50 = vrot.slane %v3444_v18, 6 }
0x104a   :  { %v3437_v25 = vadd.f32 %v3435_v5, %v6740_v42 }
0x104b   :  { %v3676_v28 = vmul.f32 -1.442695, %v3427_v10 }
0x104c   :  { %v3677_v44 = vmul.f32 -1.442695, %v3437_v25 }
0x104d   :  { %5661 = vpow2.f32 %v3676_v28 }
0x104e   :  { %5663 = vpow2.f32 %v3677_v44 }
0x1057   :  { %v5662_v59 = vpop.eup %5661 }
0x1058   :  { %v5664_v60 = vpop.eup %5663  ;;  %v3431_v4 = vadd.f32 1.0, %v5662_v59 }
0x1059   :  { %v3441_v40 = vadd.f32 1.0, %v5664_v60 }
0x105a   :  { %5665 = vrcp.f32 %v3431_v4 }
0x105b   :  { %5667 = vrcp.f32 %v3441_v40 }
0x1064   :  { %v5666_v49 = vpop.eup %5665 }
0x1065   :  { %v5668_v22 = vpop.eup %5667  ;;  %v3448_v33 = vmul.f32 %v5666_v49, %v3446_v50 }
0x1066   :  { %v3456_v41 = vmul.f32 %v5668_v22, %v3454_v35  ;;  %v3451_v0 = vsub.f32 1.0, %v5668_v22 }
0x1067   :  { %v3449_v42 = vadd.f32 %v3448_v33, %v6737_v53 }
0x1069   :  { %5669 = vtanh.f32 %v3449_v42 }
0x1073   :  { %v5670_v62 = vpop.eup %5669 }
0x1074   :  { %v3452_v61 = vmul.f32 %v5670_v62, %v3451_v0 }
0x1076   :  { %v3457_v16 = vadd.f32 %v3456_v41, %v3452_v61 }
0x1078   :  { %v3467_v19 = vrot.slane %v3457_v16, 5  ;;  %v3493_v34 = vsel %vm3481_vm14, %v6946_v55, %v3457_v16 }
0x107a   :  { %v3486_v1 = vsel %vm3485_vm0, %v6943_v52, %v3467_v19 }
0x107b   :  { %v3488_v3 = vsel %vm3487_vm1, %v3486_v1, %v3469_v29 }
0x107c   :  { %v3490_v53 = vsel %vm3489_vm2, %v3488_v3, %v3471_v31 }
0x107d   :  { %4555 = vmatprep.mubr.f32.mxu1 %v3490_v53 }
0x107e   :  { %4556 = vmatmul.mubr.f32.vlgmr.msra.gmra.mrb[34].mxu1 %v3493_v34 }
0x1151   :  { %v4557_v30 = vpop.f32.mrb[34].mxu1 }
0x1152   :  { %v3589_v24 = vadd.f32 %v4557_v30, %v3678_v21  ;;  %v3583_v26 = vpop.f32.mrb[35].mxu1 }
0x1153   :  { %v3584_v7 = vadd.f32 %v3678_v21, %v3583_v26 }
0x1154   :  { %v3594_v55 = vsel %vm3483_vm15, %v3589_v24, -inf }
0x1155   :  { %3595 = vmax.xlane.f32.xlu0 %v3594_v55  ;;  %3592 = vmax.xlane.f32.xlu1 %v3584_v7 }
0x11e2   :  { %v3596_v46 = vpop.xlane.xlu0 %3595  ;;  %v3593_v45 = vpop.xlane.xlu1 %3592 }
0x11e3   :  { %v3598_v56 = vsub.f32 %v3589_v24, %v3596_v46  ;;  %v3597_v52 = vsub.f32 %v3584_v7, %v3593_v45 }
0x11e5   :  { %v3601_v54 = vmul.f32 1.442695, %v3598_v56  ;;  %v3599_v58 = vmul.f32 1.442695, %v3597_v52 }
0x11e7   :  { %5671 = vpow2.f32 %v3599_v58 }
0x11e8   :  { %5673 = vpow2.f32 %v3601_v54 }
0x11f1   :  { %v5672_v9 = vpop.eup %5671 }
0x11f2   :  { %v5674_v14 = vpop.eup %5673  ;;  %3603 = vadd.xlane.f32.xlu0 %v5672_v9 }
0x11f3   :  { %v3605_v11 = vsel %vm3483_vm15, %v5674_v14, 0.0 }
0x11f6   :  { %3606 = vadd.xlane.f32.xlu0 %v3605_v11 }
0x127f   :  { %v3604_v13 = vpop.xlane.xlu0 %3603 }
0x1280   :  { %5675 = vlog2.f32 %v3604_v13 }
0x1283   :  { %v3607_v38 = vpop.xlane.xlu0 %3606 }
0x1284   :  { %5677 = vlog2.f32 %v3607_v38 }
0x128a   :  { %v5676_v47 = vpop.eup %5675 }
0x128b   :  { %v3609_v6 = vmul.f32 0.6931472, %v5676_v47 }
0x128d   :  { %v3612_v17 = vsub.f32 %v3597_v52, %v3609_v6 }
0x128e   :  { %v5678_v48 = vpop.eup %5677 }
0x128f   :  { %3614 = vst [vmem:[#allocation13] sm:$0xff] %v3612_v17  ;;  %v3611_v39 = vmul.f32 0.6931472, %v5678_v48 }
0x1291   :  { %v3613_v15 = vsub.f32 %v3598_v56, %v3611_v39 }
0x1293   :  { %3615 = vst [vmem:[#allocation13 + $0x8] sm:$0xf] %v3613_v15 }
0x1294   :  { %5823 = shalt.err (!%p5820_p10)
}
0x1295   :  { %s5824_s18 = scalar_lea.hbm %s7040_s17, 256 }
0x1296   :  { %p5825_p11 = scmp.ne.s32.totalorder %s7040_s17, %s5824_s18  ;;  %p5828_p12 = scmp.lt.u32.totalorder %s5824_s18, %s7040_s17 }
0x1298   :  { %p5830_p13 = pnand %p5828_p12, %p5825_p11 }
0x129a   :  { %5833 = shalt.err (!%p5830_p13)
}
0x129b   :  { %s5859_s2 = smov 128   ;;  %s5860_s6 = smov 8  }
0x129c   :  { %3627 = dma.vmem_to_hbm [thread:$0]  %s3622_s26, 256, %s7040_s17, [#allocation4], %s5859_s2, %s5859_s2, %s5860_s6  }
0x129d   :  { %5842 = dma.done.wait [#allocation4], 256  }
0x129e   :  { %5843 = vsyncadd [#allocation4], 4294967040 }
0x129f   :  { %3631 = vsyncpa [#allocation3], 1 }
0x12a0   :  { %3632 = vsyncpa [#allocation6], 1 }
0x12a1   :  { %3633 = vsyncpa [#allocation9], 1 }
0x12a2   :  { %3634 = vsyncpa [#allocation12], 1 }
0x12a3   :  { %3635 = vsyncpa [#allocation4], 1 }

</bundles_post_ra>
